<compile_context>
chip_gen: v5e
topology: v5e:2x2
jax: 0.10.0
libtpu: 0.0.40
codegen_flags: <defaults>
</compile_context>

<pallas_src>
import functools

import jax
import jax.numpy as jnp
from jax.experimental import pallas as pl
from jax.experimental.pallas import tpu as pltpu


# ----------------------------- config (small) -----------------------------
class Cfg:
    image_size = 16
    patch = 4
    channels = 3
    vis_hidden = 32
    vis_heads = 4
    vis_layers = 3
    extract_layers = (1, 2, 3)      # analogue of CLIPSeg's [3, 6, 9]
    txt_vocab = 64
    txt_len = 8
    txt_hidden = 32
    txt_heads = 4
    txt_layers = 2
    proj_dim = 32
    reduce_dim = 16                 # analogue of rd64
    dec_heads = 4
    mlp_ratio = 4


_LAYER_W_NAMES = ("qk_w", "qk_b", "vo_w", "vo_b", "ln1_g", "ln1_b",
                  "ln2_g", "ln2_b", "fc1_w", "fc1_b", "fc2_w", "fc2_b")


# ----------------------------- math helpers (used in- and out-of-kernel) -----------------------------
def _ln(x, g, b, eps=1e-5):
    mu = jnp.mean(x, axis=-1, keepdims=True)
    var = jnp.mean(jnp.square(x - mu), axis=-1, keepdims=True)
    return (x - mu) * jax.lax.rsqrt(var + eps) * g + b


def _quick_gelu(y):
    return y * jax.nn.sigmoid(1.702 * y)


def _attention(h, w, heads, scale, causal):
    """Fused multi-head attention with the V*O projection folded into vo_w.

    h: (S, D) f32.  w["qk_w"]: (D, 2D), w["vo_w"]: (D, H*D), biases lane-contiguous.
    """
    S, D = h.shape
    dh = D // heads
    qk = jnp.dot(h, w["qk_w"], preferred_element_type=jnp.float32) + w["qk_b"]   # (S, 2D)
    hv = jnp.dot(h, w["vo_w"], preferred_element_type=jnp.float32)               # (S, H*D)

    if causal:  # built in-kernel, never DMA'd
        row = jax.lax.broadcasted_iota(jnp.int32, (S, S), 0)
        col = jax.lax.broadcasted_iota(jnp.int32, (S, S), 1)
        neg = jnp.where(col <= row, 0.0, -1e9).astype(jnp.float32)

    acc = None
    for hh in range(heads):
        qh = qk[:, hh * dh:(hh + 1) * dh]
        kh = qk[:, D + hh * dh:D + (hh + 1) * dh]
        s = jax.lax.dot_general(qh, kh, (((1,), (1,)), ((), ())),
                                preferred_element_type=jnp.float32) * scale
        if causal:
            s = s + neg
        s = s - jnp.max(s, axis=-1, keepdims=True)
        p = jnp.exp(s)
        p = p * pl.reciprocal(jnp.sum(p, axis=-1, keepdims=True), approx=True)
        c = jnp.dot(p, hv[:, hh * D:(hh + 1) * D], preferred_element_type=jnp.float32)
        acc = c if acc is None else acc + c
    return acc + w["vo_b"]


def _pre_norm_layer(x, w, heads, scale, causal):
    """CLIP encoder layer (pre-norm)."""
    h = _ln(x, w["ln1_g"], w["ln1_b"])
    x1 = x + _attention(h, w, heads, scale, causal)
    h2 = _ln(x1, w["ln2_g"], w["ln2_b"])
    m = _quick_gelu(jnp.dot(h2, w["fc1_w"], preferred_element_type=jnp.float32) + w["fc1_b"])
    m = jnp.dot(m, w["fc2_w"], preferred_element_type=jnp.float32) + w["fc2_b"]
    return x1 + m


def _post_norm_layer(x, w, heads, scale):
    """HF CLIPSegDecoderLayer: x->attn->add->LN1 ; ->MLP->add->LN2 (residual is LN1 output)."""
    x1 = _ln(x + _attention(x, w, heads, scale, False), w["ln1_g"], w["ln1_b"])
    m = _quick_gelu(jnp.dot(x1, w["fc1_w"], preferred_element_type=jnp.float32) + w["fc1_b"])
    m = jnp.dot(m, w["fc2_w"], preferred_element_type=jnp.float32) + w["fc2_b"]
    return _ln(x1 + m, w["ln2_g"], w["ln2_b"])


# ----------------------------- BlockSpec helpers -----------------------------
def _layer_spec(arr):
    """One layer's slab of a (L, ...) stacked weight, indexed by the layer grid axis."""
    zeros = (0,) * (arr.ndim - 1)

    def imap(b, l):
        return (l,) + zeros
    return pl.BlockSpec((1,) + arr.shape[1:], imap)


def _const_spec(arr):
    """Whole array, same block for every grid step."""
    zeros = (0,) * arr.ndim

    def imap(b, l):
        return zeros
    return pl.BlockSpec(arr.shape, imap)


# ----------------------------- encoder stack (vision / text) -----------------------------
def _enc_stack_kernel(heads, causal, emit_all, scale, x_ref, *rest):
    w_refs = rest[:12]
    o_ref, act_ref = rest[12], rest[13]
    l = pl.program_id(1)

    @pl.when(l == 0)
    def _():
        act_ref[...] = x_ref[0].astype(jnp.float32)

    w = {n: r[0] for n, r in zip(_LAYER_W_NAMES, w_refs)}
    out = _pre_norm_layer(act_ref[...], w, heads, scale, causal)
    act_ref[...] = out
    if emit_all:
        o_ref[0, 0] = out                      # (L, B, S, D) output: one block per layer
    else:
        o_ref[0] = out                         # resident block; last layer is what flushes


def encoder_stack(x, sp, heads, causal, emit_all):
    """x: (B, S, D). One pallas_call for the whole transformer stack, grid=(B, L)."""
    B, S, D = x.shape
    L = sp["qk_w"].shape[0]
    scale = (D // heads) ** -0.5
    weights = [sp[n] for n in _LAYER_W_NAMES]

    if emit_all:
        out_shape = jax.ShapeDtypeStruct((L, B, S, D), jnp.float32)
        out_spec = pl.BlockSpec((1, 1, S, D), lambda b, l: (l, b, 0, 0))
    else:
        out_shape = jax.ShapeDtypeStruct((B, S, D), jnp.float32)
        out_spec = pl.BlockSpec((1, S, D), lambda b, l: (b, 0, 0))

    return pl.pallas_call(
        functools.partial(_enc_stack_kernel, heads, causal, emit_all, scale),
        out_shape=out_shape,
        grid=(B, L),
        in_specs=[pl.BlockSpec((1, S, D), lambda b, l: (b, 0, 0))]
                 + [_layer_spec(w) for w in weights],
        out_specs=out_spec,
        scratch_shapes=[pltpu.VMEM((S, D), jnp.float32)],
        compiler_params=pltpu.CompilerParams(
            dimension_semantics=("parallel", "arbitrary")),
    )(x, *weights)


# ----------------------------- decoder stack -----------------------------
def _dec_stack_kernel(heads, scale, hs_ref, cond_ref, red_w_ref, red_b_ref, *rest):
    w_refs = rest[:12]
    fm_w_ref, fm_b_ref, fa_w_ref, fa_b_ref, tc_w_ref, tc_b_ref = rest[12:18]
    o_ref, act_ref = rest[18], rest[19]
    i = pl.program_id(1)
    nl = pl.num_programs(1)

    hs = hs_ref[0, 0].astype(jnp.float32)                                        # (S, Dv)
    r = jnp.dot(hs, red_w_ref[0], preferred_element_type=jnp.float32) + red_b_ref[0]

    @pl.when(i == 0)
    def _():  # FiLM conditioning on the text embedding (only on the deepest level)
        cond = cond_ref[0]                                                        # (1, Dp)
        mul = jnp.dot(cond, fm_w_ref[...], preferred_element_type=jnp.float32) + fm_b_ref[...]
        add = jnp.dot(cond, fa_w_ref[...], preferred_element_type=jnp.float32) + fa_b_ref[...]
        act_ref[...] = r * mul + add

    @pl.when(i != 0)
    def _():
        act_ref[...] = act_ref[...] + r

    w = {n: ref[0] for n, ref in zip(_LAYER_W_NAMES, w_refs)}
    a = _post_norm_layer(act_ref[...], w, heads, scale)
    act_ref[...] = a

    @pl.when(i == nl - 1)
    def _():  # drop CLS, transposed-conv matmul with the sigmoid fused in
        seg = a[1:, :]
        logits = jnp.dot(seg, tc_w_ref[...], preferred_element_type=jnp.float32) + tc_b_ref[...]
        o_ref[0] = jax.nn.sigmoid(logits)


def decoder_stack(hs_stack, cond, P, cfg):
    """hs_stack: (L, B, S, Dv) deepest-first; cond: (B, Dp). -> (B, S-1, p*p) sigmoid patches."""
    L, B, S, Dv = hs_stack.shape
    R = cfg.reduce_dim
    heads = cfg.dec_heads
    scale = (R // heads) ** -0.5
    PP = cfg.patch * cfg.patch
    Dp = cond.shape[-1]
    cond3 = cond.reshape(B, 1, Dp)
    sp = P["stack"]
    block_ws = [sp[n] for n in _LAYER_W_NAMES]
    tconv_b = jnp.broadcast_to(P["tconv_b"].reshape(1, 1), (1, PP))

    return pl.pallas_call(
        functools.partial(_dec_stack_kernel, heads, scale),
        out_shape=jax.ShapeDtypeStruct((B, S - 1, PP), jnp.float32),
        grid=(B, L),
        in_specs=[pl.BlockSpec((1, 1, S, Dv), lambda b, i: (i, b, 0, 0)),
                  pl.BlockSpec((1, 1, Dp), lambda b, i: (b, 0, 0)),
                  _layer_spec(P["reduce_w"]), _layer_spec(P["reduce_b"])]
                 + [_layer_spec(w) for w in block_ws]
                 + [_const_spec(P["film_mul_w"]), _const_spec(P["film_mul_b"]),
                    _const_spec(P["film_add_w"]), _const_spec(P["film_add_b"]),
                    _const_spec(P["tconv_w"]), _const_spec(tconv_b)],
        out_specs=pl.BlockSpec((1, S - 1, PP), lambda b, i: (b, 0, 0)),
        scratch_shapes=[pltpu.VMEM((S, R), jnp.float32)],
        compiler_params=pltpu.CompilerParams(
            dimension_semantics=("parallel", "arbitrary")),
    )(hs_stack, cond3, P["reduce_w"], P["reduce_b"], *block_ws,
      P["film_mul_w"], P["film_mul_b"], P["film_add_w"], P["film_add_b"],
      P["tconv_w"], tconv_b)


# ----------------------------- model pieces -----------------------------
def vision_encoder(pix, P, cfg):
    """pix: (B, 3, H, W). Returns list of hidden states at cfg.extract_layers."""
    B, C, H, W = pix.shape
    p = cfg.patch
    Hp, Wp = H // p, W // p
    # patch-extract (conv stride=kernel=p lowered to matmul) — tiny, left to XLA
    patches = pix.reshape(B, C, Hp, p, Wp, p).transpose(0, 2, 4, 1, 3, 5).reshape(B, Hp * Wp, C * p * p)
    emb = patches @ P["patch_w"] + P["patch_b"]
    cls = jnp.broadcast_to(P["class_emb"].reshape(1, 1, -1), (B, 1, cfg.vis_hidden))
    h = jnp.concatenate([cls, emb], axis=1) + P["pos_emb"][None]
    h = _ln(h, P["pre_ln_g"], P["pre_ln_b"])
    # TODO(synk): S=17 leaves ~30% sublane padding in every (S,·) tile; pad to 24 when scaling up.
    all_h = encoder_stack(h, P["stack"], cfg.vis_heads, causal=False, emit_all=True)   # (L, B, S, D)
    return [all_h[li - 1] for li in cfg.extract_layers]


def text_encoder(ids, P, cfg):
    """ids: (B, L) int32. Returns projected text embeddings (B, proj_dim)."""
    B, L = ids.shape
    h = P["tok_emb"][ids] + P["pos_emb"][None]
    h = encoder_stack(h, P["stack"], cfg.txt_heads, causal=True, emit_all=False)        # (B, L, D)
    # TODO(synk): real CLIP pools at argmax(input_ids) (EOS id); with the synthetic hash
    # tokenizer the analogue is the last non-pad position (pad id == 0).
    eos = jnp.maximum(jnp.sum((ids != 0).astype(jnp.int32), axis=1) - 1, 0)
    pooled = h[jnp.arange(B), eos]
    pooled = _ln(pooled, P["final_ln_g"], P["final_ln_b"])
    return pooled @ P["proj_w"]                                                         # (B, proj_dim)


def decoder(hidden_list, cond, P, cfg):
    """hidden_list: list of (B, S, Dv); cond: (B, proj_dim). Returns sigmoid maps (B, H, W)."""
    B, S, Dv = hidden_list[0].shape
    hs_stack = jnp.stack(list(reversed(hidden_list)), axis=0)        # deepest level first
    probs = decoder_stack(hs_stack, cond, P, cfg)                    # (B, Hp*Wp, p*p)
    p = cfg.patch
    Hp = Wp = cfg.image_size // p
    out = probs.reshape(B, Hp, Wp, p, p).transpose(0, 1, 3, 2, 4)
    return out.reshape(B, cfg.image_size, cfg.image_size)


# ----------------------------- parameters -----------------------------
def _pack_stack(layer_list, heads):
    """Pack raw per-layer params into the fused, layer-stacked layout the kernels expect."""
    d = layer_list[0]["q_w"].shape[0]
    dh = d // heads

    def one(lp):
        qk_w = jnp.concatenate([lp["q_w"], lp["k_w"]], axis=1)                     # (D, 2D)
        qk_b = jnp.concatenate([lp["q_b"], lp["k_b"]]).reshape(1, 2 * d)
        vo = [lp["v_w"][:, h * dh:(h + 1) * dh] @ lp["o_w"][h * dh:(h + 1) * dh, :]
              for h in range(heads)]                                               # fold V·O per head
        vo_w = jnp.concatenate(vo, axis=1)                                         # (D, H*D)
        vo_b = (lp["v_b"] @ lp["o_w"] + lp["o_b"]).reshape(1, d)
        return dict(
            qk_w=qk_w, qk_b=qk_b, vo_w=vo_w, vo_b=vo_b,
            ln1_g=lp["ln1_g"].reshape(1, d), ln1_b=lp["ln1_b"].reshape(1, d),
            ln2_g=lp["ln2_g"].reshape(1, d), ln2_b=lp["ln2_b"].reshape(1, d),
            fc1_w=lp["fc1_w"], fc1_b=lp["fc1_b"].reshape(1, -1),
            fc2_w=lp["fc2_w"], fc2_b=lp["fc2_b"].reshape(1, d),
        )

    packed = [one(lp) for lp in layer_list]
    return {k: jnp.stack([p[k] for p in packed], axis=0) for k in packed[0]}


def init_params(key, cfg):
    cnt = [0]

    def nrm(shape, std=0.02):
        cnt[0] += 1
        return std * jax.random.normal(jax.random.fold_in(key, cnt[0]), shape, jnp.float32)

    def layer_params(d, mlp):
        return dict(
            q_w=nrm((d, d)), q_b=jnp.zeros((d,), jnp.float32),
            k_w=nrm((d, d)), k_b=jnp.zeros((d,), jnp.float32),
            v_w=nrm((d, d)), v_b=jnp.zeros((d,), jnp.float32),
            o_w=nrm((d, d)), o_b=jnp.zeros((d,), jnp.float32),
            ln1_g=jnp.ones((d,), jnp.float32), ln1_b=jnp.zeros((d,), jnp.float32),
            ln2_g=jnp.ones((d,), jnp.float32), ln2_b=jnp.zeros((d,), jnp.float32),
            fc1_w=nrm((d, mlp)), fc1_b=jnp.zeros((mlp,), jnp.float32),
            fc2_w=nrm((mlp, d)), fc2_b=jnp.zeros((d,), jnp.float32),
        )

    p = cfg.patch
    n_patches = (cfg.image_size // p) ** 2
    vision = dict(
        patch_w=nrm((cfg.channels * p * p, cfg.vis_hidden)),
        patch_b=jnp.zeros((cfg.vis_hidden,), jnp.float32),
        class_emb=nrm((cfg.vis_hidden,)),
        pos_emb=nrm((n_patches + 1, cfg.vis_hidden)),
        pre_ln_g=jnp.ones((cfg.vis_hidden,), jnp.float32),
        pre_ln_b=jnp.zeros((cfg.vis_hidden,), jnp.float32),
        stack=_pack_stack([layer_params(cfg.vis_hidden, cfg.mlp_ratio * cfg.vis_hidden)
                           for _ in range(cfg.vis_layers)], cfg.vis_heads),
    )
    text = dict(
        tok_emb=nrm((cfg.txt_vocab, cfg.txt_hidden)),
        pos_emb=nrm((cfg.txt_len, cfg.txt_hidden)),
        stack=_pack_stack([layer_params(cfg.txt_hidden, cfg.mlp_ratio * cfg.txt_hidden)
                           for _ in range(cfg.txt_layers)], cfg.txt_heads),
        final_ln_g=jnp.ones((cfg.txt_hidden,), jnp.float32),
        final_ln_b=jnp.zeros((cfg.txt_hidden,), jnp.float32),
        proj_w=nrm((cfg.txt_hidden, cfg.proj_dim)),
    )
    n_ext = len(cfg.extract_layers)
    dec = dict(
        film_mul_w=nrm((cfg.proj_dim, cfg.reduce_dim)),
        film_mul_b=jnp.ones((1, cfg.reduce_dim), jnp.float32),
        film_add_w=nrm((cfg.proj_dim, cfg.reduce_dim)),
        film_add_b=jnp.zeros((1, cfg.reduce_dim), jnp.float32),
        reduce_w=jnp.stack([nrm((cfg.vis_hidden, cfg.reduce_dim)) for _ in range(n_ext)]),
        reduce_b=jnp.zeros((n_ext, 1, cfg.reduce_dim), jnp.float32),
        stack=_pack_stack([layer_params(cfg.reduce_dim, cfg.mlp_ratio * cfg.reduce_dim)
                           for _ in range(n_ext)], cfg.dec_heads),
        tconv_w=nrm((cfg.reduce_dim, p * p)),
        tconv_b=jnp.zeros((), jnp.float32),   # single scalar out-channel bias
    )
    return dict(vision=vision, text=text, decoder=dec)


# ----------------------------- "processor" glue -----------------------------
def tokenize(descs, vocab, length):
    """Deterministic stand-in for the HF CLIP tokenizer (hashes characters)."""
    ids = []
    for d in descs:
        toks = [(sum(ord(c) for c in d[: i + 1]) + i) % (vocab - 2) + 1 for i in range(min(len(d), length))]
        toks = toks + [0] * (length - len(toks))
        ids.append(toks)
    return jnp.array(ids, dtype=jnp.int32)


@functools.partial(jax.jit, static_argnames=("cfg",))
def _clipseg_core(x, ids, params, cfg):
    T = ids.shape[0]
    mean = jnp.array([0.48145466, 0.4578275, 0.40821073], jnp.float32).reshape(3, 1, 1)
    std = jnp.array([0.26862954, 0.26130258, 0.27577711], jnp.float32).reshape(3, 1, 1)
    pix = (x.astype(jnp.float32) - mean) / std
    pix = jnp.broadcast_to(pix[None], (T,) + pix.shape)        # images = [x] * len(descs)
    hidden_list = vision_encoder(pix, params["vision"], cfg)   # list of (T, S, Dv)
    cond = text_encoder(ids, params["text"], cfg)              # (T, proj_dim)
    return decoder(hidden_list, cond, params["decoder"], cfg)  # (T, H, W), sigmoid applied


def clipseg_forward(x, descs, params, cfg):
    """Mirrors CLIPSeg.forward: returns a list (len == len(descs)) of sigmoid(logits) maps (H, W)."""
    ids = tokenize(descs, cfg.txt_vocab, cfg.txt_len)
    probs = _clipseg_core(x, ids, params, cfg=cfg)
    return [probs[i] for i in range(len(descs))]


# ----------------------------- main -----------------------------
if __name__ == "__main__":
    cfg = Cfg()
    key = jax.random.PRNGKey(0)
    x = jax.random.uniform(key, (cfg.channels, cfg.image_size, cfg.image_size), dtype=jnp.float32)
    descs = ["a cat", "a dog"]

    params = init_params(jax.random.PRNGKey(42), cfg)
    preds = clipseg_forward(x, descs, params, cfg)
    preds = [jax.block_until_ready(p) for p in preds]

    assert len(preds) == len(descs)
    for p in preds:
        assert p.shape == (cfg.image_size, cfg.image_size)
        assert p.dtype == jnp.float32
        assert bool(jnp.all(jnp.isfinite(p)))
        assert bool(jnp.all((p >= 0.0) & (p <= 1.0)))
    print("KERNEL_OK")
</pallas_src>

<mosaic_0001>
module attributes {stable_mosaic.version = 11 : i64} {
  func.func @_enc_stack_kernel(%arg0: i32, %arg1: i32, %arg2: memref<1x17x32xf32, #tpu.memory_space<vmem>>, %arg3: memref<1x32x64xf32, #tpu.memory_space<vmem>>, %arg4: memref<1x1x64xf32, #tpu.memory_space<vmem>>, %arg5: memref<1x32x128xf32, #tpu.memory_space<vmem>>, %arg6: memref<1x1x32xf32, #tpu.memory_space<vmem>>, %arg7: memref<1x1x32xf32, #tpu.memory_space<vmem>>, %arg8: memref<1x1x32xf32, #tpu.memory_space<vmem>>, %arg9: memref<1x1x32xf32, #tpu.memory_space<vmem>>, %arg10: memref<1x1x32xf32, #tpu.memory_space<vmem>>, %arg11: memref<1x32x128xf32, #tpu.memory_space<vmem>>, %arg12: memref<1x1x128xf32, #tpu.memory_space<vmem>>, %arg13: memref<1x128x32xf32, #tpu.memory_space<vmem>>, %arg14: memref<1x1x32xf32, #tpu.memory_space<vmem>>, %arg15: memref<1x1x17x32xf32, #tpu.memory_space<vmem>>, %arg16: memref<17x32xf32, #tpu.memory_space<vmem>>) attributes {dimension_semantics = [#tpu.dimension_semantics<parallel>, #tpu.dimension_semantics<arbitrary>], iteration_bounds = array<i64: 2, 3>, scalar_prefetch = 0 : i64, scratch_operands = 1 : i64, tpu.core_type = #tpu.core_type<tc>, window_params = [{transform_indices = @transform_0, window_bounds = array<i64: 1, 17, 32>}, {transform_indices = @transform_1, window_bounds = array<i64: 1, 32, 64>}, {transform_indices = @transform_2, window_bounds = array<i64: 1, 1, 64>}, {transform_indices = @transform_3, window_bounds = array<i64: 1, 32, 128>}, {transform_indices = @transform_4, window_bounds = array<i64: 1, 1, 32>}, {transform_indices = @transform_5, window_bounds = array<i64: 1, 1, 32>}, {transform_indices = @transform_6, window_bounds = array<i64: 1, 1, 32>}, {transform_indices = @transform_7, window_bounds = array<i64: 1, 1, 32>}, {transform_indices = @transform_8, window_bounds = array<i64: 1, 1, 32>}, {transform_indices = @transform_9, window_bounds = array<i64: 1, 32, 128>}, {transform_indices = @transform_10, window_bounds = array<i64: 1, 1, 128>}, {transform_indices = @transform_11, window_bounds = array<i64: 1, 128, 32>}, {transform_indices = @transform_12, window_bounds = array<i64: 1, 1, 32>}, {transform_indices = @transform_13, window_bounds = array<i64: 1, 1, 17, 32>}]} {
    %c0_i32 = arith.constant 0 : i32
    %0 = arith.cmpi eq, %arg1, %c0_i32 : i32
    %1 = arith.extui %0 : i1 to i32
    %c0_i32_0 = arith.constant 0 : i32
    %2 = arith.cmpi ne, %1, %c0_i32_0 : i32
    scf.if %2 {
      %c0_79 = arith.constant 0 : index
      %c0_80 = arith.constant 0 : index
      %c0_81 = arith.constant 0 : index
      %169 = vector.load %arg2[%c0_79, %c0_80, %c0_81] : memref<1x17x32xf32, #tpu.memory_space<vmem>>, vector<1x17x32xf32>
      %170 = vector.shape_cast %169 : vector<1x17x32xf32> to vector<17x32xf32>
      %c0_82 = arith.constant 0 : index
      %c0_83 = arith.constant 0 : index
      %171 = vector.load %arg16[%c0_82, %c0_83] : memref<17x32xf32, #tpu.memory_space<vmem>>, vector<17x32xf32>
      tpu.vector_store %arg16[%c0_82, %c0_83], %170 {strides = array<i32>} : memref<17x32xf32, #tpu.memory_space<vmem>>, vector<17x32xf32>,
    } else {
    }
    %c0 = arith.constant 0 : index
    %c0_1 = arith.constant 0 : index
    %c0_2 = arith.constant 0 : index
    %3 = vector.load %arg3[%c0, %c0_1, %c0_2] : memref<1x32x64xf32, #tpu.memory_space<vmem>>, vector<1x32x64xf32>
    %4 = vector.shape_cast %3 : vector<1x32x64xf32> to vector<32x64xf32>
    %c0_3 = arith.constant 0 : index
    %c0_4 = arith.constant 0 : index
    %c0_5 = arith.constant 0 : index
    %5 = vector.load %arg4[%c0_3, %c0_4, %c0_5] : memref<1x1x64xf32, #tpu.memory_space<vmem>>, vector<1x1x64xf32>
    %6 = vector.shape_cast %5 : vector<1x1x64xf32> to vector<1x64xf32>
    %c0_6 = arith.constant 0 : index
    %c0_7 = arith.constant 0 : index
    %c0_8 = arith.constant 0 : index
    %7 = vector.load %arg5[%c0_6, %c0_7, %c0_8] : memref<1x32x128xf32, #tpu.memory_space<vmem>>, vector<1x32x128xf32>
    %8 = vector.shape_cast %7 : vector<1x32x128xf32> to vector<32x128xf32>
    %c0_9 = arith.constant 0 : index
    %c0_10 = arith.constant 0 : index
    %c0_11 = arith.constant 0 : index
    %9 = vector.load %arg6[%c0_9, %c0_10, %c0_11] : memref<1x1x32xf32, #tpu.memory_space<vmem>>, vector<1x1x32xf32>
    %10 = vector.shape_cast %9 : vector<1x1x32xf32> to vector<1x32xf32>
    %c0_12 = arith.constant 0 : index
    %c0_13 = arith.constant 0 : index
    %c0_14 = arith.constant 0 : index
    %11 = vector.load %arg7[%c0_12, %c0_13, %c0_14] : memref<1x1x32xf32, #tpu.memory_space<vmem>>, vector<1x1x32xf32>
    %12 = vector.shape_cast %11 : vector<1x1x32xf32> to vector<1x32xf32>
    %c0_15 = arith.constant 0 : index
    %c0_16 = arith.constant 0 : index
    %c0_17 = arith.constant 0 : index
    %13 = vector.load %arg8[%c0_15, %c0_16, %c0_17] : memref<1x1x32xf32, #tpu.memory_space<vmem>>, vector<1x1x32xf32>
    %14 = vector.shape_cast %13 : vector<1x1x32xf32> to vector<1x32xf32>
    %c0_18 = arith.constant 0 : index
    %c0_19 = arith.constant 0 : index
    %c0_20 = arith.constant 0 : index
    %15 = vector.load %arg9[%c0_18, %c0_19, %c0_20] : memref<1x1x32xf32, #tpu.memory_space<vmem>>, vector<1x1x32xf32>
    %16 = vector.shape_cast %15 : vector<1x1x32xf32> to vector<1x32xf32>
    %c0_21 = arith.constant 0 : index
    %c0_22 = arith.constant 0 : index
    %c0_23 = arith.constant 0 : index
    %17 = vector.load %arg10[%c0_21, %c0_22, %c0_23] : memref<1x1x32xf32, #tpu.memory_space<vmem>>, vector<1x1x32xf32>
    %18 = vector.shape_cast %17 : vector<1x1x32xf32> to vector<1x32xf32>
    %c0_24 = arith.constant 0 : index
    %c0_25 = arith.constant 0 : index
    %c0_26 = arith.constant 0 : index
    %19 = vector.load %arg11[%c0_24, %c0_25, %c0_26] : memref<1x32x128xf32, #tpu.memory_space<vmem>>, vector<1x32x128xf32>
    %20 = vector.shape_cast %19 : vector<1x32x128xf32> to vector<32x128xf32>
    %c0_27 = arith.constant 0 : index
    %c0_28 = arith.constant 0 : index
    %c0_29 = arith.constant 0 : index
    %21 = vector.load %arg12[%c0_27, %c0_28, %c0_29] : memref<1x1x128xf32, #tpu.memory_space<vmem>>, vector<1x1x128xf32>
    %22 = vector.shape_cast %21 : vector<1x1x128xf32> to vector<1x128xf32>
    %c0_30 = arith.constant 0 : index
    %c0_31 = arith.constant 0 : index
    %c0_32 = arith.constant 0 : index
    %23 = vector.load %arg13[%c0_30, %c0_31, %c0_32] : memref<1x128x32xf32, #tpu.memory_space<vmem>>, vector<1x128x32xf32>
    %24 = vector.shape_cast %23 : vector<1x128x32xf32> to vector<128x32xf32>
    %c0_33 = arith.constant 0 : index
    %c0_34 = arith.constant 0 : index
    %c0_35 = arith.constant 0 : index
    %25 = vector.load %arg14[%c0_33, %c0_34, %c0_35] : memref<1x1x32xf32, #tpu.memory_space<vmem>>, vector<1x1x32xf32>
    %26 = vector.shape_cast %25 : vector<1x1x32xf32> to vector<1x32xf32>
    %c0_36 = arith.constant 0 : index
    %c0_37 = arith.constant 0 : index
    %27 = vector.load %arg16[%c0_36, %c0_37] : memref<17x32xf32, #tpu.memory_space<vmem>>, vector<17x32xf32>
    %cst = arith.constant dense<0.000000e+00> : vector<17xf32>
    %28 = vector.multi_reduction <add>, %27, %cst [1] : vector<17x32xf32> to vector<17xf32>
    %29 = vector.shape_cast %28 : vector<17xf32> to vector<17x1xf32>
    %cst_38 = arith.constant 3.200000e+01 : f32
    %30 = vector.broadcast %cst_38 : f32 to vector<17x1xf32>
    %31 = arith.divf %29, %30 : vector<17x1xf32>
    %32 = vector.broadcast %31 : vector<17x1xf32> to vector<17x32xf32>
    %33 = arith.subf %27, %32 : vector<17x32xf32>
    %34 = arith.mulf %33, %33 : vector<17x32xf32>
    %cst_39 = arith.constant dense<0.000000e+00> : vector<17xf32>
    %35 = vector.multi_reduction <add>, %34, %cst_39 [1] : vector<17x32xf32> to vector<17xf32>
    %36 = vector.shape_cast %35 : vector<17xf32> to vector<17x1xf32>
    %cst_40 = arith.constant 3.200000e+01 : f32
    %37 = vector.broadcast %cst_40 : f32 to vector<17x1xf32>
    %38 = arith.divf %36, %37 : vector<17x1xf32>
    %39 = vector.broadcast %31 : vector<17x1xf32> to vector<17x32xf32>
    %40 = arith.subf %27, %39 : vector<17x32xf32>
    %cst_41 = arith.constant 9.99999974E-6 : f32
    %41 = vector.broadcast %cst_41 : f32 to vector<17x1xf32>
    %42 = arith.addf %38, %41 : vector<17x1xf32>
    %43 = math.rsqrt %42 : vector<17x1xf32>
    %44 = vector.broadcast %43 : vector<17x1xf32> to vector<17x32xf32>
    %45 = arith.mulf %40, %44 : vector<17x32xf32>
    %46 = vector.broadcast %12 : vector<1x32xf32> to vector<17x32xf32>
    %47 = arith.mulf %45, %46 : vector<17x32xf32>
    %48 = vector.broadcast %14 : vector<1x32xf32> to vector<17x32xf32>
    %49 = arith.addf %47, %48 : vector<17x32xf32>
    %cst_42 = arith.constant dense<0.000000e+00> : vector<17x64xf32>
    %50 = tpu.matmul %49, %4, %cst_42 {dimension_numbers = #tpu.dot_dimension_numbers<[1], [0], [0], [1], [0, 0, 1, 1], [], []>} : vector<17x32xf32>, vector<32x64xf32>, vector<17x64xf32> -> vector<17x64xf32>
    %51 = vector.broadcast %6 : vector<1x64xf32> to vector<17x64xf32>
    %52 = arith.addf %50, %51 : vector<17x64xf32>
    %cst_43 = arith.constant dense<0.000000e+00> : vector<17x128xf32>
    %53 = tpu.matmul %49, %8, %cst_43 {dimension_numbers = #tpu.dot_dimension_numbers<[1], [0], [0], [1], [0, 0, 1, 1], [], []>} : vector<17x32xf32>, vector<32x128xf32>, vector<17x128xf32> -> vector<17x128xf32>
    %54 = vector.extract_strided_slice %52 {offsets = [0, 0], sizes = [17, 8], strides = [1, 1]} : vector<17x64xf32> to vector<17x8xf32>
    %55 = vector.extract_strided_slice %52 {offsets = [0, 32], sizes = [17, 8], strides = [1, 1]} : vector<17x64xf32> to vector<17x8xf32>
    %cst_44 = arith.constant dense<0.000000e+00> : vector<17x17xf32>
    %56 = tpu.matmul %54, %55, %cst_44 {dimension_numbers = #tpu.dot_dimension_numbers<[1], [1], [0], [0], [0, 0, 1, 0], [], []>} : vector<17x8xf32>, vector<17x8xf32>, vector<17x17xf32> -> vector<17x17xf32>
    %cst_45 = arith.constant 0.353553385 : f32
    %57 = vector.broadcast %cst_45 : f32 to vector<17x17xf32>
    %58 = arith.mulf %56, %57 : vector<17x17xf32>
    %cst_46 = arith.constant dense<0xFF800000> : vector<17xf32>
    %59 = vector.multi_reduction <maximumf>, %58, %cst_46 [1] : vector<17x17xf32> to vector<17xf32>
    %60 = vector.shape_cast %59 : vector<17xf32> to vector<17x1xf32>
    %61 = vector.broadcast %60 : vector<17x1xf32> to vector<17x17xf32>
    %62 = arith.subf %58, %61 : vector<17x17xf32>
    %63 = math.exp %62 : vector<17x17xf32>
    %cst_47 = arith.constant dense<0.000000e+00> : vector<17xf32>
    %64 = vector.multi_reduction <add>, %63, %cst_47 [1] : vector<17x17xf32> to vector<17xf32>
    %65 = vector.shape_cast %64 : vector<17xf32> to vector<17x1xf32>
    %66 = tpu.reciprocal %65 {approx = true} : vector<17x1xf32> -> vector<17x1xf32>
    %67 = vector.broadcast %66 : vector<17x1xf32> to vector<17x17xf32>
    %68 = arith.mulf %63, %67 : vector<17x17xf32>
    %69 = vector.extract_strided_slice %53 {offsets = [0, 0], sizes = [17, 32], strides = [1, 1]} : vector<17x128xf32> to vector<17x32xf32>
    %cst_48 = arith.constant dense<0.000000e+00> : vector<17x32xf32>
    %70 = tpu.matmul %68, %69, %cst_48 {dimension_numbers = #tpu.dot_dimension_numbers<[1], [0], [0], [1], [0, 0, 1, 1], [], []>} : vector<17x17xf32>, vector<17x32xf32>, vector<17x32xf32> -> vector<17x32xf32>
    %71 = vector.extract_strided_slice %52 {offsets = [0, 8], sizes = [17, 8], strides = [1, 1]} : vector<17x64xf32> to vector<17x8xf32>
    %72 = vector.extract_strided_slice %52 {offsets = [0, 40], sizes = [17, 8], strides = [1, 1]} : vector<17x64xf32> to vector<17x8xf32>
    %cst_49 = arith.constant dense<0.000000e+00> : vector<17x17xf32>
    %73 = tpu.matmul %71, %72, %cst_49 {dimension_numbers = #tpu.dot_dimension_numbers<[1], [1], [0], [0], [0, 0, 1, 0], [], []>} : vector<17x8xf32>, vector<17x8xf32>, vector<17x17xf32> -> vector<17x17xf32>
    %cst_50 = arith.constant 0.353553385 : f32
    %74 = vector.broadcast %cst_50 : f32 to vector<17x17xf32>
    %75 = arith.mulf %73, %74 : vector<17x17xf32>
    %cst_51 = arith.constant dense<0xFF800000> : vector<17xf32>
    %76 = vector.multi_reduction <maximumf>, %75, %cst_51 [1] : vector<17x17xf32> to vector<17xf32>
    %77 = vector.shape_cast %76 : vector<17xf32> to vector<17x1xf32>
    %78 = vector.broadcast %77 : vector<17x1xf32> to vector<17x17xf32>
    %79 = arith.subf %75, %78 : vector<17x17xf32>
    %80 = math.exp %79 : vector<17x17xf32>
    %cst_52 = arith.constant dense<0.000000e+00> : vector<17xf32>
    %81 = vector.multi_reduction <add>, %80, %cst_52 [1] : vector<17x17xf32> to vector<17xf32>
    %82 = vector.shape_cast %81 : vector<17xf32> to vector<17x1xf32>
    %83 = tpu.reciprocal %82 {approx = true} : vector<17x1xf32> -> vector<17x1xf32>
    %84 = vector.broadcast %83 : vector<17x1xf32> to vector<17x17xf32>
    %85 = arith.mulf %80, %84 : vector<17x17xf32>
    %86 = vector.extract_strided_slice %53 {offsets = [0, 32], sizes = [17, 32], strides = [1, 1]} : vector<17x128xf32> to vector<17x32xf32>
    %cst_53 = arith.constant dense<0.000000e+00> : vector<17x32xf32>
    %87 = tpu.matmul %85, %86, %cst_53 {dimension_numbers = #tpu.dot_dimension_numbers<[1], [0], [0], [1], [0, 0, 1, 1], [], []>} : vector<17x17xf32>, vector<17x32xf32>, vector<17x32xf32> -> vector<17x32xf32>
    %88 = arith.addf %70, %87 : vector<17x32xf32>
    %89 = vector.extract_strided_slice %52 {offsets = [0, 16], sizes = [17, 8], strides = [1, 1]} : vector<17x64xf32> to vector<17x8xf32>
    %90 = vector.extract_strided_slice %52 {offsets = [0, 48], sizes = [17, 8], strides = [1, 1]} : vector<17x64xf32> to vector<17x8xf32>
    %cst_54 = arith.constant dense<0.000000e+00> : vector<17x17xf32>
    %91 = tpu.matmul %89, %90, %cst_54 {dimension_numbers = #tpu.dot_dimension_numbers<[1], [1], [0], [0], [0, 0, 1, 0], [], []>} : vector<17x8xf32>, vector<17x8xf32>, vector<17x17xf32> -> vector<17x17xf32>
    %cst_55 = arith.constant 0.353553385 : f32
    %92 = vector.broadcast %cst_55 : f32 to vector<17x17xf32>
    %93 = arith.mulf %91, %92 : vector<17x17xf32>
    %cst_56 = arith.constant dense<0xFF800000> : vector<17xf32>
    %94 = vector.multi_reduction <maximumf>, %93, %cst_56 [1] : vector<17x17xf32> to vector<17xf32>
    %95 = vector.shape_cast %94 : vector<17xf32> to vector<17x1xf32>
    %96 = vector.broadcast %95 : vector<17x1xf32> to vector<17x17xf32>
    %97 = arith.subf %93, %96 : vector<17x17xf32>
    %98 = math.exp %97 : vector<17x17xf32>
    %cst_57 = arith.constant dense<0.000000e+00> : vector<17xf32>
    %99 = vector.multi_reduction <add>, %98, %cst_57 [1] : vector<17x17xf32> to vector<17xf32>
    %100 = vector.shape_cast %99 : vector<17xf32> to vector<17x1xf32>
    %101 = tpu.reciprocal %100 {approx = true} : vector<17x1xf32> -> vector<17x1xf32>
    %102 = vector.broadcast %101 : vector<17x1xf32> to vector<17x17xf32>
    %103 = arith.mulf %98, %102 : vector<17x17xf32>
    %104 = vector.extract_strided_slice %53 {offsets = [0, 64], sizes = [17, 32], strides = [1, 1]} : vector<17x128xf32> to vector<17x32xf32>
    %cst_58 = arith.constant dense<0.000000e+00> : vector<17x32xf32>
    %105 = tpu.matmul %103, %104, %cst_58 {dimension_numbers = #tpu.dot_dimension_numbers<[1], [0], [0], [1], [0, 0, 1, 1], [], []>} : vector<17x17xf32>, vector<17x32xf32>, vector<17x32xf32> -> vector<17x32xf32>
    %106 = arith.addf %88, %105 : vector<17x32xf32>
    %107 = vector.extract_strided_slice %52 {offsets = [0, 24], sizes = [17, 8], strides = [1, 1]} : vector<17x64xf32> to vector<17x8xf32>
    %108 = vector.extract_strided_slice %52 {offsets = [0, 56], sizes = [17, 8], strides = [1, 1]} : vector<17x64xf32> to vector<17x8xf32>
    %cst_59 = arith.constant dense<0.000000e+00> : vector<17x17xf32>
    %109 = tpu.matmul %107, %108, %cst_59 {dimension_numbers = #tpu.dot_dimension_numbers<[1], [1], [0], [0], [0, 0, 1, 0], [], []>} : vector<17x8xf32>, vector<17x8xf32>, vector<17x17xf32> -> vector<17x17xf32>
    %cst_60 = arith.constant 0.353553385 : f32
    %110 = vector.broadcast %cst_60 : f32 to vector<17x17xf32>
    %111 = arith.mulf %109, %110 : vector<17x17xf32>
    %cst_61 = arith.constant dense<0xFF800000> : vector<17xf32>
    %112 = vector.multi_reduction <maximumf>, %111, %cst_61 [1] : vector<17x17xf32> to vector<17xf32>
    %113 = vector.shape_cast %112 : vector<17xf32> to vector<17x1xf32>
    %114 = vector.broadcast %113 : vector<17x1xf32> to vector<17x17xf32>
    %115 = arith.subf %111, %114 : vector<17x17xf32>
    %116 = math.exp %115 : vector<17x17xf32>
    %cst_62 = arith.constant dense<0.000000e+00> : vector<17xf32>
    %117 = vector.multi_reduction <add>, %116, %cst_62 [1] : vector<17x17xf32> to vector<17xf32>
    %118 = vector.shape_cast %117 : vector<17xf32> to vector<17x1xf32>
    %119 = tpu.reciprocal %118 {approx = true} : vector<17x1xf32> -> vector<17x1xf32>
    %120 = vector.broadcast %119 : vector<17x1xf32> to vector<17x17xf32>
    %121 = arith.mulf %116, %120 : vector<17x17xf32>
    %122 = vector.extract_strided_slice %53 {offsets = [0, 96], sizes = [17, 32], strides = [1, 1]} : vector<17x128xf32> to vector<17x32xf32>
    %cst_63 = arith.constant dense<0.000000e+00> : vector<17x32xf32>
    %123 = tpu.matmul %121, %122, %cst_63 {dimension_numbers = #tpu.dot_dimension_numbers<[1], [0], [0], [1], [0, 0, 1, 1], [], []>} : vector<17x17xf32>, vector<17x32xf32>, vector<17x32xf32> -> vector<17x32xf32>
    %124 = arith.addf %106, %123 : vector<17x32xf32>
    %125 = vector.broadcast %10 : vector<1x32xf32> to vector<17x32xf32>
    %126 = arith.addf %124, %125 : vector<17x32xf32>
    %127 = arith.addf %27, %126 : vector<17x32xf32>
    %cst_64 = arith.constant dense<0.000000e+00> : vector<17xf32>
    %128 = vector.multi_reduction <add>, %127, %cst_64 [1] : vector<17x32xf32> to vector<17xf32>
    %129 = vector.shape_cast %128 : vector<17xf32> to vector<17x1xf32>
    %cst_65 = arith.constant 3.200000e+01 : f32
    %130 = vector.broadcast %cst_65 : f32 to vector<17x1xf32>
    %131 = arith.divf %129, %130 : vector<17x1xf32>
    %132 = vector.broadcast %131 : vector<17x1xf32> to vector<17x32xf32>
    %133 = arith.subf %127, %132 : vector<17x32xf32>
    %134 = arith.mulf %133, %133 : vector<17x32xf32>
    %cst_66 = arith.constant dense<0.000000e+00> : vector<17xf32>
    %135 = vector.multi_reduction <add>, %134, %cst_66 [1] : vector<17x32xf32> to vector<17xf32>
    %136 = vector.shape_cast %135 : vector<17xf32> to vector<17x1xf32>
    %cst_67 = arith.constant 3.200000e+01 : f32
    %137 = vector.broadcast %cst_67 : f32 to vector<17x1xf32>
    %138 = arith.divf %136, %137 : vector<17x1xf32>
    %139 = vector.broadcast %131 : vector<17x1xf32> to vector<17x32xf32>
    %140 = arith.subf %127, %139 : vector<17x32xf32>
    %cst_68 = arith.constant 9.99999974E-6 : f32
    %141 = vector.broadcast %cst_68 : f32 to vector<17x1xf32>
    %142 = arith.addf %138, %141 : vector<17x1xf32>
    %143 = math.rsqrt %142 : vector<17x1xf32>
    %144 = vector.broadcast %143 : vector<17x1xf32> to vector<17x32xf32>
    %145 = arith.mulf %140, %144 : vector<17x32xf32>
    %146 = vector.broadcast %16 : vector<1x32xf32> to vector<17x32xf32>
    %147 = arith.mulf %145, %146 : vector<17x32xf32>
    %148 = vector.broadcast %18 : vector<1x32xf32> to vector<17x32xf32>
    %149 = arith.addf %147, %148 : vector<17x32xf32>
    %cst_69 = arith.constant dense<0.000000e+00> : vector<17x128xf32>
    %150 = tpu.matmul %149, %20, %cst_69 {dimension_numbers = #tpu.dot_dimension_numbers<[1], [0], [0], [1], [0, 0, 1, 1], [], []>} : vector<17x32xf32>, vector<32x128xf32>, vector<17x128xf32> -> vector<17x128xf32>
    %151 = vector.broadcast %22 : vector<1x128xf32> to vector<17x128xf32>
    %152 = arith.addf %150, %151 : vector<17x128xf32>
    %cst_70 = arith.constant 1.702000e+00 : f32
    %153 = vector.broadcast %cst_70 : f32 to vector<17x128xf32>
    %154 = arith.mulf %153, %152 : vector<17x128xf32>
    %155 = arith.negf %154 : vector<17x128xf32>
    %156 = math.exp %155 : vector<17x128xf32>
    %cst_71 = arith.constant 1.000000e+00 : f32
    %157 = vector.broadcast %cst_71 : f32 to vector<17x128xf32>
    %158 = arith.addf %157, %156 : vector<17x128xf32>
    %159 = arith.divf %157, %158 : vector<17x128xf32>
    %160 = arith.mulf %152, %159 : vector<17x128xf32>
    %cst_72 = arith.constant dense<0.000000e+00> : vector<17x32xf32>
    %161 = tpu.matmul %160, %24, %cst_72 {dimension_numbers = #tpu.dot_dimension_numbers<[1], [0], [0], [1], [0, 0, 1, 1], [], []>} : vector<17x128xf32>, vector<128x32xf32>, vector<17x32xf32> -> vector<17x32xf32>
    %162 = vector.broadcast %26 : vector<1x32xf32> to vector<17x32xf32>
    %163 = arith.addf %161, %162 : vector<17x32xf32>
    %164 = arith.addf %127, %163 : vector<17x32xf32>
    %c0_73 = arith.constant 0 : index
    %c0_74 = arith.constant 0 : index
    %165 = vector.load %arg16[%c0_73, %c0_74] : memref<17x32xf32, #tpu.memory_space<vmem>>, vector<17x32xf32>
    tpu.vector_store %arg16[%c0_73, %c0_74], %164 {strides = array<i32>} : memref<17x32xf32, #tpu.memory_space<vmem>>, vector<17x32xf32>,
    %c0_75 = arith.constant 0 : index
    %c0_76 = arith.constant 0 : index
    %c0_77 = arith.constant 0 : index
    %c0_78 = arith.constant 0 : index
    %166 = vector.load %arg15[%c0_75, %c0_76, %c0_77, %c0_78] : memref<1x1x17x32xf32, #tpu.memory_space<vmem>>, vector<1x1x17x32xf32>
    %167 = vector.shape_cast %166 : vector<1x1x17x32xf32> to vector<17x32xf32>
    %168 = vector.shape_cast %164 : vector<17x32xf32> to vector<1x1x17x32xf32>
    tpu.vector_store %arg15[%c0_75, %c0_76, %c0_77, %c0_78], %168 {strides = array<i32>} : memref<1x1x17x32xf32, #tpu.memory_space<vmem>>, vector<1x1x17x32xf32>,
    return
  }
  func.func @transform_0(%arg0: i32, %arg1: i32) -> (i32, i32, i32) {
    %c0_i32 = arith.constant 0 : i32
    %c0_i32_0 = arith.constant 0 : i32
    %c0_i32_1 = arith.constant 0 : i32
    return %arg0, %c0_i32, %c0_i32_0 : i32, i32, i32
  }
  func.func @transform_1(%arg0: i32, %arg1: i32) -> (i32, i32, i32) {
    %c0_i32 = arith.constant 0 : i32
    %c0_i32_0 = arith.constant 0 : i32
    %c0_i32_1 = arith.constant 0 : i32
    return %arg1, %c0_i32, %c0_i32_0 : i32, i32, i32
  }
  func.func @transform_2(%arg0: i32, %arg1: i32) -> (i32, i32, i32) {
    %c0_i32 = arith.constant 0 : i32
    %c0_i32_0 = arith.constant 0 : i32
    %c0_i32_1 = arith.constant 0 : i32
    return %arg1, %c0_i32, %c0_i32_0 : i32, i32, i32
  }
  func.func @transform_3(%arg0: i32, %arg1: i32) -> (i32, i32, i32) {
    %c0_i32 = arith.constant 0 : i32
    %c0_i32_0 = arith.constant 0 : i32
    %c0_i32_1 = arith.constant 0 : i32
    return %arg1, %c0_i32, %c0_i32_0 : i32, i32, i32
  }
  func.func @transform_4(%arg0: i32, %arg1: i32) -> (i32, i32, i32) {
    %c0_i32 = arith.constant 0 : i32
    %c0_i32_0 = arith.constant 0 : i32
    %c0_i32_1 = arith.constant 0 : i32
    return %arg1, %c0_i32, %c0_i32_0 : i32, i32, i32
  }
  func.func @transform_5(%arg0: i32, %arg1: i32) -> (i32, i32, i32) {
    %c0_i32 = arith.constant 0 : i32
    %c0_i32_0 = arith.constant 0 : i32
    %c0_i32_1 = arith.constant 0 : i32
    return %arg1, %c0_i32, %c0_i32_0 : i32, i32, i32
  }
  func.func @transform_6(%arg0: i32, %arg1: i32) -> (i32, i32, i32) {
    %c0_i32 = arith.constant 0 : i32
    %c0_i32_0 = arith.constant 0 : i32
    %c0_i32_1 = arith.constant 0 : i32
    return %arg1, %c0_i32, %c0_i32_0 : i32, i32, i32
  }
  func.func @transform_7(%arg0: i32, %arg1: i32) -> (i32, i32, i32) {
    %c0_i32 = arith.constant 0 : i32
    %c0_i32_0 = arith.constant 0 : i32
    %c0_i32_1 = arith.constant 0 : i32
    return %arg1, %c0_i32, %c0_i32_0 : i32, i32, i32
  }
  func.func @transform_8(%arg0: i32, %arg1: i32) -> (i32, i32, i32) {
    %c0_i32 = arith.constant 0 : i32
    %c0_i32_0 = arith.constant 0 : i32
    %c0_i32_1 = arith.constant 0 : i32
    return %arg1, %c0_i32, %c0_i32_0 : i32, i32, i32
  }
  func.func @transform_9(%arg0: i32, %arg1: i32) -> (i32, i32, i32) {
    %c0_i32 = arith.constant 0 : i32
    %c0_i32_0 = arith.constant 0 : i32
    %c0_i32_1 = arith.constant 0 : i32
    return %arg1, %c0_i32, %c0_i32_0 : i32, i32, i32
  }
  func.func @transform_10(%arg0: i32, %arg1: i32) -> (i32, i32, i32) {
    %c0_i32 = arith.constant 0 : i32
    %c0_i32_0 = arith.constant 0 : i32
    %c0_i32_1 = arith.constant 0 : i32
    return %arg1, %c0_i32, %c0_i32_0 : i32, i32, i32
  }
  func.func @transform_11(%arg0: i32, %arg1: i32) -> (i32, i32, i32) {
    %c0_i32 = arith.constant 0 : i32
    %c0_i32_0 = arith.constant 0 : i32
    %c0_i32_1 = arith.constant 0 : i32
    return %arg1, %c0_i32, %c0_i32_0 : i32, i32, i32
  }
  func.func @transform_12(%arg0: i32, %arg1: i32) -> (i32, i32, i32) {
    %c0_i32 = arith.constant 0 : i32
    %c0_i32_0 = arith.constant 0 : i32
    %c0_i32_1 = arith.constant 0 : i32
    return %arg1, %c0_i32, %c0_i32_0 : i32, i32, i32
  }
  func.func @transform_13(%arg0: i32, %arg1: i32) -> (i32, i32, i32, i32) {
    %c0_i32 = arith.constant 0 : i32
    %c0_i32_0 = arith.constant 0 : i32
    %c0_i32_1 = arith.constant 0 : i32
    return %arg1, %arg0, %c0_i32, %c0_i32_0 : i32, i32, i32, i32
  }
}

module attributes {stable_mosaic.version = 11 : i64} {
  func.func @_enc_stack_kernel(%arg0: i32, %arg1: i32, %arg2: memref<1x8x32xf32, #tpu.memory_space<vmem>>, %arg3: memref<1x32x64xf32, #tpu.memory_space<vmem>>, %arg4: memref<1x1x64xf32, #tpu.memory_space<vmem>>, %arg5: memref<1x32x128xf32, #tpu.memory_space<vmem>>, %arg6: memref<1x1x32xf32, #tpu.memory_space<vmem>>, %arg7: memref<1x1x32xf32, #tpu.memory_space<vmem>>, %arg8: memref<1x1x32xf32, #tpu.memory_space<vmem>>, %arg9: memref<1x1x32xf32, #tpu.memory_space<vmem>>, %arg10: memref<1x1x32xf32, #tpu.memory_space<vmem>>, %arg11: memref<1x32x128xf32, #tpu.memory_space<vmem>>, %arg12: memref<1x1x128xf32, #tpu.memory_space<vmem>>, %arg13: memref<1x128x32xf32, #tpu.memory_space<vmem>>, %arg14: memref<1x1x32xf32, #tpu.memory_space<vmem>>, %arg15: memref<1x8x32xf32, #tpu.memory_space<vmem>>, %arg16: memref<8x32xf32, #tpu.memory_space<vmem>>) attributes {dimension_semantics = [#tpu.dimension_semantics<parallel>, #tpu.dimension_semantics<arbitrary>], iteration_bounds = array<i64: 2, 2>, scalar_prefetch = 0 : i64, scratch_operands = 1 : i64, tpu.core_type = #tpu.core_type<tc>, window_params = [{transform_indices = @transform_0, window_bounds = array<i64: 1, 8, 32>}, {transform_indices = @transform_1, window_bounds = array<i64: 1, 32, 64>}, {transform_indices = @transform_2, window_bounds = array<i64: 1, 1, 64>}, {transform_indices = @transform_3, window_bounds = array<i64: 1, 32, 128>}, {transform_indices = @transform_4, window_bounds = array<i64: 1, 1, 32>}, {transform_indices = @transform_5, window_bounds = array<i64: 1, 1, 32>}, {transform_indices = @transform_6, window_bounds = array<i64: 1, 1, 32>}, {transform_indices = @transform_7, window_bounds = array<i64: 1, 1, 32>}, {transform_indices = @transform_8, window_bounds = array<i64: 1, 1, 32>}, {transform_indices = @transform_9, window_bounds = array<i64: 1, 32, 128>}, {transform_indices = @transform_10, window_bounds = array<i64: 1, 1, 128>}, {transform_indices = @transform_11, window_bounds = array<i64: 1, 128, 32>}, {transform_indices = @transform_12, window_bounds = array<i64: 1, 1, 32>}, {transform_indices = @transform_13, window_bounds = array<i64: 1, 8, 32>}]} {
    %c0_i32 = arith.constant 0 : i32
    %0 = arith.cmpi eq, %arg1, %c0_i32 : i32
    %1 = arith.extui %0 : i1 to i32
    %c0_i32_0 = arith.constant 0 : i32
    %2 = arith.cmpi ne, %1, %c0_i32_0 : i32
    scf.if %2 {
      %c0_80 = arith.constant 0 : index
      %c0_81 = arith.constant 0 : index
      %c0_82 = arith.constant 0 : index
      %179 = vector.load %arg2[%c0_80, %c0_81, %c0_82] : memref<1x8x32xf32, #tpu.memory_space<vmem>>, vector<1x8x32xf32>
      %180 = vector.shape_cast %179 : vector<1x8x32xf32> to vector<8x32xf32>
      %c0_83 = arith.constant 0 : index
      %c0_84 = arith.constant 0 : index
      %181 = vector.load %arg16[%c0_83, %c0_84] : memref<8x32xf32, #tpu.memory_space<vmem>>, vector<8x32xf32>
      tpu.vector_store %arg16[%c0_83, %c0_84], %180 {strides = array<i32>} : memref<8x32xf32, #tpu.memory_space<vmem>>, vector<8x32xf32>,
    } else {
    }
    %c0 = arith.constant 0 : index
    %c0_1 = arith.constant 0 : index
    %c0_2 = arith.constant 0 : index
    %3 = vector.load %arg3[%c0, %c0_1, %c0_2] : memref<1x32x64xf32, #tpu.memory_space<vmem>>, vector<1x32x64xf32>
    %4 = vector.shape_cast %3 : vector<1x32x64xf32> to vector<32x64xf32>
    %c0_3 = arith.constant 0 : index
    %c0_4 = arith.constant 0 : index
    %c0_5 = arith.constant 0 : index
    %5 = vector.load %arg4[%c0_3, %c0_4, %c0_5] : memref<1x1x64xf32, #tpu.memory_space<vmem>>, vector<1x1x64xf32>
    %6 = vector.shape_cast %5 : vector<1x1x64xf32> to vector<1x64xf32>
    %c0_6 = arith.constant 0 : index
    %c0_7 = arith.constant 0 : index
    %c0_8 = arith.constant 0 : index
    %7 = vector.load %arg5[%c0_6, %c0_7, %c0_8] : memref<1x32x128xf32, #tpu.memory_space<vmem>>, vector<1x32x128xf32>
    %8 = vector.shape_cast %7 : vector<1x32x128xf32> to vector<32x128xf32>
    %c0_9 = arith.constant 0 : index
    %c0_10 = arith.constant 0 : index
    %c0_11 = arith.constant 0 : index
    %9 = vector.load %arg6[%c0_9, %c0_10, %c0_11] : memref<1x1x32xf32, #tpu.memory_space<vmem>>, vector<1x1x32xf32>
    %10 = vector.shape_cast %9 : vector<1x1x32xf32> to vector<1x32xf32>
    %c0_12 = arith.constant 0 : index
    %c0_13 = arith.constant 0 : index
    %c0_14 = arith.constant 0 : index
    %11 = vector.load %arg7[%c0_12, %c0_13, %c0_14] : memref<1x1x32xf32, #tpu.memory_space<vmem>>, vector<1x1x32xf32>
    %12 = vector.shape_cast %11 : vector<1x1x32xf32> to vector<1x32xf32>
    %c0_15 = arith.constant 0 : index
    %c0_16 = arith.constant 0 : index
    %c0_17 = arith.constant 0 : index
    %13 = vector.load %arg8[%c0_15, %c0_16, %c0_17] : memref<1x1x32xf32, #tpu.memory_space<vmem>>, vector<1x1x32xf32>
    %14 = vector.shape_cast %13 : vector<1x1x32xf32> to vector<1x32xf32>
    %c0_18 = arith.constant 0 : index
    %c0_19 = arith.constant 0 : index
    %c0_20 = arith.constant 0 : index
    %15 = vector.load %arg9[%c0_18, %c0_19, %c0_20] : memref<1x1x32xf32, #tpu.memory_space<vmem>>, vector<1x1x32xf32>
    %16 = vector.shape_cast %15 : vector<1x1x32xf32> to vector<1x32xf32>
    %c0_21 = arith.constant 0 : index
    %c0_22 = arith.constant 0 : index
    %c0_23 = arith.constant 0 : index
    %17 = vector.load %arg10[%c0_21, %c0_22, %c0_23] : memref<1x1x32xf32, #tpu.memory_space<vmem>>, vector<1x1x32xf32>
    %18 = vector.shape_cast %17 : vector<1x1x32xf32> to vector<1x32xf32>
    %c0_24 = arith.constant 0 : index
    %c0_25 = arith.constant 0 : index
    %c0_26 = arith.constant 0 : index
    %19 = vector.load %arg11[%c0_24, %c0_25, %c0_26] : memref<1x32x128xf32, #tpu.memory_space<vmem>>, vector<1x32x128xf32>
    %20 = vector.shape_cast %19 : vector<1x32x128xf32> to vector<32x128xf32>
    %c0_27 = arith.constant 0 : index
    %c0_28 = arith.constant 0 : index
    %c0_29 = arith.constant 0 : index
    %21 = vector.load %arg12[%c0_27, %c0_28, %c0_29] : memref<1x1x128xf32, #tpu.memory_space<vmem>>, vector<1x1x128xf32>
    %22 = vector.shape_cast %21 : vector<1x1x128xf32> to vector<1x128xf32>
    %c0_30 = arith.constant 0 : index
    %c0_31 = arith.constant 0 : index
    %c0_32 = arith.constant 0 : index
    %23 = vector.load %arg13[%c0_30, %c0_31, %c0_32] : memref<1x128x32xf32, #tpu.memory_space<vmem>>, vector<1x128x32xf32>
    %24 = vector.shape_cast %23 : vector<1x128x32xf32> to vector<128x32xf32>
    %c0_33 = arith.constant 0 : index
    %c0_34 = arith.constant 0 : index
    %c0_35 = arith.constant 0 : index
    %25 = vector.load %arg14[%c0_33, %c0_34, %c0_35] : memref<1x1x32xf32, #tpu.memory_space<vmem>>, vector<1x1x32xf32>
    %26 = vector.shape_cast %25 : vector<1x1x32xf32> to vector<1x32xf32>
    %c0_36 = arith.constant 0 : index
    %c0_37 = arith.constant 0 : index
    %27 = vector.load %arg16[%c0_36, %c0_37] : memref<8x32xf32, #tpu.memory_space<vmem>>, vector<8x32xf32>
    %cst = arith.constant dense<0.000000e+00> : vector<8xf32>
    %28 = vector.multi_reduction <add>, %27, %cst [1] : vector<8x32xf32> to vector<8xf32>
    %29 = vector.shape_cast %28 : vector<8xf32> to vector<8x1xf32>
    %cst_38 = arith.constant 3.200000e+01 : f32
    %30 = vector.broadcast %cst_38 : f32 to vector<8x1xf32>
    %31 = arith.divf %29, %30 : vector<8x1xf32>
    %32 = vector.broadcast %31 : vector<8x1xf32> to vector<8x32xf32>
    %33 = arith.subf %27, %32 : vector<8x32xf32>
    %34 = arith.mulf %33, %33 : vector<8x32xf32>
    %cst_39 = arith.constant dense<0.000000e+00> : vector<8xf32>
    %35 = vector.multi_reduction <add>, %34, %cst_39 [1] : vector<8x32xf32> to vector<8xf32>
    %36 = vector.shape_cast %35 : vector<8xf32> to vector<8x1xf32>
    %cst_40 = arith.constant 3.200000e+01 : f32
    %37 = vector.broadcast %cst_40 : f32 to vector<8x1xf32>
    %38 = arith.divf %36, %37 : vector<8x1xf32>
    %39 = vector.broadcast %31 : vector<8x1xf32> to vector<8x32xf32>
    %40 = arith.subf %27, %39 : vector<8x32xf32>
    %cst_41 = arith.constant 9.99999974E-6 : f32
    %41 = vector.broadcast %cst_41 : f32 to vector<8x1xf32>
    %42 = arith.addf %38, %41 : vector<8x1xf32>
    %43 = math.rsqrt %42 : vector<8x1xf32>
    %44 = vector.broadcast %43 : vector<8x1xf32> to vector<8x32xf32>
    %45 = arith.mulf %40, %44 : vector<8x32xf32>
    %46 = vector.broadcast %12 : vector<1x32xf32> to vector<8x32xf32>
    %47 = arith.mulf %45, %46 : vector<8x32xf32>
    %48 = vector.broadcast %14 : vector<1x32xf32> to vector<8x32xf32>
    %49 = arith.addf %47, %48 : vector<8x32xf32>
    %cst_42 = arith.constant dense<0.000000e+00> : vector<8x64xf32>
    %50 = tpu.matmul %49, %4, %cst_42 {dimension_numbers = #tpu.dot_dimension_numbers<[1], [0], [0], [1], [0, 0, 1, 1], [], []>} : vector<8x32xf32>, vector<32x64xf32>, vector<8x64xf32> -> vector<8x64xf32>
    %51 = vector.broadcast %6 : vector<1x64xf32> to vector<8x64xf32>
    %52 = arith.addf %50, %51 : vector<8x64xf32>
    %cst_43 = arith.constant dense<0.000000e+00> : vector<8x128xf32>
    %53 = tpu.matmul %49, %8, %cst_43 {dimension_numbers = #tpu.dot_dimension_numbers<[1], [0], [0], [1], [0, 0, 1, 1], [], []>} : vector<8x32xf32>, vector<32x128xf32>, vector<8x128xf32> -> vector<8x128xf32>
    %54 = tpu.iota {dimensions = array<i32: 0>} : vector<8x8xi32>
    %55 = tpu.iota {dimensions = array<i32: 1>} : vector<8x8xi32>
    %56 = arith.cmpi sle, %55, %54 : vector<8x8xi32>
    %cst_44 = arith.constant 0.000000e+00 : f32
    %cst_45 = arith.constant -1.000000e+09 : f32
    %57 = vector.broadcast %cst_44 : f32 to vector<8x8xf32>
    %58 = vector.broadcast %cst_45 : f32 to vector<8x8xf32>
    %59 = arith.select %56, %57, %58 : vector<8x8xi1>, vector<8x8xf32>
    %60 = vector.extract_strided_slice %52 {offsets = [0, 0], sizes = [8, 8], strides = [1, 1]} : vector<8x64xf32> to vector<8x8xf32>
    %61 = vector.extract_strided_slice %52 {offsets = [0, 32], sizes = [8, 8], strides = [1, 1]} : vector<8x64xf32> to vector<8x8xf32>
    %cst_46 = arith.constant dense<0.000000e+00> : vector<8x8xf32>
    %62 = tpu.matmul %60, %61, %cst_46 {dimension_numbers = #tpu.dot_dimension_numbers<[1], [1], [0], [0], [0, 0, 1, 0], [], []>} : vector<8x8xf32>, vector<8x8xf32>, vector<8x8xf32> -> vector<8x8xf32>
    %cst_47 = arith.constant 0.353553385 : f32
    %63 = vector.broadcast %cst_47 : f32 to vector<8x8xf32>
    %64 = arith.mulf %62, %63 : vector<8x8xf32>
    %65 = arith.addf %64, %59 : vector<8x8xf32>
    %cst_48 = arith.constant dense<0xFF800000> : vector<8xf32>
    %66 = vector.multi_reduction <maximumf>, %65, %cst_48 [1] : vector<8x8xf32> to vector<8xf32>
    %67 = vector.shape_cast %66 : vector<8xf32> to vector<8x1xf32>
    %68 = vector.broadcast %67 : vector<8x1xf32> to vector<8x8xf32>
    %69 = arith.subf %65, %68 : vector<8x8xf32>
    %70 = math.exp %69 : vector<8x8xf32>
    %cst_49 = arith.constant dense<0.000000e+00> : vector<8xf32>
    %71 = vector.multi_reduction <add>, %70, %cst_49 [1] : vector<8x8xf32> to vector<8xf32>
    %72 = vector.shape_cast %71 : vector<8xf32> to vector<8x1xf32>
    %73 = tpu.reciprocal %72 {approx = true} : vector<8x1xf32> -> vector<8x1xf32>
    %74 = vector.broadcast %73 : vector<8x1xf32> to vector<8x8xf32>
    %75 = arith.mulf %70, %74 : vector<8x8xf32>
    %76 = vector.extract_strided_slice %53 {offsets = [0, 0], sizes = [8, 32], strides = [1, 1]} : vector<8x128xf32> to vector<8x32xf32>
    %cst_50 = arith.constant dense<0.000000e+00> : vector<8x32xf32>
    %77 = tpu.matmul %75, %76, %cst_50 {dimension_numbers = #tpu.dot_dimension_numbers<[1], [0], [0], [1], [0, 0, 1, 1], [], []>} : vector<8x8xf32>, vector<8x32xf32>, vector<8x32xf32> -> vector<8x32xf32>
    %78 = vector.extract_strided_slice %52 {offsets = [0, 8], sizes = [8, 8], strides = [1, 1]} : vector<8x64xf32> to vector<8x8xf32>
    %79 = vector.extract_strided_slice %52 {offsets = [0, 40], sizes = [8, 8], strides = [1, 1]} : vector<8x64xf32> to vector<8x8xf32>
    %cst_51 = arith.constant dense<0.000000e+00> : vector<8x8xf32>
    %80 = tpu.matmul %78, %79, %cst_51 {dimension_numbers = #tpu.dot_dimension_numbers<[1], [1], [0], [0], [0, 0, 1, 0], [], []>} : vector<8x8xf32>, vector<8x8xf32>, vector<8x8xf32> -> vector<8x8xf32>
    %cst_52 = arith.constant 0.353553385 : f32
    %81 = vector.broadcast %cst_52 : f32 to vector<8x8xf32>
    %82 = arith.mulf %80, %81 : vector<8x8xf32>
    %83 = arith.addf %82, %59 : vector<8x8xf32>
    %cst_53 = arith.constant dense<0xFF800000> : vector<8xf32>
    %84 = vector.multi_reduction <maximumf>, %83, %cst_53 [1] : vector<8x8xf32> to vector<8xf32>
    %85 = vector.shape_cast %84 : vector<8xf32> to vector<8x1xf32>
    %86 = vector.broadcast %85 : vector<8x1xf32> to vector<8x8xf32>
    %87 = arith.subf %83, %86 : vector<8x8xf32>
    %88 = math.exp %87 : vector<8x8xf32>
    %cst_54 = arith.constant dense<0.000000e+00> : vector<8xf32>
    %89 = vector.multi_reduction <add>, %88, %cst_54 [1] : vector<8x8xf32> to vector<8xf32>
    %90 = vector.shape_cast %89 : vector<8xf32> to vector<8x1xf32>
    %91 = tpu.reciprocal %90 {approx = true} : vector<8x1xf32> -> vector<8x1xf32>
    %92 = vector.broadcast %91 : vector<8x1xf32> to vector<8x8xf32>
    %93 = arith.mulf %88, %92 : vector<8x8xf32>
    %94 = vector.extract_strided_slice %53 {offsets = [0, 32], sizes = [8, 32], strides = [1, 1]} : vector<8x128xf32> to vector<8x32xf32>
    %cst_55 = arith.constant dense<0.000000e+00> : vector<8x32xf32>
    %95 = tpu.matmul %93, %94, %cst_55 {dimension_numbers = #tpu.dot_dimension_numbers<[1], [0], [0], [1], [0, 0, 1, 1], [], []>} : vector<8x8xf32>, vector<8x32xf32>, vector<8x32xf32> -> vector<8x32xf32>
    %96 = arith.addf %77, %95 : vector<8x32xf32>
    %97 = vector.extract_strided_slice %52 {offsets = [0, 16], sizes = [8, 8], strides = [1, 1]} : vector<8x64xf32> to vector<8x8xf32>
    %98 = vector.extract_strided_slice %52 {offsets = [0, 48], sizes = [8, 8], strides = [1, 1]} : vector<8x64xf32> to vector<8x8xf32>
    %cst_56 = arith.constant dense<0.000000e+00> : vector<8x8xf32>
    %99 = tpu.matmul %97, %98, %cst_56 {dimension_numbers = #tpu.dot_dimension_numbers<[1], [1], [0], [0], [0, 0, 1, 0], [], []>} : vector<8x8xf32>, vector<8x8xf32>, vector<8x8xf32> -> vector<8x8xf32>
    %cst_57 = arith.constant 0.353553385 : f32
    %100 = vector.broadcast %cst_57 : f32 to vector<8x8xf32>
    %101 = arith.mulf %99, %100 : vector<8x8xf32>
    %102 = arith.addf %101, %59 : vector<8x8xf32>
    %cst_58 = arith.constant dense<0xFF800000> : vector<8xf32>
    %103 = vector.multi_reduction <maximumf>, %102, %cst_58 [1] : vector<8x8xf32> to vector<8xf32>
    %104 = vector.shape_cast %103 : vector<8xf32> to vector<8x1xf32>
    %105 = vector.broadcast %104 : vector<8x1xf32> to vector<8x8xf32>
    %106 = arith.subf %102, %105 : vector<8x8xf32>
    %107 = math.exp %106 : vector<8x8xf32>
    %cst_59 = arith.constant dense<0.000000e+00> : vector<8xf32>
    %108 = vector.multi_reduction <add>, %107, %cst_59 [1] : vector<8x8xf32> to vector<8xf32>
    %109 = vector.shape_cast %108 : vector<8xf32> to vector<8x1xf32>
    %110 = tpu.reciprocal %109 {approx = true} : vector<8x1xf32> -> vector<8x1xf32>
    %111 = vector.broadcast %110 : vector<8x1xf32> to vector<8x8xf32>
    %112 = arith.mulf %107, %111 : vector<8x8xf32>
    %113 = vector.extract_strided_slice %53 {offsets = [0, 64], sizes = [8, 32], strides = [1, 1]} : vector<8x128xf32> to vector<8x32xf32>
    %cst_60 = arith.constant dense<0.000000e+00> : vector<8x32xf32>
    %114 = tpu.matmul %112, %113, %cst_60 {dimension_numbers = #tpu.dot_dimension_numbers<[1], [0], [0], [1], [0, 0, 1, 1], [], []>} : vector<8x8xf32>, vector<8x32xf32>, vector<8x32xf32> -> vector<8x32xf32>
    %115 = arith.addf %96, %114 : vector<8x32xf32>
    %116 = vector.extract_strided_slice %52 {offsets = [0, 24], sizes = [8, 8], strides = [1, 1]} : vector<8x64xf32> to vector<8x8xf32>
    %117 = vector.extract_strided_slice %52 {offsets = [0, 56], sizes = [8, 8], strides = [1, 1]} : vector<8x64xf32> to vector<8x8xf32>
    %cst_61 = arith.constant dense<0.000000e+00> : vector<8x8xf32>
    %118 = tpu.matmul %116, %117, %cst_61 {dimension_numbers = #tpu.dot_dimension_numbers<[1], [1], [0], [0], [0, 0, 1, 0], [], []>} : vector<8x8xf32>, vector<8x8xf32>, vector<8x8xf32> -> vector<8x8xf32>
    %cst_62 = arith.constant 0.353553385 : f32
    %119 = vector.broadcast %cst_62 : f32 to vector<8x8xf32>
    %120 = arith.mulf %118, %119 : vector<8x8xf32>
    %121 = arith.addf %120, %59 : vector<8x8xf32>
    %cst_63 = arith.constant dense<0xFF800000> : vector<8xf32>
    %122 = vector.multi_reduction <maximumf>, %121, %cst_63 [1] : vector<8x8xf32> to vector<8xf32>
    %123 = vector.shape_cast %122 : vector<8xf32> to vector<8x1xf32>
    %124 = vector.broadcast %123 : vector<8x1xf32> to vector<8x8xf32>
    %125 = arith.subf %121, %124 : vector<8x8xf32>
    %126 = math.exp %125 : vector<8x8xf32>
    %cst_64 = arith.constant dense<0.000000e+00> : vector<8xf32>
    %127 = vector.multi_reduction <add>, %126, %cst_64 [1] : vector<8x8xf32> to vector<8xf32>
    %128 = vector.shape_cast %127 : vector<8xf32> to vector<8x1xf32>
    %129 = tpu.reciprocal %128 {approx = true} : vector<8x1xf32> -> vector<8x1xf32>
    %130 = vector.broadcast %129 : vector<8x1xf32> to vector<8x8xf32>
    %131 = arith.mulf %126, %130 : vector<8x8xf32>
    %132 = vector.extract_strided_slice %53 {offsets = [0, 96], sizes = [8, 32], strides = [1, 1]} : vector<8x128xf32> to vector<8x32xf32>
    %cst_65 = arith.constant dense<0.000000e+00> : vector<8x32xf32>
    %133 = tpu.matmul %131, %132, %cst_65 {dimension_numbers = #tpu.dot_dimension_numbers<[1], [0], [0], [1], [0, 0, 1, 1], [], []>} : vector<8x8xf32>, vector<8x32xf32>, vector<8x32xf32> -> vector<8x32xf32>
    %134 = arith.addf %115, %133 : vector<8x32xf32>
    %135 = vector.broadcast %10 : vector<1x32xf32> to vector<8x32xf32>
    %136 = arith.addf %134, %135 : vector<8x32xf32>
    %137 = arith.addf %27, %136 : vector<8x32xf32>
    %cst_66 = arith.constant dense<0.000000e+00> : vector<8xf32>
    %138 = vector.multi_reduction <add>, %137, %cst_66 [1] : vector<8x32xf32> to vector<8xf32>
    %139 = vector.shape_cast %138 : vector<8xf32> to vector<8x1xf32>
    %cst_67 = arith.constant 3.200000e+01 : f32
    %140 = vector.broadcast %cst_67 : f32 to vector<8x1xf32>
    %141 = arith.divf %139, %140 : vector<8x1xf32>
    %142 = vector.broadcast %141 : vector<8x1xf32> to vector<8x32xf32>
    %143 = arith.subf %137, %142 : vector<8x32xf32>
    %144 = arith.mulf %143, %143 : vector<8x32xf32>
    %cst_68 = arith.constant dense<0.000000e+00> : vector<8xf32>
    %145 = vector.multi_reduction <add>, %144, %cst_68 [1] : vector<8x32xf32> to vector<8xf32>
    %146 = vector.shape_cast %145 : vector<8xf32> to vector<8x1xf32>
    %cst_69 = arith.constant 3.200000e+01 : f32
    %147 = vector.broadcast %cst_69 : f32 to vector<8x1xf32>
    %148 = arith.divf %146, %147 : vector<8x1xf32>
    %149 = vector.broadcast %141 : vector<8x1xf32> to vector<8x32xf32>
    %150 = arith.subf %137, %149 : vector<8x32xf32>
    %cst_70 = arith.constant 9.99999974E-6 : f32
    %151 = vector.broadcast %cst_70 : f32 to vector<8x1xf32>
    %152 = arith.addf %148, %151 : vector<8x1xf32>
    %153 = math.rsqrt %152 : vector<8x1xf32>
    %154 = vector.broadcast %153 : vector<8x1xf32> to vector<8x32xf32>
    %155 = arith.mulf %150, %154 : vector<8x32xf32>
    %156 = vector.broadcast %16 : vector<1x32xf32> to vector<8x32xf32>
    %157 = arith.mulf %155, %156 : vector<8x32xf32>
    %158 = vector.broadcast %18 : vector<1x32xf32> to vector<8x32xf32>
    %159 = arith.addf %157, %158 : vector<8x32xf32>
    %cst_71 = arith.constant dense<0.000000e+00> : vector<8x128xf32>
    %160 = tpu.matmul %159, %20, %cst_71 {dimension_numbers = #tpu.dot_dimension_numbers<[1], [0], [0], [1], [0, 0, 1, 1], [], []>} : vector<8x32xf32>, vector<32x128xf32>, vector<8x128xf32> -> vector<8x128xf32>
    %161 = vector.broadcast %22 : vector<1x128xf32> to vector<8x128xf32>
    %162 = arith.addf %160, %161 : vector<8x128xf32>
    %cst_72 = arith.constant 1.702000e+00 : f32
    %163 = vector.broadcast %cst_72 : f32 to vector<8x128xf32>
    %164 = arith.mulf %163, %162 : vector<8x128xf32>
    %165 = arith.negf %164 : vector<8x128xf32>
    %166 = math.exp %165 : vector<8x128xf32>
    %cst_73 = arith.constant 1.000000e+00 : f32
    %167 = vector.broadcast %cst_73 : f32 to vector<8x128xf32>
    %168 = arith.addf %167, %166 : vector<8x128xf32>
    %169 = arith.divf %167, %168 : vector<8x128xf32>
    %170 = arith.mulf %162, %169 : vector<8x128xf32>
    %cst_74 = arith.constant dense<0.000000e+00> : vector<8x32xf32>
    %171 = tpu.matmul %170, %24, %cst_74 {dimension_numbers = #tpu.dot_dimension_numbers<[1], [0], [0], [1], [0, 0, 1, 1], [], []>} : vector<8x128xf32>, vector<128x32xf32>, vector<8x32xf32> -> vector<8x32xf32>
    %172 = vector.broadcast %26 : vector<1x32xf32> to vector<8x32xf32>
    %173 = arith.addf %171, %172 : vector<8x32xf32>
    %174 = arith.addf %137, %173 : vector<8x32xf32>
    %c0_75 = arith.constant 0 : index
    %c0_76 = arith.constant 0 : index
    %175 = vector.load %arg16[%c0_75, %c0_76] : memref<8x32xf32, #tpu.memory_space<vmem>>, vector<8x32xf32>
    tpu.vector_store %arg16[%c0_75, %c0_76], %174 {strides = array<i32>} : memref<8x32xf32, #tpu.memory_space<vmem>>, vector<8x32xf32>,
    %c0_77 = arith.constant 0 : index
    %c0_78 = arith.constant 0 : index
    %c0_79 = arith.constant 0 : index
    %176 = vector.load %arg15[%c0_77, %c0_78, %c0_79] : memref<1x8x32xf32, #tpu.memory_space<vmem>>, vector<1x8x32xf32>
    %177 = vector.shape_cast %176 : vector<1x8x32xf32> to vector<8x32xf32>
    %178 = vector.shape_cast %174 : vector<8x32xf32> to vector<1x8x32xf32>
    tpu.vector_store %arg15[%c0_77, %c0_78, %c0_79], %178 {strides = array<i32>} : memref<1x8x32xf32, #tpu.memory_space<vmem>>, vector<1x8x32xf32>,
    return
  }
  func.func @transform_0(%arg0: i32, %arg1: i32) -> (i32, i32, i32) {
    %c0_i32 = arith.constant 0 : i32
    %c0_i32_0 = arith.constant 0 : i32
    %c0_i32_1 = arith.constant 0 : i32
    return %arg0, %c0_i32, %c0_i32_0 : i32, i32, i32
  }
  func.func @transform_1(%arg0: i32, %arg1: i32) -> (i32, i32, i32) {
    %c0_i32 = arith.constant 0 : i32
    %c0_i32_0 = arith.constant 0 : i32
    %c0_i32_1 = arith.constant 0 : i32
    return %arg1, %c0_i32, %c0_i32_0 : i32, i32, i32
  }
  func.func @transform_2(%arg0: i32, %arg1: i32) -> (i32, i32, i32) {
    %c0_i32 = arith.constant 0 : i32
    %c0_i32_0 = arith.constant 0 : i32
    %c0_i32_1 = arith.constant 0 : i32
    return %arg1, %c0_i32, %c0_i32_0 : i32, i32, i32
  }
  func.func @transform_3(%arg0: i32, %arg1: i32) -> (i32, i32, i32) {
    %c0_i32 = arith.constant 0 : i32
    %c0_i32_0 = arith.constant 0 : i32
    %c0_i32_1 = arith.constant 0 : i32
    return %arg1, %c0_i32, %c0_i32_0 : i32, i32, i32
  }
  func.func @transform_4(%arg0: i32, %arg1: i32) -> (i32, i32, i32) {
    %c0_i32 = arith.constant 0 : i32
    %c0_i32_0 = arith.constant 0 : i32
    %c0_i32_1 = arith.constant 0 : i32
    return %arg1, %c0_i32, %c0_i32_0 : i32, i32, i32
  }
  func.func @transform_5(%arg0: i32, %arg1: i32) -> (i32, i32, i32) {
    %c0_i32 = arith.constant 0 : i32
    %c0_i32_0 = arith.constant 0 : i32
    %c0_i32_1 = arith.constant 0 : i32
    return %arg1, %c0_i32, %c0_i32_0 : i32, i32, i32
  }
  func.func @transform_6(%arg0: i32, %arg1: i32) -> (i32, i32, i32) {
    %c0_i32 = arith.constant 0 : i32
    %c0_i32_0 = arith.constant 0 : i32
    %c0_i32_1 = arith.constant 0 : i32
    return %arg1, %c0_i32, %c0_i32_0 : i32, i32, i32
  }
  func.func @transform_7(%arg0: i32, %arg1: i32) -> (i32, i32, i32) {
    %c0_i32 = arith.constant 0 : i32
    %c0_i32_0 = arith.constant 0 : i32
    %c0_i32_1 = arith.constant 0 : i32
    return %arg1, %c0_i32, %c0_i32_0 : i32, i32, i32
  }
  func.func @transform_8(%arg0: i32, %arg1: i32) -> (i32, i32, i32) {
    %c0_i32 = arith.constant 0 : i32
    %c0_i32_0 = arith.constant 0 : i32
    %c0_i32_1 = arith.constant 0 : i32
    return %arg1, %c0_i32, %c0_i32_0 : i32, i32, i32
  }
  func.func @transform_9(%arg0: i32, %arg1: i32) -> (i32, i32, i32) {
    %c0_i32 = arith.constant 0 : i32
    %c0_i32_0 = arith.constant 0 : i32
    %c0_i32_1 = arith.constant 0 : i32
    return %arg1, %c0_i32, %c0_i32_0 : i32, i32, i32
  }
  func.func @transform_10(%arg0: i32, %arg1: i32) -> (i32, i32, i32) {
    %c0_i32 = arith.constant 0 : i32
    %c0_i32_0 = arith.constant 0 : i32
    %c0_i32_1 = arith.constant 0 : i32
    return %arg1, %c0_i32, %c0_i32_0 : i32, i32, i32
  }
  func.func @transform_11(%arg0: i32, %arg1: i32) -> (i32, i32, i32) {
    %c0_i32 = arith.constant 0 : i32
    %c0_i32_0 = arith.constant 0 : i32
    %c0_i32_1 = arith.constant 0 : i32
    return %arg1, %c0_i32, %c0_i32_0 : i32, i32, i32
  }
  func.func @transform_12(%arg0: i32, %arg1: i32) -> (i32, i32, i32) {
    %c0_i32 = arith.constant 0 : i32
    %c0_i32_0 = arith.constant 0 : i32
    %c0_i32_1 = arith.constant 0 : i32
    return %arg1, %c0_i32, %c0_i32_0 : i32, i32, i32
  }
  func.func @transform_13(%arg0: i32, %arg1: i32) -> (i32, i32, i32) {
    %c0_i32 = arith.constant 0 : i32
    %c0_i32_0 = arith.constant 0 : i32
    %c0_i32_1 = arith.constant 0 : i32
    return %arg0, %c0_i32, %c0_i32_0 : i32, i32, i32
  }
}

module attributes {stable_mosaic.version = 11 : i64} {
  func.func @_dec_stack_kernel(%arg0: i32, %arg1: i32, %arg2: memref<1x1x17x32xf32, #tpu.memory_space<vmem>>, %arg3: memref<1x1x32xf32, #tpu.memory_space<vmem>>, %arg4: memref<1x32x16xf32, #tpu.memory_space<vmem>>, %arg5: memref<1x1x16xf32, #tpu.memory_space<vmem>>, %arg6: memref<1x16x32xf32, #tpu.memory_space<vmem>>, %arg7: memref<1x1x32xf32, #tpu.memory_space<vmem>>, %arg8: memref<1x16x64xf32, #tpu.memory_space<vmem>>, %arg9: memref<1x1x16xf32, #tpu.memory_space<vmem>>, %arg10: memref<1x1x16xf32, #tpu.memory_space<vmem>>, %arg11: memref<1x1x16xf32, #tpu.memory_space<vmem>>, %arg12: memref<1x1x16xf32, #tpu.memory_space<vmem>>, %arg13: memref<1x1x16xf32, #tpu.memory_space<vmem>>, %arg14: memref<1x16x64xf32, #tpu.memory_space<vmem>>, %arg15: memref<1x1x64xf32, #tpu.memory_space<vmem>>, %arg16: memref<1x64x16xf32, #tpu.memory_space<vmem>>, %arg17: memref<1x1x16xf32, #tpu.memory_space<vmem>>, %arg18: memref<32x16xf32, #tpu.memory_space<vmem>>, %arg19: memref<1x16xf32, #tpu.memory_space<vmem>>, %arg20: memref<32x16xf32, #tpu.memory_space<vmem>>, %arg21: memref<1x16xf32, #tpu.memory_space<vmem>>, %arg22: memref<16x16xf32, #tpu.memory_space<vmem>>, %arg23: memref<1x16xf32, #tpu.memory_space<vmem>>, %arg24: memref<1x16x16xf32, #tpu.memory_space<vmem>>, %arg25: memref<17x16xf32, #tpu.memory_space<vmem>>) attributes {dimension_semantics = [#tpu.dimension_semantics<parallel>, #tpu.dimension_semantics<arbitrary>], iteration_bounds = array<i64: 2, 3>, scalar_prefetch = 0 : i64, scratch_operands = 1 : i64, tpu.core_type = #tpu.core_type<tc>, window_params = [{transform_indices = @transform_0, window_bounds = array<i64: 1, 1, 17, 32>}, {transform_indices = @transform_1, window_bounds = array<i64: 1, 1, 32>}, {transform_indices = @transform_2, window_bounds = array<i64: 1, 32, 16>}, {transform_indices = @transform_3, window_bounds = array<i64: 1, 1, 16>}, {transform_indices = @transform_4, window_bounds = array<i64: 1, 16, 32>}, {transform_indices = @transform_5, window_bounds = array<i64: 1, 1, 32>}, {transform_indices = @transform_6, window_bounds = array<i64: 1, 16, 64>}, {transform_indices = @transform_7, window_bounds = array<i64: 1, 1, 16>}, {transform_indices = @transform_8, window_bounds = array<i64: 1, 1, 16>}, {transform_indices = @transform_9, window_bounds = array<i64: 1, 1, 16>}, {transform_indices = @transform_10, window_bounds = array<i64: 1, 1, 16>}, {transform_indices = @transform_11, window_bounds = array<i64: 1, 1, 16>}, {transform_indices = @transform_12, window_bounds = array<i64: 1, 16, 64>}, {transform_indices = @transform_13, window_bounds = array<i64: 1, 1, 64>}, {transform_indices = @transform_14, window_bounds = array<i64: 1, 64, 16>}, {transform_indices = @transform_15, window_bounds = array<i64: 1, 1, 16>}, {pipeline_mode = #tpu.pipeline_mode<synchronous>, transform_indices = @transform_16, window_bounds = array<i64: 32, 16>}, {pipeline_mode = #tpu.pipeline_mode<synchronous>, transform_indices = @transform_17, window_bounds = array<i64: 1, 16>}, {pipeline_mode = #tpu.pipeline_mode<synchronous>, transform_indices = @transform_18, window_bounds = array<i64: 32, 16>}, {pipeline_mode = #tpu.pipeline_mode<synchronous>, transform_indices = @transform_19, window_bounds = array<i64: 1, 16>}, {pipeline_mode = #tpu.pipeline_mode<synchronous>, transform_indices = @transform_20, window_bounds = array<i64: 16, 16>}, {pipeline_mode = #tpu.pipeline_mode<synchronous>, transform_indices = @transform_21, window_bounds = array<i64: 1, 16>}, {transform_indices = @transform_22, window_bounds = array<i64: 1, 16, 16>}]} {
    %c0 = arith.constant 0 : index
    %c0_0 = arith.constant 0 : index
    %c0_1 = arith.constant 0 : index
    %c0_2 = arith.constant 0 : index
    %0 = vector.load %arg2[%c0, %c0_0, %c0_1, %c0_2] : memref<1x1x17x32xf32, #tpu.memory_space<vmem>>, vector<1x1x17x32xf32>
    %1 = vector.shape_cast %0 : vector<1x1x17x32xf32> to vector<17x32xf32>
    %c0_3 = arith.constant 0 : index
    %c0_4 = arith.constant 0 : index
    %c0_5 = arith.constant 0 : index
    %2 = vector.load %arg4[%c0_3, %c0_4, %c0_5] : memref<1x32x16xf32, #tpu.memory_space<vmem>>, vector<1x32x16xf32>
    %3 = vector.shape_cast %2 : vector<1x32x16xf32> to vector<32x16xf32>
    %cst = arith.constant dense<0.000000e+00> : vector<17x16xf32>
    %4 = tpu.matmul %1, %3, %cst {dimension_numbers = #tpu.dot_dimension_numbers<[1], [0], [0], [1], [0, 0, 1, 1], [], []>} : vector<17x32xf32>, vector<32x16xf32>, vector<17x16xf32> -> vector<17x16xf32>
    %c0_6 = arith.constant 0 : index
    %c0_7 = arith.constant 0 : index
    %c0_8 = arith.constant 0 : index
    %5 = vector.load %arg5[%c0_6, %c0_7, %c0_8] : memref<1x1x16xf32, #tpu.memory_space<vmem>>, vector<1x1x16xf32>
    %6 = vector.shape_cast %5 : vector<1x1x16xf32> to vector<1x16xf32>
    %7 = vector.broadcast %6 : vector<1x16xf32> to vector<17x16xf32>
    %8 = arith.addf %4, %7 : vector<17x16xf32>
    %c0_i32 = arith.constant 0 : i32
    %9 = arith.cmpi eq, %arg1, %c0_i32 : i32
    %10 = arith.extui %9 : i1 to i32
    %c0_i32_9 = arith.constant 0 : i32
    %11 = arith.cmpi ne, %10, %c0_i32_9 : i32
    scf.if %11 {
      %c0_89 = arith.constant 0 : index
      %c0_90 = arith.constant 0 : index
      %c0_91 = arith.constant 0 : index
      %181 = vector.load %arg3[%c0_89, %c0_90, %c0_91] : memref<1x1x32xf32, #tpu.memory_space<vmem>>, vector<1x1x32xf32>
      %182 = vector.shape_cast %181 : vector<1x1x32xf32> to vector<1x32xf32>
      %c0_92 = arith.constant 0 : index
      %c0_93 = arith.constant 0 : index
      %183 = vector.load %arg18[%c0_92, %c0_93] : memref<32x16xf32, #tpu.memory_space<vmem>>, vector<32x16xf32>
      %cst_94 = arith.constant dense<0.000000e+00> : vector<1x16xf32>
      %184 = tpu.matmul %182, %183, %cst_94 {dimension_numbers = #tpu.dot_dimension_numbers<[1], [0], [0], [1], [0, 0, 1, 1], [], []>} : vector<1x32xf32>, vector<32x16xf32>, vector<1x16xf32> -> vector<1x16xf32>
      %c0_95 = arith.constant 0 : index
      %c0_96 = arith.constant 0 : index
      %185 = vector.load %arg19[%c0_95, %c0_96] : memref<1x16xf32, #tpu.memory_space<vmem>>, vector<1x16xf32>
      %186 = arith.addf %184, %185 : vector<1x16xf32>
      %c0_97 = arith.constant 0 : index
      %c0_98 = arith.constant 0 : index
      %187 = vector.load %arg20[%c0_97, %c0_98] : memref<32x16xf32, #tpu.memory_space<vmem>>, vector<32x16xf32>
      %cst_99 = arith.constant dense<0.000000e+00> : vector<1x16xf32>
      %188 = tpu.matmul %182, %187, %cst_99 {dimension_numbers = #tpu.dot_dimension_numbers<[1], [0], [0], [1], [0, 0, 1, 1], [], []>} : vector<1x32xf32>, vector<32x16xf32>, vector<1x16xf32> -> vector<1x16xf32>
      %c0_100 = arith.constant 0 : index
      %c0_101 = arith.constant 0 : index
      %189 = vector.load %arg21[%c0_100, %c0_101] : memref<1x16xf32, #tpu.memory_space<vmem>>, vector<1x16xf32>
      %190 = arith.addf %188, %189 : vector<1x16xf32>
      %191 = vector.broadcast %186 : vector<1x16xf32> to vector<17x16xf32>
      %192 = arith.mulf %8, %191 : vector<17x16xf32>
      %193 = vector.broadcast %190 : vector<1x16xf32> to vector<17x16xf32>
      %194 = arith.addf %192, %193 : vector<17x16xf32>
      %c0_102 = arith.constant 0 : index
      %c0_103 = arith.constant 0 : index
      %195 = vector.load %arg25[%c0_102, %c0_103] : memref<17x16xf32, #tpu.memory_space<vmem>>, vector<17x16xf32>
      tpu.vector_store %arg25[%c0_102, %c0_103], %194 {strides = array<i32>} : memref<17x16xf32, #tpu.memory_space<vmem>>, vector<17x16xf32>,
    } else {
    }
    %c0_i32_10 = arith.constant 0 : i32
    %12 = arith.cmpi ne, %arg1, %c0_i32_10 : i32
    %13 = arith.extui %12 : i1 to i32
    %c0_i32_11 = arith.constant 0 : i32
    %14 = arith.cmpi ne, %13, %c0_i32_11 : i32
    scf.if %14 {
      %c0_89 = arith.constant 0 : index
      %c0_90 = arith.constant 0 : index
      %181 = vector.load %arg25[%c0_89, %c0_90] : memref<17x16xf32, #tpu.memory_space<vmem>>, vector<17x16xf32>
      %182 = arith.addf %181, %8 : vector<17x16xf32>
      %c0_91 = arith.constant 0 : index
      %c0_92 = arith.constant 0 : index
      %183 = vector.load %arg25[%c0_91, %c0_92] : memref<17x16xf32, #tpu.memory_space<vmem>>, vector<17x16xf32>
      tpu.vector_store %arg25[%c0_91, %c0_92], %182 {strides = array<i32>} : memref<17x16xf32, #tpu.memory_space<vmem>>, vector<17x16xf32>,
    } else {
    }
    %c0_12 = arith.constant 0 : index
    %c0_13 = arith.constant 0 : index
    %c0_14 = arith.constant 0 : index
    %15 = vector.load %arg6[%c0_12, %c0_13, %c0_14] : memref<1x16x32xf32, #tpu.memory_space<vmem>>, vector<1x16x32xf32>
    %16 = vector.shape_cast %15 : vector<1x16x32xf32> to vector<16x32xf32>
    %c0_15 = arith.constant 0 : index
    %c0_16 = arith.constant 0 : index
    %c0_17 = arith.constant 0 : index
    %17 = vector.load %arg7[%c0_15, %c0_16, %c0_17] : memref<1x1x32xf32, #tpu.memory_space<vmem>>, vector<1x1x32xf32>
    %18 = vector.shape_cast %17 : vector<1x1x32xf32> to vector<1x32xf32>
    %c0_18 = arith.constant 0 : index
    %c0_19 = arith.constant 0 : index
    %c0_20 = arith.constant 0 : index
    %19 = vector.load %arg8[%c0_18, %c0_19, %c0_20] : memref<1x16x64xf32, #tpu.memory_space<vmem>>, vector<1x16x64xf32>
    %20 = vector.shape_cast %19 : vector<1x16x64xf32> to vector<16x64xf32>
    %c0_21 = arith.constant 0 : index
    %c0_22 = arith.constant 0 : index
    %c0_23 = arith.constant 0 : index
    %21 = vector.load %arg9[%c0_21, %c0_22, %c0_23] : memref<1x1x16xf32, #tpu.memory_space<vmem>>, vector<1x1x16xf32>
    %22 = vector.shape_cast %21 : vector<1x1x16xf32> to vector<1x16xf32>
    %c0_24 = arith.constant 0 : index
    %c0_25 = arith.constant 0 : index
    %c0_26 = arith.constant 0 : index
    %23 = vector.load %arg10[%c0_24, %c0_25, %c0_26] : memref<1x1x16xf32, #tpu.memory_space<vmem>>, vector<1x1x16xf32>
    %24 = vector.shape_cast %23 : vector<1x1x16xf32> to vector<1x16xf32>
    %c0_27 = arith.constant 0 : index
    %c0_28 = arith.constant 0 : index
    %c0_29 = arith.constant 0 : index
    %25 = vector.load %arg11[%c0_27, %c0_28, %c0_29] : memref<1x1x16xf32, #tpu.memory_space<vmem>>, vector<1x1x16xf32>
    %26 = vector.shape_cast %25 : vector<1x1x16xf32> to vector<1x16xf32>
    %c0_30 = arith.constant 0 : index
    %c0_31 = arith.constant 0 : index
    %c0_32 = arith.constant 0 : index
    %27 = vector.load %arg12[%c0_30, %c0_31, %c0_32] : memref<1x1x16xf32, #tpu.memory_space<vmem>>, vector<1x1x16xf32>
    %28 = vector.shape_cast %27 : vector<1x1x16xf32> to vector<1x16xf32>
    %c0_33 = arith.constant 0 : index
    %c0_34 = arith.constant 0 : index
    %c0_35 = arith.constant 0 : index
    %29 = vector.load %arg13[%c0_33, %c0_34, %c0_35] : memref<1x1x16xf32, #tpu.memory_space<vmem>>, vector<1x1x16xf32>
    %30 = vector.shape_cast %29 : vector<1x1x16xf32> to vector<1x16xf32>
    %c0_36 = arith.constant 0 : index
    %c0_37 = arith.constant 0 : index
    %c0_38 = arith.constant 0 : index
    %31 = vector.load %arg14[%c0_36, %c0_37, %c0_38] : memref<1x16x64xf32, #tpu.memory_space<vmem>>, vector<1x16x64xf32>
    %32 = vector.shape_cast %31 : vector<1x16x64xf32> to vector<16x64xf32>
    %c0_39 = arith.constant 0 : index
    %c0_40 = arith.constant 0 : index
    %c0_41 = arith.constant 0 : index
    %33 = vector.load %arg15[%c0_39, %c0_40, %c0_41] : memref<1x1x64xf32, #tpu.memory_space<vmem>>, vector<1x1x64xf32>
    %34 = vector.shape_cast %33 : vector<1x1x64xf32> to vector<1x64xf32>
    %c0_42 = arith.constant 0 : index
    %c0_43 = arith.constant 0 : index
    %c0_44 = arith.constant 0 : index
    %35 = vector.load %arg16[%c0_42, %c0_43, %c0_44] : memref<1x64x16xf32, #tpu.memory_space<vmem>>, vector<1x64x16xf32>
    %36 = vector.shape_cast %35 : vector<1x64x16xf32> to vector<64x16xf32>
    %c0_45 = arith.constant 0 : index
    %c0_46 = arith.constant 0 : index
    %c0_47 = arith.constant 0 : index
    %37 = vector.load %arg17[%c0_45, %c0_46, %c0_47] : memref<1x1x16xf32, #tpu.memory_space<vmem>>, vector<1x1x16xf32>
    %38 = vector.shape_cast %37 : vector<1x1x16xf32> to vector<1x16xf32>
    %c0_48 = arith.constant 0 : index
    %c0_49 = arith.constant 0 : index
    %39 = vector.load %arg25[%c0_48, %c0_49] : memref<17x16xf32, #tpu.memory_space<vmem>>, vector<17x16xf32>
    %cst_50 = arith.constant dense<0.000000e+00> : vector<17x32xf32>
    %40 = tpu.matmul %39, %16, %cst_50 {dimension_numbers = #tpu.dot_dimension_numbers<[1], [0], [0], [1], [0, 0, 1, 1], [], []>} : vector<17x16xf32>, vector<16x32xf32>, vector<17x32xf32> -> vector<17x32xf32>
    %41 = vector.broadcast %18 : vector<1x32xf32> to vector<17x32xf32>
    %42 = arith.addf %40, %41 : vector<17x32xf32>
    %cst_51 = arith.constant dense<0.000000e+00> : vector<17x64xf32>
    %43 = tpu.matmul %39, %20, %cst_51 {dimension_numbers = #tpu.dot_dimension_numbers<[1], [0], [0], [1], [0, 0, 1, 1], [], []>} : vector<17x16xf32>, vector<16x64xf32>, vector<17x64xf32> -> vector<17x64xf32>
    %44 = vector.extract_strided_slice %42 {offsets = [0, 0], sizes = [17, 4], strides = [1, 1]} : vector<17x32xf32> to vector<17x4xf32>
    %45 = vector.extract_strided_slice %42 {offsets = [0, 16], sizes = [17, 4], strides = [1, 1]} : vector<17x32xf32> to vector<17x4xf32>
    %cst_52 = arith.constant dense<0.000000e+00> : vector<17x17xf32>
    %46 = tpu.matmul %44, %45, %cst_52 {dimension_numbers = #tpu.dot_dimension_numbers<[1], [1], [0], [0], [0, 0, 1, 0], [], []>} : vector<17x4xf32>, vector<17x4xf32>, vector<17x17xf32> -> vector<17x17xf32>
    %cst_53 = arith.constant 5.000000e-01 : f32
    %47 = vector.broadcast %cst_53 : f32 to vector<17x17xf32>
    %48 = arith.mulf %46, %47 : vector<17x17xf32>
    %cst_54 = arith.constant dense<0xFF800000> : vector<17xf32>
    %49 = vector.multi_reduction <maximumf>, %48, %cst_54 [1] : vector<17x17xf32> to vector<17xf32>
    %50 = vector.shape_cast %49 : vector<17xf32> to vector<17x1xf32>
    %51 = vector.broadcast %50 : vector<17x1xf32> to vector<17x17xf32>
    %52 = arith.subf %48, %51 : vector<17x17xf32>
    %53 = math.exp %52 : vector<17x17xf32>
    %cst_55 = arith.constant dense<0.000000e+00> : vector<17xf32>
    %54 = vector.multi_reduction <add>, %53, %cst_55 [1] : vector<17x17xf32> to vector<17xf32>
    %55 = vector.shape_cast %54 : vector<17xf32> to vector<17x1xf32>
    %56 = tpu.reciprocal %55 {approx = true} : vector<17x1xf32> -> vector<17x1xf32>
    %57 = vector.broadcast %56 : vector<17x1xf32> to vector<17x17xf32>
    %58 = arith.mulf %53, %57 : vector<17x17xf32>
    %59 = vector.extract_strided_slice %43 {offsets = [0, 0], sizes = [17, 16], strides = [1, 1]} : vector<17x64xf32> to vector<17x16xf32>
    %cst_56 = arith.constant dense<0.000000e+00> : vector<17x16xf32>
    %60 = tpu.matmul %58, %59, %cst_56 {dimension_numbers = #tpu.dot_dimension_numbers<[1], [0], [0], [1], [0, 0, 1, 1], [], []>} : vector<17x17xf32>, vector<17x16xf32>, vector<17x16xf32> -> vector<17x16xf32>
    %61 = vector.extract_strided_slice %42 {offsets = [0, 4], sizes = [17, 4], strides = [1, 1]} : vector<17x32xf32> to vector<17x4xf32>
    %62 = vector.extract_strided_slice %42 {offsets = [0, 20], sizes = [17, 4], strides = [1, 1]} : vector<17x32xf32> to vector<17x4xf32>
    %cst_57 = arith.constant dense<0.000000e+00> : vector<17x17xf32>
    %63 = tpu.matmul %61, %62, %cst_57 {dimension_numbers = #tpu.dot_dimension_numbers<[1], [1], [0], [0], [0, 0, 1, 0], [], []>} : vector<17x4xf32>, vector<17x4xf32>, vector<17x17xf32> -> vector<17x17xf32>
    %cst_58 = arith.constant 5.000000e-01 : f32
    %64 = vector.broadcast %cst_58 : f32 to vector<17x17xf32>
    %65 = arith.mulf %63, %64 : vector<17x17xf32>
    %cst_59 = arith.constant dense<0xFF800000> : vector<17xf32>
    %66 = vector.multi_reduction <maximumf>, %65, %cst_59 [1] : vector<17x17xf32> to vector<17xf32>
    %67 = vector.shape_cast %66 : vector<17xf32> to vector<17x1xf32>
    %68 = vector.broadcast %67 : vector<17x1xf32> to vector<17x17xf32>
    %69 = arith.subf %65, %68 : vector<17x17xf32>
    %70 = math.exp %69 : vector<17x17xf32>
    %cst_60 = arith.constant dense<0.000000e+00> : vector<17xf32>
    %71 = vector.multi_reduction <add>, %70, %cst_60 [1] : vector<17x17xf32> to vector<17xf32>
    %72 = vector.shape_cast %71 : vector<17xf32> to vector<17x1xf32>
    %73 = tpu.reciprocal %72 {approx = true} : vector<17x1xf32> -> vector<17x1xf32>
    %74 = vector.broadcast %73 : vector<17x1xf32> to vector<17x17xf32>
    %75 = arith.mulf %70, %74 : vector<17x17xf32>
    %76 = vector.extract_strided_slice %43 {offsets = [0, 16], sizes = [17, 16], strides = [1, 1]} : vector<17x64xf32> to vector<17x16xf32>
    %cst_61 = arith.constant dense<0.000000e+00> : vector<17x16xf32>
    %77 = tpu.matmul %75, %76, %cst_61 {dimension_numbers = #tpu.dot_dimension_numbers<[1], [0], [0], [1], [0, 0, 1, 1], [], []>} : vector<17x17xf32>, vector<17x16xf32>, vector<17x16xf32> -> vector<17x16xf32>
    %78 = arith.addf %60, %77 : vector<17x16xf32>
    %79 = vector.extract_strided_slice %42 {offsets = [0, 8], sizes = [17, 4], strides = [1, 1]} : vector<17x32xf32> to vector<17x4xf32>
    %80 = vector.extract_strided_slice %42 {offsets = [0, 24], sizes = [17, 4], strides = [1, 1]} : vector<17x32xf32> to vector<17x4xf32>
    %cst_62 = arith.constant dense<0.000000e+00> : vector<17x17xf32>
    %81 = tpu.matmul %79, %80, %cst_62 {dimension_numbers = #tpu.dot_dimension_numbers<[1], [1], [0], [0], [0, 0, 1, 0], [], []>} : vector<17x4xf32>, vector<17x4xf32>, vector<17x17xf32> -> vector<17x17xf32>
    %cst_63 = arith.constant 5.000000e-01 : f32
    %82 = vector.broadcast %cst_63 : f32 to vector<17x17xf32>
    %83 = arith.mulf %81, %82 : vector<17x17xf32>
    %cst_64 = arith.constant dense<0xFF800000> : vector<17xf32>
    %84 = vector.multi_reduction <maximumf>, %83, %cst_64 [1] : vector<17x17xf32> to vector<17xf32>
    %85 = vector.shape_cast %84 : vector<17xf32> to vector<17x1xf32>
    %86 = vector.broadcast %85 : vector<17x1xf32> to vector<17x17xf32>
    %87 = arith.subf %83, %86 : vector<17x17xf32>
    %88 = math.exp %87 : vector<17x17xf32>
    %cst_65 = arith.constant dense<0.000000e+00> : vector<17xf32>
    %89 = vector.multi_reduction <add>, %88, %cst_65 [1] : vector<17x17xf32> to vector<17xf32>
    %90 = vector.shape_cast %89 : vector<17xf32> to vector<17x1xf32>
    %91 = tpu.reciprocal %90 {approx = true} : vector<17x1xf32> -> vector<17x1xf32>
    %92 = vector.broadcast %91 : vector<17x1xf32> to vector<17x17xf32>
    %93 = arith.mulf %88, %92 : vector<17x17xf32>
    %94 = vector.extract_strided_slice %43 {offsets = [0, 32], sizes = [17, 16], strides = [1, 1]} : vector<17x64xf32> to vector<17x16xf32>
    %cst_66 = arith.constant dense<0.000000e+00> : vector<17x16xf32>
    %95 = tpu.matmul %93, %94, %cst_66 {dimension_numbers = #tpu.dot_dimension_numbers<[1], [0], [0], [1], [0, 0, 1, 1], [], []>} : vector<17x17xf32>, vector<17x16xf32>, vector<17x16xf32> -> vector<17x16xf32>
    %96 = arith.addf %78, %95 : vector<17x16xf32>
    %97 = vector.extract_strided_slice %42 {offsets = [0, 12], sizes = [17, 4], strides = [1, 1]} : vector<17x32xf32> to vector<17x4xf32>
    %98 = vector.extract_strided_slice %42 {offsets = [0, 28], sizes = [17, 4], strides = [1, 1]} : vector<17x32xf32> to vector<17x4xf32>
    %cst_67 = arith.constant dense<0.000000e+00> : vector<17x17xf32>
    %99 = tpu.matmul %97, %98, %cst_67 {dimension_numbers = #tpu.dot_dimension_numbers<[1], [1], [0], [0], [0, 0, 1, 0], [], []>} : vector<17x4xf32>, vector<17x4xf32>, vector<17x17xf32> -> vector<17x17xf32>
    %cst_68 = arith.constant 5.000000e-01 : f32
    %100 = vector.broadcast %cst_68 : f32 to vector<17x17xf32>
    %101 = arith.mulf %99, %100 : vector<17x17xf32>
    %cst_69 = arith.constant dense<0xFF800000> : vector<17xf32>
    %102 = vector.multi_reduction <maximumf>, %101, %cst_69 [1] : vector<17x17xf32> to vector<17xf32>
    %103 = vector.shape_cast %102 : vector<17xf32> to vector<17x1xf32>
    %104 = vector.broadcast %103 : vector<17x1xf32> to vector<17x17xf32>
    %105 = arith.subf %101, %104 : vector<17x17xf32>
    %106 = math.exp %105 : vector<17x17xf32>
    %cst_70 = arith.constant dense<0.000000e+00> : vector<17xf32>
    %107 = vector.multi_reduction <add>, %106, %cst_70 [1] : vector<17x17xf32> to vector<17xf32>
    %108 = vector.shape_cast %107 : vector<17xf32> to vector<17x1xf32>
    %109 = tpu.reciprocal %108 {approx = true} : vector<17x1xf32> -> vector<17x1xf32>
    %110 = vector.broadcast %109 : vector<17x1xf32> to vector<17x17xf32>
    %111 = arith.mulf %106, %110 : vector<17x17xf32>
    %112 = vector.extract_strided_slice %43 {offsets = [0, 48], sizes = [17, 16], strides = [1, 1]} : vector<17x64xf32> to vector<17x16xf32>
    %cst_71 = arith.constant dense<0.000000e+00> : vector<17x16xf32>
    %113 = tpu.matmul %111, %112, %cst_71 {dimension_numbers = #tpu.dot_dimension_numbers<[1], [0], [0], [1], [0, 0, 1, 1], [], []>} : vector<17x17xf32>, vector<17x16xf32>, vector<17x16xf32> -> vector<17x16xf32>
    %114 = arith.addf %96, %113 : vector<17x16xf32>
    %115 = vector.broadcast %22 : vector<1x16xf32> to vector<17x16xf32>
    %116 = arith.addf %114, %115 : vector<17x16xf32>
    %117 = arith.addf %39, %116 : vector<17x16xf32>
    %cst_72 = arith.constant dense<0.000000e+00> : vector<17xf32>
    %118 = vector.multi_reduction <add>, %117, %cst_72 [1] : vector<17x16xf32> to vector<17xf32>
    %119 = vector.shape_cast %118 : vector<17xf32> to vector<17x1xf32>
    %cst_73 = arith.constant 1.600000e+01 : f32
    %120 = vector.broadcast %cst_73 : f32 to vector<17x1xf32>
    %121 = arith.divf %119, %120 : vector<17x1xf32>
    %122 = vector.broadcast %121 : vector<17x1xf32> to vector<17x16xf32>
    %123 = arith.subf %117, %122 : vector<17x16xf32>
    %124 = arith.mulf %123, %123 : vector<17x16xf32>
    %cst_74 = arith.constant dense<0.000000e+00> : vector<17xf32>
    %125 = vector.multi_reduction <add>, %124, %cst_74 [1] : vector<17x16xf32> to vector<17xf32>
    %126 = vector.shape_cast %125 : vector<17xf32> to vector<17x1xf32>
    %cst_75 = arith.constant 1.600000e+01 : f32
    %127 = vector.broadcast %cst_75 : f32 to vector<17x1xf32>
    %128 = arith.divf %126, %127 : vector<17x1xf32>
    %129 = vector.broadcast %121 : vector<17x1xf32> to vector<17x16xf32>
    %130 = arith.subf %117, %129 : vector<17x16xf32>
    %cst_76 = arith.constant 9.99999974E-6 : f32
    %131 = vector.broadcast %cst_76 : f32 to vector<17x1xf32>
    %132 = arith.addf %128, %131 : vector<17x1xf32>
    %133 = math.rsqrt %132 : vector<17x1xf32>
    %134 = vector.broadcast %133 : vector<17x1xf32> to vector<17x16xf32>
    %135 = arith.mulf %130, %134 : vector<17x16xf32>
    %136 = vector.broadcast %24 : vector<1x16xf32> to vector<17x16xf32>
    %137 = arith.mulf %135, %136 : vector<17x16xf32>
    %138 = vector.broadcast %26 : vector<1x16xf32> to vector<17x16xf32>
    %139 = arith.addf %137, %138 : vector<17x16xf32>
    %cst_77 = arith.constant dense<0.000000e+00> : vector<17x64xf32>
    %140 = tpu.matmul %139, %32, %cst_77 {dimension_numbers = #tpu.dot_dimension_numbers<[1], [0], [0], [1], [0, 0, 1, 1], [], []>} : vector<17x16xf32>, vector<16x64xf32>, vector<17x64xf32> -> vector<17x64xf32>
    %141 = vector.broadcast %34 : vector<1x64xf32> to vector<17x64xf32>
    %142 = arith.addf %140, %141 : vector<17x64xf32>
    %cst_78 = arith.constant 1.702000e+00 : f32
    %143 = vector.broadcast %cst_78 : f32 to vector<17x64xf32>
    %144 = arith.mulf %143, %142 : vector<17x64xf32>
    %145 = arith.negf %144 : vector<17x64xf32>
    %146 = math.exp %145 : vector<17x64xf32>
    %cst_79 = arith.constant 1.000000e+00 : f32
    %147 = vector.broadcast %cst_79 : f32 to vector<17x64xf32>
    %148 = arith.addf %147, %146 : vector<17x64xf32>
    %149 = arith.divf %147, %148 : vector<17x64xf32>
    %150 = arith.mulf %142, %149 : vector<17x64xf32>
    %cst_80 = arith.constant dense<0.000000e+00> : vector<17x16xf32>
    %151 = tpu.matmul %150, %36, %cst_80 {dimension_numbers = #tpu.dot_dimension_numbers<[1], [0], [0], [1], [0, 0, 1, 1], [], []>} : vector<17x64xf32>, vector<64x16xf32>, vector<17x16xf32> -> vector<17x16xf32>
    %152 = vector.broadcast %38 : vector<1x16xf32> to vector<17x16xf32>
    %153 = arith.addf %151, %152 : vector<17x16xf32>
    %154 = arith.addf %139, %153 : vector<17x16xf32>
    %cst_81 = arith.constant dense<0.000000e+00> : vector<17xf32>
    %155 = vector.multi_reduction <add>, %154, %cst_81 [1] : vector<17x16xf32> to vector<17xf32>
    %156 = vector.shape_cast %155 : vector<17xf32> to vector<17x1xf32>
    %cst_82 = arith.constant 1.600000e+01 : f32
    %157 = vector.broadcast %cst_82 : f32 to vector<17x1xf32>
    %158 = arith.divf %156, %157 : vector<17x1xf32>
    %159 = vector.broadcast %158 : vector<17x1xf32> to vector<17x16xf32>
    %160 = arith.subf %154, %159 : vector<17x16xf32>
    %161 = arith.mulf %160, %160 : vector<17x16xf32>
    %cst_83 = arith.constant dense<0.000000e+00> : vector<17xf32>
    %162 = vector.multi_reduction <add>, %161, %cst_83 [1] : vector<17x16xf32> to vector<17xf32>
    %163 = vector.shape_cast %162 : vector<17xf32> to vector<17x1xf32>
    %cst_84 = arith.constant 1.600000e+01 : f32
    %164 = vector.broadcast %cst_84 : f32 to vector<17x1xf32>
    %165 = arith.divf %163, %164 : vector<17x1xf32>
    %166 = vector.broadcast %158 : vector<17x1xf32> to vector<17x16xf32>
    %167 = arith.subf %154, %166 : vector<17x16xf32>
    %cst_85 = arith.constant 9.99999974E-6 : f32
    %168 = vector.broadcast %cst_85 : f32 to vector<17x1xf32>
    %169 = arith.addf %165, %168 : vector<17x1xf32>
    %170 = math.rsqrt %169 : vector<17x1xf32>
    %171 = vector.broadcast %170 : vector<17x1xf32> to vector<17x16xf32>
    %172 = arith.mulf %167, %171 : vector<17x16xf32>
    %173 = vector.broadcast %28 : vector<1x16xf32> to vector<17x16xf32>
    %174 = arith.mulf %172, %173 : vector<17x16xf32>
    %175 = vector.broadcast %30 : vector<1x16xf32> to vector<17x16xf32>
    %176 = arith.addf %174, %175 : vector<17x16xf32>
    %c0_86 = arith.constant 0 : index
    %c0_87 = arith.constant 0 : index
    %177 = vector.load %arg25[%c0_86, %c0_87] : memref<17x16xf32, #tpu.memory_space<vmem>>, vector<17x16xf32>
    tpu.vector_store %arg25[%c0_86, %c0_87], %176 {strides = array<i32>} : memref<17x16xf32, #tpu.memory_space<vmem>>, vector<17x16xf32>,
    %c2_i32 = arith.constant 2 : i32
    %178 = arith.cmpi eq, %arg1, %c2_i32 : i32
    %179 = arith.extui %178 : i1 to i32
    %c0_i32_88 = arith.constant 0 : i32
    %180 = arith.cmpi ne, %179, %c0_i32_88 : i32
    scf.if %180 {
      %181 = vector.extract_strided_slice %176 {offsets = [1, 0], sizes = [16, 16], strides = [1, 1]} : vector<17x16xf32> to vector<16x16xf32>
      %c0_89 = arith.constant 0 : index
      %c0_90 = arith.constant 0 : index
      %182 = vector.load %arg22[%c0_89, %c0_90] : memref<16x16xf32, #tpu.memory_space<vmem>>, vector<16x16xf32>
      %cst_91 = arith.constant dense<0.000000e+00> : vector<16x16xf32>
      %183 = tpu.matmul %181, %182, %cst_91 {dimension_numbers = #tpu.dot_dimension_numbers<[1], [0], [0], [1], [0, 0, 1, 1], [], []>} : vector<16x16xf32>, vector<16x16xf32>, vector<16x16xf32> -> vector<16x16xf32>
      %c0_92 = arith.constant 0 : index
      %c0_93 = arith.constant 0 : index
      %184 = vector.load %arg23[%c0_92, %c0_93] : memref<1x16xf32, #tpu.memory_space<vmem>>, vector<1x16xf32>
      %185 = vector.broadcast %184 : vector<1x16xf32> to vector<16x16xf32>
      %186 = arith.addf %183, %185 : vector<16x16xf32>
      %187 = arith.negf %186 : vector<16x16xf32>
      %188 = math.exp %187 : vector<16x16xf32>
      %cst_94 = arith.constant 1.000000e+00 : f32
      %189 = vector.broadcast %cst_94 : f32 to vector<16x16xf32>
      %190 = arith.addf %189, %188 : vector<16x16xf32>
      %191 = arith.divf %189, %190 : vector<16x16xf32>
      %c0_95 = arith.constant 0 : index
      %c0_96 = arith.constant 0 : index
      %c0_97 = arith.constant 0 : index
      %192 = vector.load %arg24[%c0_95, %c0_96, %c0_97] : memref<1x16x16xf32, #tpu.memory_space<vmem>>, vector<1x16x16xf32>
      %193 = vector.shape_cast %192 : vector<1x16x16xf32> to vector<16x16xf32>
      %194 = vector.shape_cast %191 : vector<16x16xf32> to vector<1x16x16xf32>
      tpu.vector_store %arg24[%c0_95, %c0_96, %c0_97], %194 {strides = array<i32>} : memref<1x16x16xf32, #tpu.memory_space<vmem>>, vector<1x16x16xf32>,
    } else {
    }
    return
  }
  func.func @transform_0(%arg0: i32, %arg1: i32) -> (i32, i32, i32, i32) {
    %c0_i32 = arith.constant 0 : i32
    %c0_i32_0 = arith.constant 0 : i32
    %c0_i32_1 = arith.constant 0 : i32
    return %arg1, %arg0, %c0_i32, %c0_i32_0 : i32, i32, i32, i32
  }
  func.func @transform_1(%arg0: i32, %arg1: i32) -> (i32, i32, i32) {
    %c0_i32 = arith.constant 0 : i32
    %c0_i32_0 = arith.constant 0 : i32
    %c0_i32_1 = arith.constant 0 : i32
    return %arg0, %c0_i32, %c0_i32_0 : i32, i32, i32
  }
  func.func @transform_2(%arg0: i32, %arg1: i32) -> (i32, i32, i32) {
    %c0_i32 = arith.constant 0 : i32
    %c0_i32_0 = arith.constant 0 : i32
    %c0_i32_1 = arith.constant 0 : i32
    return %arg1, %c0_i32, %c0_i32_0 : i32, i32, i32
  }
  func.func @transform_3(%arg0: i32, %arg1: i32) -> (i32, i32, i32) {
    %c0_i32 = arith.constant 0 : i32
    %c0_i32_0 = arith.constant 0 : i32
    %c0_i32_1 = arith.constant 0 : i32
    return %arg1, %c0_i32, %c0_i32_0 : i32, i32, i32
  }
  func.func @transform_4(%arg0: i32, %arg1: i32) -> (i32, i32, i32) {
    %c0_i32 = arith.constant 0 : i32
    %c0_i32_0 = arith.constant 0 : i32
    %c0_i32_1 = arith.constant 0 : i32
    return %arg1, %c0_i32, %c0_i32_0 : i32, i32, i32
  }
  func.func @transform_5(%arg0: i32, %arg1: i32) -> (i32, i32, i32) {
    %c0_i32 = arith.constant 0 : i32
    %c0_i32_0 = arith.constant 0 : i32
    %c0_i32_1 = arith.constant 0 : i32
    return %arg1, %c0_i32, %c0_i32_0 : i32, i32, i32
  }
  func.func @transform_6(%arg0: i32, %arg1: i32) -> (i32, i32, i32) {
    %c0_i32 = arith.constant 0 : i32
    %c0_i32_0 = arith.constant 0 : i32
    %c0_i32_1 = arith.constant 0 : i32
    return %arg1, %c0_i32, %c0_i32_0 : i32, i32, i32
  }
  func.func @transform_7(%arg0: i32, %arg1: i32) -> (i32, i32, i32) {
    %c0_i32 = arith.constant 0 : i32
    %c0_i32_0 = arith.constant 0 : i32
    %c0_i32_1 = arith.constant 0 : i32
    return %arg1, %c0_i32, %c0_i32_0 : i32, i32, i32
  }
  func.func @transform_8(%arg0: i32, %arg1: i32) -> (i32, i32, i32) {
    %c0_i32 = arith.constant 0 : i32
    %c0_i32_0 = arith.constant 0 : i32
    %c0_i32_1 = arith.constant 0 : i32
    return %arg1, %c0_i32, %c0_i32_0 : i32, i32, i32
  }
  func.func @transform_9(%arg0: i32, %arg1: i32) -> (i32, i32, i32) {
    %c0_i32 = arith.constant 0 : i32
    %c0_i32_0 = arith.constant 0 : i32
    %c0_i32_1 = arith.constant 0 : i32
    return %arg1, %c0_i32, %c0_i32_0 : i32, i32, i32
  }
  func.func @transform_10(%arg0: i32, %arg1: i32) -> (i32, i32, i32) {
    %c0_i32 = arith.constant 0 : i32
    %c0_i32_0 = arith.constant 0 : i32
    %c0_i32_1 = arith.constant 0 : i32
    return %arg1, %c0_i32, %c0_i32_0 : i32, i32, i32
  }
  func.func @transform_11(%arg0: i32, %arg1: i32) -> (i32, i32, i32) {
    %c0_i32 = arith.constant 0 : i32
    %c0_i32_0 = arith.constant 0 : i32
    %c0_i32_1 = arith.constant 0 : i32
    return %arg1, %c0_i32, %c0_i32_0 : i32, i32, i32
  }
  func.func @transform_12(%arg0: i32, %arg1: i32) -> (i32, i32, i32) {
    %c0_i32 = arith.constant 0 : i32
    %c0_i32_0 = arith.constant 0 : i32
    %c0_i32_1 = arith.constant 0 : i32
    return %arg1, %c0_i32, %c0_i32_0 : i32, i32, i32
  }
  func.func @transform_13(%arg0: i32, %arg1: i32) -> (i32, i32, i32) {
    %c0_i32 = arith.constant 0 : i32
    %c0_i32_0 = arith.constant 0 : i32
    %c0_i32_1 = arith.constant 0 : i32
    return %arg1, %c0_i32, %c0_i32_0 : i32, i32, i32
  }
  func.func @transform_14(%arg0: i32, %arg1: i32) -> (i32, i32, i32) {
    %c0_i32 = arith.constant 0 : i32
    %c0_i32_0 = arith.constant 0 : i32
    %c0_i32_1 = arith.constant 0 : i32
    return %arg1, %c0_i32, %c0_i32_0 : i32, i32, i32
  }
  func.func @transform_15(%arg0: i32, %arg1: i32) -> (i32, i32, i32) {
    %c0_i32 = arith.constant 0 : i32
    %c0_i32_0 = arith.constant 0 : i32
    %c0_i32_1 = arith.constant 0 : i32
    return %arg1, %c0_i32, %c0_i32_0 : i32, i32, i32
  }
  func.func @transform_16(%arg0: i32, %arg1: i32) -> (i32, i32) {
    %c0_i32 = arith.constant 0 : i32
    %c0_i32_0 = arith.constant 0 : i32
    %c0_i32_1 = arith.constant 0 : i32
    return %c0_i32, %c0_i32_0 : i32, i32
  }
  func.func @transform_17(%arg0: i32, %arg1: i32) -> (i32, i32) {
    %c0_i32 = arith.constant 0 : i32
    %c0_i32_0 = arith.constant 0 : i32
    %c0_i32_1 = arith.constant 0 : i32
    return %c0_i32, %c0_i32_0 : i32, i32
  }
  func.func @transform_18(%arg0: i32, %arg1: i32) -> (i32, i32) {
    %c0_i32 = arith.constant 0 : i32
    %c0_i32_0 = arith.constant 0 : i32
    %c0_i32_1 = arith.constant 0 : i32
    return %c0_i32, %c0_i32_0 : i32, i32
  }
  func.func @transform_19(%arg0: i32, %arg1: i32) -> (i32, i32) {
    %c0_i32 = arith.constant 0 : i32
    %c0_i32_0 = arith.constant 0 : i32
    %c0_i32_1 = arith.constant 0 : i32
    return %c0_i32, %c0_i32_0 : i32, i32
  }
  func.func @transform_20(%arg0: i32, %arg1: i32) -> (i32, i32) {
    %c0_i32 = arith.constant 0 : i32
    %c0_i32_0 = arith.constant 0 : i32
    %c0_i32_1 = arith.constant 0 : i32
    return %c0_i32, %c0_i32_0 : i32, i32
  }
  func.func @transform_21(%arg0: i32, %arg1: i32) -> (i32, i32) {
    %c0_i32 = arith.constant 0 : i32
    %c0_i32_0 = arith.constant 0 : i32
    %c0_i32_1 = arith.constant 0 : i32
    return %c0_i32, %c0_i32_0 : i32, i32
  }
  func.func @transform_22(%arg0: i32, %arg1: i32) -> (i32, i32, i32) {
    %c0_i32 = arith.constant 0 : i32
    %c0_i32_0 = arith.constant 0 : i32
    %c0_i32_1 = arith.constant 0 : i32
    return %arg0, %c0_i32, %c0_i32_0 : i32, i32, i32
  }
}

</mosaic_0001>

<bundles_post_ra>
// kernel: _clipseg_core.4
= control target key start
LH: loop header
LB: loop body
LE: loop exit
PB: predicated region body
PF: predicated region fallthrough
CT: control target
= control target key end

     0   :  { %s1578_s25 = smov 0   ;;  %s1580_s26 = smov 0   ;;  %s1812_s0 = inlined_call_operand.vmem [shape: f32[2,8,32], index: 0, kind: input, shape index: {}]   ;;  %s1813_s1 = inlined_call_operand.vmem [shape: f32[2,32,64], index: 1, kind: input, shape index: {}]   ;;  %s1814_s2 = inlined_call_operand.vmem [shape: f32[2,1,64], index: 2, kind: input, shape index: {}]   ;;  %s1815_s3 = inlined_call_operand.vmem [shape: f32[2,32,128], index: 3, kind: input, shape index: {}]   ;;  %s1816_s4 = inlined_call_operand.vmem [shape: f32[2,1,32], index: 4, kind: input, shape index: {}]   ;;  %s1817_s5 = inlined_call_operand.vmem [shape: f32[2,1,32], index: 5, kind: input, shape index: {}]   ;;  %s1818_s6 = inlined_call_operand.vmem [shape: f32[2,1,32], index: 6, kind: input, shape index: {}]   ;;  %s1819_s7 = inlined_call_operand.vmem [shape: f32[2,1,32], index: 7, kind: input, shape index: {}]   ;;  %s1820_s8 = inlined_call_operand.vmem [shape: f32[2,1,32], index: 8, kind: input, shape index: {}]   ;;  %s1821_s9 = inlined_call_operand.vmem [shape: f32[2,32,128], index: 9, kind: input, shape index: {}]   ;;  %s1822_s10 = inlined_call_operand.vmem [shape: f32[2,1,128], index: 10, kind: input, shape index: {}]   ;;  %s1823_s11 = inlined_call_operand.vmem [shape: f32[2,128,32], index: 11, kind: input, shape index: {}]   ;;  %s1824_s12 = inlined_call_operand.vmem [shape: f32[2,1,32], index: 12, kind: input, shape index: {}]   ;;  %s1825_s13 = inlined_call_operand.vmem [shape: f32[2,8,32], index: 13, kind: output, shape index: {}]  }
   0x1   :  { %1831 = sst [smem:[#allocation10_spill]] %s1812_s0  ;;  %s1582_s27 = smov 0  }
   0x2   :  { %1832 = sst [smem:[#allocation11_spill]] %s1813_s1  ;;  %s1584_s28 = smov 0  }
   0x3   :  { %1833 = sst [smem:[#allocation12_spill]] %s1814_s2  ;;  %s1586_s29 = smov 0  }
   0x4   :  { %1834 = sst [smem:[#allocation13_spill]] %s1815_s3 }
   0x5   :  { %1835 = sst [smem:[#allocation14_spill]] %s1825_s13 }
   0x6 LB: > { %1836 = sst [smem:[#allocation3_spill]] %s1479_s25  ;;  %s32_s30 = sadd.s32 1, %s1487_s27  ;;  %s1495_s29 = sphi %s1586_s29, %s23_s29   ;;  %s1491_s28 = sphi %s1584_s28, %s1860_s28   ;;  %s1487_s27 = sphi %s1582_s27, %s1859_s27   ;;  %s1483_s26 = sphi %s1580_s26, %s1858_s26   ;;  %s1479_s25 = sphi %s1578_s25, %s1857_s25  }
   0x7   : > { %1837 = sst [smem:[#allocation4_spill]] %s1487_s27  ;;  %s35_s14 = sadd.s32 1, %s1491_s28 }
   0x8   : > { %1838 = sst [smem:[#allocation5_spill]] %s1491_s28  ;;  %p33_p0 = scmp.ge.s32.totalorder %s32_s30, 2 }
   0x9   : > { %1839 = sst [smem:[#allocation6_spill]] %s1495_s29  ;;  %p1338_p1 = scmp.ge.s32.totalorder %s1495_s29, 1 }
   0xa   : > { %p502_p2 = scmp.lt.s32.totalorder %s1495_s29, 5  ;;  %s1862_s30 = smov (%p33_p0, %s32_s30), 0 }
   0xb   : > { %1840 = sst [smem:[#allocation7_spill]] %s1862_s30  ;;  %s1864_s14 = smov (!%p33_p0, %s35_s14), %s1491_s28 }
   0xc   : > { %p503_p3 = pnand %p1338_p1, %p502_p2  ;;  %p37_p4 = scmp.ge.s32.totalorder %s1864_s14, 2 }
   0xe   : > { %s1866_s14 = smov (%p37_p4, %s1864_s14), 0  ;;  %506 = sbr.rel (%p503_p3) target bundleno = 2072 (0x818), region = 72 }
   0xf   : > { %1841 = sst [smem:[#allocation8_spill]] %s1866_s14 }
  0x13   : > { %p588_p5 = scmp.lt.s32.totalorder %s1483_s26, 1  ;;  %p592_p6 = scmp.lt.s32.totalorder %s1479_s25, 1 }
  0x14   : > { %s1842_s0 = sld [smem:[#allocation10_spill]] }
  0x15   : > { %s1868_s26 = smov (!%p588_p5, %s1483_s26), 1  ;;  %s1843_s1 = sld [smem:[#allocation11_spill]] }
  0x16   : > { %s1612_s15 = scalar_select %p592_p6, %s1479_s25, 1 }
  0x17   : > { %s1339_s16 = sshll.u32 %s1868_s26, 3  ;;  %s1846_s3 = sld [smem:[#allocation13_spill]] }
  0x18   : > { %s1368_s20 = sshll.u32 %s1612_s15, 5  ;;  %s610_s13 = scalar_lea.vmem %s1817_s5, %s1612_s15 }
  0x19   : > { %s1655_s25 = scalar_lea.vmem %s1821_s9, %s1368_s20  ;;  %s627_s18 = scalar_lea.vmem %s1822_s10, %s1612_s15 }
  0x1a   : > { %s591_s19 = scalar_lea.vmem %s1842_s0, %s1339_s16  ;;  %s1371_s17 = sshll.u32 %s1612_s15, 7 }
  0x1b   : > { %s1621_s23 = scalar_lea.vmem %s1843_s1, %s1368_s20  ;;  %s635_s1 = scalar_lea.vmem %s1824_s12, %s1612_s15 }
  0x1c   : > { %1844 = sst [smem:[#allocation9_spill]] %s1621_s23  ;;  %s1669_s24 = scalar_lea.vmem %s1823_s11, %s1371_s17 }
  0x1d   : > { %s1630_s29 = scalar_lea.vmem %s1846_s3, %s1368_s20  ;;  %s1847_s28 = sld [smem:[#allocation14_spill]] }
  0x1e   : > { %s1848_s3 = sld [smem:[#allocation3_spill]] }
  0x23   : > { %s1674_s2 = scalar_lea.vmem %s1847_s28, %s1339_s16 }
  0x24   : > { %p1349_p7 = scmp.ne.s32.totalorder %s1848_s3, 0 }
  0x26   : > { %643 = sbr.rel (%p1349_p7) target bundleno = 45 (0x2d), region = 76 }
  0x2b   : > { %v644_v0 = vld [vmem:[%s591_s19] sm:$0xff]  ;;  %vm645_vm0 = vcmask 261120  }
  0x2c   : > { %646 = vst.msk [vmem:[#allocation2] sm:$0xff] %vm645_vm0, %v644_v0 }
  0x2d PF: > { %vm684_vm1 = vcmask 261120   ;;  %s1849_s20 = sld [smem:[#allocation9_spill]]  ;;  %v1497_v3 = vmov 32.0   ;;  %v655_v16 = vld [vmem:[%s1630_s29 + $0x18] sm:$0xff]  ;;  %v654_v18 = vld [vmem:[%s1630_s29 + $0x10] sm:$0xff]  ;;  %v653_v20 = vld [vmem:[%s1630_s29 + $0x8] sm:$0xff]  ;;  %s1850_s28 = scalar_lea.vmem %s1818_s6, %s1612_s15  ;;  %v768_v44 = vlaneseq }
  0x2e   : > { %1431 = vrcp.f32 %v1497_v3  ;;  %760 = vmatpush.msra.mxu2 %v655_v16  ;;  %v652_v22 = vld [vmem:[%s1630_s29] sm:$0xff]  ;;  %s1851_s21 = sld [smem:[#allocation12_spill]]  ;;  %s1499_s23 = smov 120   ;;  %vm777_vm6 = vcmask 64512   ;;  %v1503_v48 = vmov -1e+09  }
  0x2f   : > { %v1423_v32 = vld [vmem:[%s610_s13] ss:$0 sm:$0xff]  ;;  %s1498_s13 = smov 88   ;;  %s1500_s14 = smov 96   ;;  %v769_v45 = vshrl.u32 %v768_v44, 7  ;;  %v771_v46 = vand.u32 127, %v768_v44 }
  0x30   : > { %761 = vmatpush.msra.mxu2 %v654_v18  ;;  %v1424_v35 = vld [vmem:[%s1850_s28] ss:$0 sm:$0xff]  ;;  %s1501_s30 = smov 72   ;;  %s1502_s27 = smov 112  }
  0x31   : > { %vm772_vm7 = vcmp.le.s32.totalorder %v771_v46, %v769_v45  ;;  %s1504_s3 = smov 104   ;;  %s1506_s29 = smov 64  }
  0x32   : > { %762 = vmatpush.msra.mxu2 %v653_v20  ;;  %v773_v49 = vsel %vm772_vm7, 0.0, %v1503_v48  ;;  %s1507_s16 = smov 32   ;;  %s1853_s28 = scalar_lea.vmem %s1816_s4, %s1612_s15 }
  0x33   : > { %v1677_v1 = vld [vmem:[#allocation2] sm:$0xff]  ;;  %v650_v15 = vld [vmem:[%s1849_s20 + $0x18] sm:$0xff]  ;;  %v649_v17 = vld [vmem:[%s1849_s20 + $0x10] sm:$0xff]  ;;  %s1854_s0 = scalar_lea.vmem %s1819_s7, %s1612_s15 }
  0x34   : > { %v685_v2 = vsel %vm684_vm1, %v1677_v1, 0.0  ;;  %v1432_v4 = vpop.eup %1431  ;;  %740 = vmatpush.msra.mxu0 %v650_v15  ;;  %v648_v19 = vld [vmem:[%s1849_s20 + $0x8] sm:$0xff]  ;;  %v647_v21 = vld [vmem:[%s1849_s20] sm:$0xff]  ;;  %763 = vmatpush.msra.mxu2 %v652_v22  ;;  %s1852_s22 = scalar_lea.vmem %s1851_s21, %s1612_s15  ;;  %s1505_s20 = smov 80  }
  0x35   : > { %686 = vadd.xlane.f32.xlu0 %v685_v2  ;;  %v689_v5 = vmul.f32 32.0, %v1432_v4  ;;  %vm693_vm2 = vweird.f32 %v1432_v4  ;;  %v1425_v38 = vld [vmem:[%s1852_s22] ss:$0 sm:$0xff] }
  0x36   : > { %741 = vmatpush.msra.mxu0 %v649_v17  ;;  %v1426_v48 = vld [vmem:[%s1853_s28] ss:$0 sm:$0xff] }
  0x37   : > { %v690_v6 = vsub.f32 1.0, %v689_v5 }
  0x38   : > { %742 = vmatpush.msra.mxu0 %v648_v19 }
  0x39   : > { %v691_v7 = vmul.f32 %v1432_v4, %v690_v6 }
  0x3a   : > { %743 = vmatpush.msra.mxu0 %v647_v21 }
  0x3b   : > { %v692_v8 = vadd.f32 %v1432_v4, %v691_v7 }
  0x3d   : > { %v1681_v9 = vsel %vm693_vm2, %v1432_v4, %v692_v8 }
  0xa8   : > { %v687_v10 = vpop.xlane.xlu0 %686 }
  0xa9   : > { %v695_v11 = vmul.f32 %v1681_v9, %v687_v10 }
  0xab   : > { %v696_v12 = vsub.f32 %v1677_v1, %v695_v11 }
  0xad   : > { %v697_v13 = vmul.f32 %v696_v12, %v696_v12 }
  0xaf   : > { %v698_v14 = vsel %vm684_vm1, %v697_v13, 0.0 }
  0xb0   : > { %699 = vadd.xlane.f32.xlu0 %v698_v14 }
 0x123   : > { %v700_v23 = vpop.xlane.xlu0 %699 }
 0x124   : > { %v701_v24 = vmul.f32 %v700_v23, %v1681_v9 }
 0x126   : > { %v702_v25 = vadd.f32 1e-05, %v701_v24 }
 0x128   : > { %1433 = vrsqrt.f32 %v702_v25  ;;  %vm709_vm4 = vweird.f32 %v702_v25 }
 0x12e   : > { %v1434_v26 = vpop.eup %1433 }
 0x12f   : > { %v704_v27 = vmul.f32 %v1434_v26, %v702_v25  ;;  %vm710_vm3 = vweird.f32 %v1434_v26 }
 0x130   : > { %vm711_vm5 = vmor %vm709_vm4, %vm710_vm3 }
 0x131   : > { %v705_v28 = vmul.f32 %v1434_v26, %v704_v27 }
 0x133   : > { %v706_v29 = vmul.f32 0.5, %v705_v28 }
 0x135   : > { %v707_v30 = vsub.f32 1.5, %v706_v29 }
 0x137   : > { %v708_v31 = vmul.f32 %v1434_v26, %v707_v30 }
 0x139   : > { %v712_v33 = vsel %vm711_vm5, %v1434_v26, %v708_v31 }
 0x13a   : > { %v713_v34 = vmul.f32 %v712_v33, %v696_v12 }
 0x13c   : > { %v717_v36 = vmul.f32 %v1423_v32, %v713_v34 }
 0x13e   : > { %v721_v37 = vadd.f32 %v1424_v35, %v717_v36 }
 0x140   : > { %1350 = vmatmul.msk.f32.vlgmr.msra.gmra.mxu0 %vm684_vm1, %v721_v37  ;;  %1351 = vmatmul.msk.f32.vlgmr.msra.gmra.mxu2 %vm684_vm1, %v721_v37 }
 0x1bd   : > { %v745_v39 = vpop.f32.mrf.mxu0 }
 0x1be   : > { %v746_v40 = vadd.f32 %v1425_v38, %v745_v39 }
 0x1c0   : > { %817 = vrot.lane.b32.xlu1 %v746_v40, %s1498_s13  ;;  %s1855_s13 = scalar_lea.vmem %s1820_s8, %s1612_s15 }
 0x1c3   : > { %v1712_v41 = vpop.f32.mrf.mxu2 }
 0x1c8   : > { %815 = vrot.lane.b32.xlu1 %v746_v40, %s1499_s23 }
 0x1d0   : > { %857 = vrot.lane.b32.xlu1 %v1712_v41, %s1500_s14 }
 0x1d8   : > { %976 = vrot.lane.b32.xlu1 %v746_v40, %s1501_s30 }
 0x1e0   : > { %906 = vrot.lane.b32.xlu1 %v746_v40, %s1502_s27 }
 0x232   : > { %v818_v42 = vpop.permute.xlu1 %817 }
 0x233   : > { %1354 = vmatpush.xpose.msk.msra.mxu3 %vm777_vm6, %v818_v42 }
 0x237   : > { %901 = vmatpush.msrb.mxu3 %v1712_v41 }
 0x23a   : > { %v816_v43 = vpop.permute.xlu1 %815 }
 0x23b   : > { %1355 = vmatmul.msk.f32.vlgmr.msra.gmra.mxu3 %vm777_vm6, %v816_v43 }
 0x242   : > { %v858_v55 = vpop.permute.xlu1 %857 }
 0x24a   : > { %v977_v59 = vpop.permute.xlu1 %976 }
 0x252   : > { %v907_v7 = vpop.permute.xlu1 %906 }
 0x2be   : > { %v840_v47 = vpop.f32.mrf.mxu3 }
 0x2bf   : > { %v843_v50 = vmul.f32 0.35355338, %v840_v47 }
 0x2c1   : > { %v844_v51 = vadd.f32 %v843_v50, %v773_v49 }
 0x2c3   : > { %v845_v52 = vsel %vm777_vm6, %v844_v51, -inf }
 0x2c4   : > { %846 = vmax.xlane.f32.xlu2 %v845_v52 }
 0x2dc   : > { %775 = vrot.lane.b32.xlu2 %v746_v40, %s1500_s14 }
 0x2e4   : > { %974 = vrot.lane.b32.xlu2 %v746_v40, %s1504_s3 }
 0x337   : > { %v847_v53 = vpop.xlane.xlu2 %846 }
 0x338   : > { %v848_v54 = vsub.f32 %v844_v51, %v847_v53 }
 0x33a   : > { %v849_v56 = vmul.f32 1.442695, %v848_v54 }
 0x33c   : > { %1435 = vpow2.f32 %v849_v56 }
 0x33f   : > { %v776_v57 = vpop.permute.xlu2 %775 }
 0x340   : > { %1352 = vmatpush.xpose.msk.msrb.mxu2 %vm777_vm6, %v776_v57 }
 0x342   : > { %v1436_v58 = vpop.eup %1435 }
 0x343   : > { %1353 = vmatmul.msk.f32.vlgmr.msrb.gmra.mxu2 %vm777_vm6, %v746_v40  ;;  %v851_v60 = vsel %vm777_vm6, %v1436_v58, 0.0 }
 0x344   : > { %878 = vmatpush.msra.mxu2 %v858_v55  ;;  %852 = vadd.xlane.f32.xlu0 %v851_v60  ;;  %v663_v60 = vld [vmem:[%s1655_s25 + $0x10] sm:$0xff] }
 0x346   : > { %1361 = vmatpush.xpose.msk.msrb.mxu2 %vm777_vm6, %v977_v59  ;;  %v664_v59 = vld [vmem:[%s1655_s25 + $0x18] sm:$0xff] }
 0x347   : > { %v975_v3 = vpop.permute.xlu2 %974 }
 0x358   : > { %908 = vrot.lane.b32.xlu0 %v746_v40, %s1505_s20 }
 0x3b7   : > { %v853_v61 = vpop.xlane.xlu0 %852 }
 0x3b8   : > { %1437 = vrcp.f32 %v853_v61  ;;  %v662_v61 = vld [vmem:[%s1655_s25 + $0x8] sm:$0xff] }
 0x3be   : > { %v1438_v62 = vpop.eup %1437 }
 0x3bf   : > { %v855_v63 = vmul.f32 %v1438_v62, %v1436_v58 }
 0x3c1   : > { %1356 = vmatmul.msk.f32.vlgmr.msra.gmra.mxu2 %vm777_vm6, %v855_v63 }
 0x3c6   : > { %v799_v0 = vpop.f32.mrf.mxu2 }
 0x3c7   : > { %v802_v2 = vmul.f32 0.35355338, %v799_v0 }
 0x3c9   : > { %1362 = vmatmul.msk.f32.vlgmr.msrb.gmra.mxu2 %vm777_vm6, %v975_v3  ;;  %v803_v4 = vadd.f32 %v802_v2, %v773_v49 }
 0x3ca   : > { %v909_v5 = vpop.permute.xlu0 %908 }
 0x3cb   : > { %1358 = vmatpush.xpose.msk.msrb.mxu0 %vm777_vm6, %v909_v5  ;;  %v804_v6 = vsel %vm777_vm6, %v803_v4, -inf }
 0x3cc   : > { %805 = vmax.xlane.f32.xlu1 %v804_v6 }
 0x3ce   : > { %1359 = vmatmul.msk.f32.vlgmr.msrb.gmra.mxu0 %vm777_vm6, %v907_v7 }
 0x3cf   : > { %1095 = vmatpush.msra.mxu0 %v664_v59 }
 0x3d1   : > { %1096 = vmatpush.msra.mxu0 %v663_v60 }
 0x3d3   : > { %1097 = vmatpush.msra.mxu0 %v662_v61 }
 0x43f   : > { %v806_v8 = vpop.xlane.xlu1 %805 }
 0x440   : > { %v807_v11 = vsub.f32 %v803_v4, %v806_v8  ;;  %v1427_v8 = vld [vmem:[%s1854_s0] ss:$0 sm:$0xff] }
 0x442   : > { %v808_v12 = vmul.f32 1.442695, %v807_v11  ;;  %v1428_v11 = vld [vmem:[%s1855_s13] ss:$0 sm:$0xff] }
 0x444   : > { %v880_v10 = vpop.f32.mrf.mxu2  ;;  %1439 = vpow2.f32 %v808_v12 }
 0x44a   : > { %v1440_v21 = vpop.eup %1439 }
 0x44b   : > { %v931_v13 = vpop.f32.mrf.mxu0  ;;  %v810_v22 = vsel %vm777_vm6, %v1440_v21, 0.0 }
 0x44c   : > { %v934_v14 = vmul.f32 0.35355338, %v931_v13  ;;  %v999_v15 = vpop.f32.mrf.mxu2 }
 0x44d   : > { %v1002_v16 = vmul.f32 0.35355338, %v999_v15  ;;  %v680_v15 = vld [vmem:[%s1669_s24 + $0x70] sm:$0xff] }
 0x44e   : > { %v935_v17 = vadd.f32 %v934_v14, %v773_v49  ;;  %v681_v14 = vld [vmem:[%s1669_s24 + $0x78] sm:$0xff] }
 0x44f   : > { %v1003_v18 = vadd.f32 %v1002_v16, %v773_v49  ;;  %1127 = vmatpush.msra.mxu1 %v681_v14  ;;  %v679_v16 = vld [vmem:[%s1669_s24 + $0x68] sm:$0xff] }
 0x450   : > { %v936_v19 = vsel %vm777_vm6, %v935_v17, -inf }
 0x451   : > { %937 = vmax.xlane.f32.xlu2 %v936_v19  ;;  %v1004_v20 = vsel %vm777_vm6, %v1003_v18, -inf  ;;  %1128 = vmatpush.msra.mxu1 %v680_v15  ;;  %v676_v19 = vld [vmem:[%s1669_s24 + $0x50] sm:$0xff] }
 0x452   : > { %1005 = vmax.xlane.f32.xlu0 %v1004_v20  ;;  %v675_v20 = vld [vmem:[%s1669_s24 + $0x48] sm:$0xff] }
 0x453   : > { %1129 = vmatpush.msra.mxu1 %v679_v16 }
 0x459   : > { %811 = vadd.xlane.f32.xlu2 %v810_v22  ;;  %v673_v22 = vld [vmem:[%s1669_s24 + $0x38] sm:$0xff] }
 0x471   : > { %947 = vrot.lane.b32.xlu2 %v1712_v41, %s1506_s29 }
 0x4c4   : > { %v938_v23 = vpop.xlane.xlu2 %937 }
 0x4c5   : > { %v939_v24 = vsub.f32 %v935_v17, %v938_v23  ;;  %v1006_v25 = vpop.xlane.xlu0 %1005  ;;  %v678_v17 = vld [vmem:[%s1669_s24 + $0x60] sm:$0xff]  ;;  %v672_v23 = vld [vmem:[%s1669_s24 + $0x30] sm:$0xff] }
 0x4c6   : > { %v1007_v26 = vsub.f32 %v1003_v18, %v1006_v25  ;;  %1130 = vmatpush.msra.mxu1 %v678_v17  ;;  %v677_v18 = vld [vmem:[%s1669_s24 + $0x58] sm:$0xff]  ;;  %v670_v25 = vld [vmem:[%s1669_s24 + $0x20] sm:$0xff] }
 0x4c7   : > { %v940_v27 = vmul.f32 1.442695, %v939_v24  ;;  %v671_v24 = vld [vmem:[%s1669_s24 + $0x28] sm:$0xff] }
 0x4c8   : > { %v1008_v28 = vmul.f32 1.442695, %v1007_v26  ;;  %1131 = vmatpush.msra.mxu1 %v677_v18  ;;  %v669_v26 = vld [vmem:[%s1669_s24 + $0x18] sm:$0xff] }
 0x4c9   : > { %1441 = vpow2.f32 %v940_v27  ;;  %v668_v27 = vld [vmem:[%s1669_s24 + $0x10] sm:$0xff] }
 0x4ca   : > { %1443 = vpow2.f32 %v1008_v28  ;;  %1132 = vmatpush.msra.mxu1 %v676_v19  ;;  %v1429_v28 = vld [vmem:[%s627_s18] ss:$0 sm:$0xff] }
 0x4cc   : > { %v812_v29 = vpop.xlane.xlu2 %811  ;;  %1133 = vmatpush.msra.mxu1 %v675_v20 }
 0x4cd   : > { %1445 = vrcp.f32 %v812_v29  ;;  %v667_v29 = vld [vmem:[%s1669_s24 + $0x8] sm:$0xff] }
 0x4cf   : > { %v1442_v30 = vpop.eup %1441 }
 0x4d0   : > { %v1444_v31 = vpop.eup %1443  ;;  %v942_v32 = vsel %vm777_vm6, %v1442_v30, 0.0 }
 0x4d1   : > { %943 = vadd.xlane.f32.xlu1 %v942_v32  ;;  %v1010_v33 = vsel %vm777_vm6, %v1444_v31, 0.0 }
 0x4d2   : > { %1011 = vadd.xlane.f32.xlu0 %v1010_v33 }
 0x4d3   : > { %v1446_v34 = vpop.eup %1445 }
 0x4d4   : > { %v948_v35 = vpop.permute.xlu2 %947  ;;  %v814_v36 = vmul.f32 %v1446_v34, %v1440_v21  ;;  %v674_v21 = vld [vmem:[%s1669_s24 + $0x40] sm:$0xff] }
 0x4d5   : > { %968 = vmatpush.msra.mxu3 %v948_v35  ;;  %1134 = vmatpush.msra.mxu1 %v674_v21 }
 0x4d6   : > { %1357 = vmatmul.msk.f32.vlgmr.msrb.gmra.mxu3 %vm777_vm6, %v814_v36 }
 0x4d7   : > { %1135 = vmatpush.msra.mxu1 %v673_v22 }
 0x4d9   : > { %1136 = vmatpush.msra.mxu1 %v672_v23 }
 0x4db   : > { %1137 = vmatpush.msra.mxu1 %v671_v24 }
 0x4dd   : > { %1138 = vmatpush.msra.mxu1 %v670_v25 }
 0x4df   : > { %1139 = vmatpush.msra.mxu1 %v669_v26 }
 0x4e1   : > { %1140 = vmatpush.msra.mxu1 %v668_v27 }
 0x4e3   : > { %1141 = vmatpush.msra.mxu1 %v667_v29 }
 0x4ea   : > { %1015 = vrot.lane.b32.xlu1 %v1712_v41, %s1507_s16 }
 0x544   : > { %v944_v37 = vpop.xlane.xlu1 %943 }
 0x545   : > { %1447 = vrcp.f32 %v944_v37  ;;  %v1012_v40 = vpop.xlane.xlu0 %1011 }
 0x546   : > { %1449 = vrcp.f32 %v1012_v40 }
 0x54b   : > { %v1448_v38 = vpop.eup %1447 }
 0x54c   : > { %v946_v39 = vmul.f32 %v1448_v38, %v1442_v30  ;;  %v1450_v42 = vpop.eup %1449  ;;  %v666_v30 = vld [vmem:[%s1669_s24] sm:$0xff] }
 0x54d   : > { %v1014_v43 = vmul.f32 %v1450_v42, %v1444_v31  ;;  %1142 = vmatpush.msra.mxu1 %v666_v30 }
 0x54e   : > { %1360 = vmatmul.msk.f32.vlgmr.msra.gmra.mxu3 %vm777_vm6, %v946_v39 }
 0x559   : > { %v903_v45 = vpop.f32.mrf.mxu3 }
 0x55a   : > { %v904_v47 = vadd.f32 %v903_v45, %v880_v10 }
 0x55c   : > { %v1016_v44 = vpop.permute.xlu1 %1015 }
 0x55d   : > { %1036 = vmatpush.msrb.mxu3 %v1016_v44 }
 0x55e   : > { %1363 = vmatmul.msk.f32.vlgmr.msrb.gmra.mxu3 %vm777_vm6, %v1014_v43 }
 0x5d1   : > { %v970_v46 = vpop.f32.mrf.mxu3 }
 0x5d2   : > { %v973_v41 = vadd.f32 %v970_v46, %v904_v47 }
 0x5e1   : > { %v1038_v49 = vpop.f32.mrf.mxu3 }
 0x5e2   : > { %v1041_v50 = vadd.f32 %v1038_v49, %v973_v41 }
 0x5e4   : > { %v1045_v51 = vadd.f32 %v1426_v48, %v1041_v50  ;;  %v1430_v48 = vld [vmem:[%s635_s1] ss:$0 sm:$0xff] }
 0x5e6   : > { %v1744_v52 = vadd.f32 %v1045_v51, %v1677_v1  ;;  %v661_v1 = vld [vmem:[%s1655_s25] sm:$0xff] }
 0x5e7   : > { %1098 = vmatpush.msra.mxu0 %v661_v1 }
 0x5e8   : > { %v1047_v53 = vsel %vm684_vm1, %v1744_v52, 0.0 }
 0x5e9   : > { %1048 = vadd.xlane.f32.xlu0 %v1047_v53 }
 0x65c   : > { %v1049_v54 = vpop.xlane.xlu0 %1048 }
 0x65d   : > { %v1050_v55 = vmul.f32 %v1049_v54, %v1681_v9 }
 0x65f   : > { %v1051_v56 = vsub.f32 %v1744_v52, %v1050_v55 }
 0x661   : > { %v1052_v57 = vmul.f32 %v1051_v56, %v1051_v56 }
 0x663   : > { %v1053_v58 = vsel %vm684_vm1, %v1052_v57, 0.0 }
 0x664   : > { %1054 = vadd.xlane.f32.xlu0 %v1053_v58 }
 0x6d7   : > { %v1055_v62 = vpop.xlane.xlu0 %1054 }
 0x6d8   : > { %v1056_v63 = vmul.f32 %v1055_v62, %v1681_v9 }
 0x6da   : > { %v1057_v0 = vadd.f32 1e-05, %v1056_v63 }
 0x6dc   : > { %1451 = vrsqrt.f32 %v1057_v0  ;;  %vm1064_vm9 = vweird.f32 %v1057_v0 }
 0x6e2   : > { %v1452_v2 = vpop.eup %1451 }
 0x6e3   : > { %v1059_v3 = vmul.f32 %v1452_v2, %v1057_v0  ;;  %vm1065_vm8 = vweird.f32 %v1452_v2 }
 0x6e4   : > { %vm1066_vm10 = vmor %vm1064_vm9, %vm1065_vm8 }
 0x6e5   : > { %v1060_v4 = vmul.f32 %v1452_v2, %v1059_v3 }
 0x6e7   : > { %v1061_v5 = vmul.f32 0.5, %v1060_v4 }
 0x6e9   : > { %v1062_v6 = vsub.f32 1.5, %v1061_v5 }
 0x6eb   : > { %v1063_v7 = vmul.f32 %v1452_v2, %v1062_v6 }
 0x6ed   : > { %v1067_v9 = vsel %vm1066_vm10, %v1452_v2, %v1063_v7 }
 0x6ee   : > { %v1068_v10 = vmul.f32 %v1067_v9, %v1051_v56 }
 0x6f0   : > { %v1072_v12 = vmul.f32 %v1427_v8, %v1068_v10 }
 0x6f2   : > { %v1076_v13 = vadd.f32 %v1428_v11, %v1072_v12 }
 0x6f4   : > { %1364 = vmatmul.msk.f32.vlgmr.msra.gmra.mxu0 %vm684_vm1, %v1076_v13 }
 0x771   : > { %v1100_v31 = vpop.f32.mrf.mxu0 }
 0x772   : > { %v1101_v32 = vadd.f32 %v1429_v28, %v1100_v31 }
 0x774   : > { %v1365_v33 = vmul.f32 -1.702, %v1101_v32 }
 0x776   : > { %v1105_v34 = vmul.f32 1.442695, %v1365_v33 }
 0x778   : > { %1453 = vpow2.f32 %v1105_v34 }
 0x77e   : > { %v1454_v35 = vpop.eup %1453 }
 0x77f   : > { %v1107_v36 = vadd.f32 1.0, %v1454_v35 }
 0x781   : > { %1455 = vrcp.f32 %v1107_v36  ;;  %v1119_v40 = vand.u32 2147483648, %v1107_v36  ;;  %v1117_v43 = vand.u32 2147483647, %v1107_v36  ;;  %vm1113_vm12 = vweird.f32 %v1107_v36 }
 0x783   : > { %v1120_v45 = vor.u32 1.1754944e-38, %v1119_v40  ;;  %vm1118_vm14 = vcmp.eq.f32.partialorder %v1117_v43, 8.507059e+37 }
 0x787   : > { %v1456_v37 = vpop.eup %1455 }
 0x788   : > { %v1109_v38 = vmul.f32 %v1456_v37, %v1107_v36  ;;  %vm1114_vm11 = vweird.f32 %v1456_v37 }
 0x789   : > { %vm1115_vm13 = vmor %vm1113_vm12, %vm1114_vm11 }
 0x78a   : > { %v1110_v39 = vsub.f32 1.0, %v1109_v38 }
 0x78c   : > { %v1111_v42 = vmul.f32 %v1456_v37, %v1110_v39 }
 0x78e   : > { %v1112_v44 = vadd.f32 %v1456_v37, %v1111_v42 }
 0x790   : > { %v1116_v46 = vsel %vm1115_vm13, %v1456_v37, %v1112_v44 }
 0x791   : > { %v1121_v47 = vsel %vm1118_vm14, %v1120_v45, %v1116_v46 }
 0x792   : > { %v1123_v41 = vmul.f32 %v1121_v47, %v1101_v32 }
 0x794   : > { %1143 = vmatmul.f32.vlgmr.msra.gmra.mxu1 %v1123_v41 }
 0x811   : > { %v1144_v49 = vpop.f32.mrf.mxu1 }
 0x812   : > { %v1145_v50 = vadd.f32 %v1430_v48, %v1144_v49 }
 0x814   : > { %v1147_v51 = vadd.f32 %v1145_v50, %v1744_v52 }
 0x816   : > { %1148 = vst.msk [vmem:[#allocation2] sm:$0xff] %vm684_vm1, %v1147_v51 }
 0x817   : > { %1149 = vst.msk [vmem:[%s1674_s2] sm:$0xff] %vm684_vm1, %v1147_v51 }
 0x818 PF: > { %s1856_s30 = sld [smem:[#allocation6_spill]] }
 0x819   : > { %s1857_s25 = sld [smem:[#allocation4_spill]] }
 0x81a   : > { %s1858_s26 = sld [smem:[#allocation5_spill]] }
 0x81b   : > { %s1859_s27 = sld [smem:[#allocation7_spill]] }
 0x81c   : > { %s1860_s28 = sld [smem:[#allocation8_spill]] }
 0x81e   : > { %s23_s29 = sadd.s32 1, %s1856_s30  }
 0x81f   : > { %p20_p8 = scmp.ge.s32.totalorder %s23_s29, 6  }
 0x821   :  { %22 = sbr.rel (!%p20_p8) target bundleno = 6 (0x6), region = 142 }

// kernel: _clipseg_core.3
= control target key start
LH: loop header
LB: loop body
LE: loop exit
PB: predicated region body
PF: predicated region fallthrough
CT: control target
= control target key end

     0   :  { %s2162_s25 = smov 0   ;;  %s2164_s26 = smov 0   ;;  %s2579_s0 = inlined_call_operand.vmem [shape: f32[2,17,32], index: 0, kind: input, shape index: {}]   ;;  %s2580_s1 = inlined_call_operand.vmem [shape: f32[3,32,64], index: 1, kind: input, shape index: {}]   ;;  %s2581_s2 = inlined_call_operand.vmem [shape: f32[3,1,64], index: 2, kind: input, shape index: {}]   ;;  %s2582_s3 = inlined_call_operand.vmem [shape: f32[3,32,128], index: 3, kind: input, shape index: {}]   ;;  %s2583_s4 = inlined_call_operand.vmem [shape: f32[3,1,32], index: 4, kind: input, shape index: {}]   ;;  %s2584_s5 = inlined_call_operand.vmem [shape: f32[3,1,32], index: 5, kind: input, shape index: {}]   ;;  %s2585_s6 = inlined_call_operand.vmem [shape: f32[3,1,32], index: 6, kind: input, shape index: {}]   ;;  %s2586_s7 = inlined_call_operand.vmem [shape: f32[3,1,32], index: 7, kind: input, shape index: {}]   ;;  %s2587_s8 = inlined_call_operand.vmem [shape: f32[3,1,32], index: 8, kind: input, shape index: {}]   ;;  %s2588_s9 = inlined_call_operand.vmem [shape: f32[3,32,128], index: 9, kind: input, shape index: {}]   ;;  %s2589_s10 = inlined_call_operand.vmem [shape: f32[3,1,128], index: 10, kind: input, shape index: {}]   ;;  %s2590_s11 = inlined_call_operand.vmem [shape: f32[3,128,32], index: 11, kind: input, shape index: {}]   ;;  %s2591_s12 = inlined_call_operand.vmem [shape: f32[3,1,32], index: 12, kind: input, shape index: {}]   ;;  %s2592_s13 = inlined_call_operand.vmem [shape: f32[3,2,17,32], index: 13, kind: output, shape index: {}]  }
   0x1   :  { %2598 = sst [smem:[#allocation10_spill]] %s2579_s0  ;;  %s2166_s27 = smov 0  }
   0x2   :  { %2599 = sst [smem:[#allocation11_spill]] %s2580_s1  ;;  %s2168_s28 = smov 0  }
   0x3   :  { %2600 = sst [smem:[#allocation12_spill]] %s2581_s2  ;;  %s2170_s29 = smov 0  }
   0x4   :  { %2601 = sst [smem:[#allocation13_spill]] %s2582_s3 }
   0x5   :  { %2602 = sst [smem:[#allocation14_spill]] %s2588_s9 }
   0x6   :  { %2603 = sst [smem:[#allocation15_spill]] %s2592_s13 }
   0x7 LB: > { %2604 = sst [smem:[#allocation3_spill]] %s2064_s25  ;;  %s32_s30 = sadd.s32 1, %s2072_s27  ;;  %s2080_s29 = sphi %s2170_s29, %s23_s29   ;;  %s2076_s28 = sphi %s2168_s28, %s2630_s28   ;;  %s2072_s27 = sphi %s2166_s27, %s2629_s27   ;;  %s2068_s26 = sphi %s2164_s26, %s2628_s26   ;;  %s2064_s25 = sphi %s2162_s25, %s2627_s25  }
   0x8   : > { %2605 = sst [smem:[#allocation4_spill]] %s2072_s27  ;;  %s35_s14 = sadd.s32 1, %s2076_s28 }
   0x9   : > { %2606 = sst [smem:[#allocation5_spill]] %s2076_s28  ;;  %p33_p0 = scmp.ge.s32.totalorder %s32_s30, 3 }
   0xa   : > { %2607 = sst [smem:[#allocation6_spill]] %s2080_s29  ;;  %p1819_p1 = scmp.ge.s32.totalorder %s2080_s29, 1 }
   0xb   : > { %p505_p2 = scmp.lt.s32.totalorder %s2080_s29, 7  ;;  %s2632_s30 = smov (%p33_p0, %s32_s30), 0 }
   0xc   : > { %2608 = sst [smem:[#allocation7_spill]] %s2632_s30  ;;  %s2634_s14 = smov (!%p33_p0, %s35_s14), %s2076_s28 }
   0xd   : > { %p506_p3 = pnand %p1819_p1, %p505_p2  ;;  %p37_p4 = scmp.ge.s32.totalorder %s2634_s14, 2 }
   0xf   : > { %s2636_s14 = smov (%p37_p4, %s2634_s14), 0  ;;  %509 = sbr.rel (%p506_p3) target bundleno = 2168 (0x878), region = 72 }
  0x10   : > { %2609 = sst [smem:[#allocation8_spill]] %s2636_s14 }
  0x14   : > { %p597_p5 = scmp.lt.s32.totalorder %s2068_s26, 1  ;;  %p602_p6 = scmp.lt.s32.totalorder %s2064_s25, 2 }
  0x15   : > { %s2611_s0 = sld [smem:[#allocation10_spill]] }
  0x16   : > { %s2638_s26 = smov (!%p597_p5, %s2068_s26), 1  ;;  %s2612_s1 = sld [smem:[#allocation11_spill]] }
  0x17   : > { %s2196_s15 = scalar_select %p602_p6, %s2064_s25, 2 }
  0x18   : > { %s1892_s16 = smul.u32 24, %s2638_s26  ;;  %s2613_s3 = sld [smem:[#allocation13_spill]] }
  0x19   : > { %s1885_s17 = sshll.u32 %s2196_s15, 5  ;;  %s2615_s9 = sld [smem:[#allocation14_spill]] }
  0x1a   : > { %s637_s19 = scalar_lea.vmem %s2589_s10, %s2196_s15  ;;  %s1888_s18 = sshll.u32 %s2196_s15, 7 }
  0x1b   : > { %s601_s23 = scalar_lea.vmem %s2611_s0, %s1892_s16  ;;  %s645_s22 = scalar_lea.vmem %s2591_s12, %s2196_s15 }
  0x1c   : > { %s2209_s30 = scalar_lea.vmem %s2612_s1, %s1885_s17  ;;  %s2253_s0 = scalar_lea.vmem %s2590_s11, %s1888_s18 }
  0x1d   : > { %s1893_s1 = smul.u32 3, %s2638_s26  ;;  %s2616_s2 = sld [smem:[#allocation15_spill]] }
  0x1e   : > { %s2214_s29 = scalar_lea.vmem %s2613_s3, %s1885_s17  ;;  %s1894_s27 = smul.u32 6, %s2196_s15 }
  0x1f   : > { %2614 = sst [smem:[#allocation9_spill]] %s2214_s29  ;;  %s2239_s13 = scalar_lea.vmem %s2615_s9, %s1885_s17 }
  0x20   : > { %s652_s28 = sadd.s32 %s1894_s27, %s1893_s1  ;;  %s2617_s25 = sld [smem:[#allocation3_spill]] }
  0x21   : > { %s1829_s3 = sshll.u32 %s652_s28, 3 }
  0x23   : > { %s2259_s9 = scalar_lea.vmem %s2616_s2, %s1829_s3 }
  0x26   : > { %p1830_p7 = scmp.ne.s32.totalorder %s2617_s25, 0 }
  0x28   : > { %658 = sbr.rel (%p1830_p7) target bundleno = 49 (0x31), region = 76 }
  0x2d   : > { %v659_v0 = vld [vmem:[%s601_s23] sm:$0xff]  ;;  %vm662_vm0 = vcmask 261120   ;;  %v660_v1 = vld [vmem:[%s601_s23 + $0x8] sm:$0xff]  ;;  %v661_v2 = vld [vmem:[%s601_s23 + $0x10] sm:$0x1]  ;;  %vm665_vm1 = vcmask 253952  }
  0x2e   : > { %663 = vst.msk [vmem:[#allocation2] sm:$0xff] %vm662_vm0, %v659_v0 }
  0x2f   : > { %664 = vst.msk [vmem:[#allocation2 + $0x8] sm:$0xff] %vm662_vm0, %v660_v1 }
  0x30   : > { %666 = vst.msk [vmem:[#allocation2 + $0x10] sm:$0x1] %vm665_vm1, %v661_v2 }
  0x31 PF: > { %vm706_vm2 = vcmask 261120   ;;  %vm713_vm3 = vcmask 253952   ;;  %v2082_v9 = vmov 32.0   ;;  %s2618_s2 = sld [smem:[#allocation9_spill]]  ;;  %v670_v31 = vld [vmem:[%s2209_s30 + $0x18] sm:$0xff]  ;;  %v669_v33 = vld [vmem:[%s2209_s30 + $0x10] sm:$0xff]  ;;  %s2619_s23 = scalar_lea.vmem %s2584_s5, %s2196_s15 }
  0x32   : > { %1968 = vrcp.f32 %v2082_v9  ;;  %817 = vmatpush.msra.mxu0 %v670_v31  ;;  %v668_v35 = vld [vmem:[%s2209_s30 + $0x8] sm:$0xff]  ;;  %v667_v37 = vld [vmem:[%s2209_s30] sm:$0xff]  ;;  %s2620_s20 = scalar_lea.vmem %s2585_s6, %s2196_s15  ;;  %s2621_s14 = sld [smem:[#allocation12_spill]]  ;;  %vm1049_vm14 = vcmask 1040384   ;;  %vm866_vm15 = vcmask 64512   ;;  %vm908_vm0 = vcmask 138240  }
  0x33   : > { %v1960_v56 = vld [vmem:[%s2619_s23] ss:$0 sm:$0xff]  ;;  %s2083_s1 = smov 88   ;;  %s2084_s27 = smov 120   ;;  %vm915_vm1 = vcmask 131072  }
  0x34   : > { %818 = vmatpush.msra.mxu0 %v669_v33  ;;  %v1961_v60 = vld [vmem:[%s2620_s20] ss:$0 sm:$0xff]  ;;  %s2085_s3 = smov 96   ;;  %s2086_s29 = smov 80  }
  0x35   : > { %v2262_v3 = vld [vmem:[#allocation2] sm:$0xff]  ;;  %s2087_s17 = smov 72   ;;  %s2088_s25 = smov 112  }
  0x36   : > { %v707_v5 = vsel %vm706_vm2, %v2262_v3, 0.0  ;;  %v2270_v7 = vld [vmem:[#allocation2 + $0x8] sm:$0xff]  ;;  %819 = vmatpush.msra.mxu0 %v668_v35  ;;  %s2090_s26 = smov 64   ;;  %s2091_s30 = smov 32  }
  0x37   : > { %v2264_v4 = vld [vmem:[#allocation2 + $0x10] sm:$0x1]  ;;  %708 = vadd.xlane.f32.xlu0 %v707_v5  ;;  %v710_v8 = vsel %vm706_vm2, %v2270_v7, 0.0  ;;  %v675_v32 = vld [vmem:[%s2618_s2 + $0x18] sm:$0xff]  ;;  %v673_v36 = vld [vmem:[%s2618_s2 + $0x8] sm:$0xff]  ;;  %s2623_s28 = scalar_lea.vmem %s2583_s4, %s2196_s15  ;;  %s2624_s21 = scalar_lea.vmem %s2586_s7, %s2196_s15 }
  0x38   : > { %v714_v6 = vsel %vm713_vm3, %v2264_v4, 0.0  ;;  %v1969_v10 = vpop.eup %1968  ;;  %843 = vmatpush.msra.mxu1 %v675_v32  ;;  %v674_v34 = vld [vmem:[%s2618_s2 + $0x10] sm:$0xff]  ;;  %v672_v38 = vld [vmem:[%s2618_s2] sm:$0xff]  ;;  %820 = vmatpush.msra.mxu0 %v667_v37  ;;  %s2622_s24 = scalar_lea.vmem %s2621_s14, %s2196_s15  ;;  %s2089_s2 = smov 104  }
  0x39   : > { %715 = vadd.xlane.f32.xlu1 %v714_v6  ;;  %v718_v11 = vmul.f32 32.0, %v1969_v10  ;;  %vm722_vm4 = vweird.f32 %v1969_v10 }
  0x3a   : > { %844 = vmatpush.msra.mxu1 %v674_v34 }
  0x3b   : > { %v719_v12 = vsub.f32 1.0, %v718_v11 }
  0x3c   : > { %845 = vmatpush.msra.mxu1 %v673_v36 }
  0x3d   : > { %v720_v13 = vmul.f32 %v1969_v10, %v719_v12 }
  0x3e   : > { %846 = vmatpush.msra.mxu1 %v672_v38 }
  0x3f   : > { %711 = vadd.xlane.f32.xlu0 %v710_v8  ;;  %v721_v14 = vadd.f32 %v1969_v10, %v720_v13 }
  0x41   : > { %v2274_v15 = vsel %vm722_vm4, %v1969_v10, %v721_v14 }
  0xaa   : > { %v709_v16 = vpop.xlane.xlu0 %708 }
  0xab   : > { %v724_v17 = vmul.f32 %v2274_v15, %v709_v16 }
  0xac   : > { %v716_v20 = vpop.xlane.xlu1 %715 }
  0xad   : > { %v727_v18 = vsub.f32 %v2262_v3, %v724_v17  ;;  %v726_v24 = vmul.f32 %v2274_v15, %v716_v20  ;;  %v1962_v20 = vld [vmem:[%s2622_s24] ss:$0 sm:$0xff]  ;;  %s2625_s24 = scalar_lea.vmem %s2587_s8, %s2196_s15 }
  0xaf   : > { %v730_v19 = vmul.f32 %v727_v18, %v727_v18  ;;  %v2285_v26 = vsub.f32 %v2264_v4, %v726_v24 }
  0xb1   : > { %v733_v21 = vsel %vm706_vm2, %v730_v19, 0.0  ;;  %v732_v29 = vmul.f32 %v2285_v26, %v2285_v26 }
  0xb2   : > { %734 = vadd.xlane.f32.xlu1 %v733_v21  ;;  %v712_v22 = vpop.xlane.xlu0 %711 }
  0xb3   : > { %v725_v23 = vmul.f32 %v2274_v15, %v712_v22  ;;  %v739_v30 = vsel %vm713_vm3, %v732_v29, 0.0 }
  0xb5   : > { %v2282_v25 = vsub.f32 %v2270_v7, %v725_v23 }
  0xb7   : > { %v731_v27 = vmul.f32 %v2282_v25, %v2282_v25 }
  0xb9   : > { %v736_v28 = vsel %vm706_vm2, %v731_v27, 0.0 }
  0xba   : > { %737 = vadd.xlane.f32.xlu2 %v736_v28 }
  0xc2   : > { %740 = vadd.xlane.f32.xlu2 %v739_v30 }
 0x125   : > { %v735_v39 = vpop.xlane.xlu1 %734 }
 0x126   : > { %v742_v40 = vmul.f32 %v735_v39, %v2274_v15 }
 0x128   : > { %v745_v41 = vadd.f32 1e-05, %v742_v40 }
 0x12a   : > { %1970 = vrsqrt.f32 %v745_v41  ;;  %vm754_vm6 = vweird.f32 %v745_v41 }
 0x12d   : > { %v738_v42 = vpop.xlane.xlu2 %737 }
 0x12e   : > { %v743_v43 = vmul.f32 %v738_v42, %v2274_v15 }
 0x130   : > { %v1971_v44 = vpop.eup %1970  ;;  %v746_v45 = vadd.f32 1e-05, %v743_v43 }
 0x131   : > { %v749_v46 = vmul.f32 %v1971_v44, %v745_v41  ;;  %vm755_vm5 = vweird.f32 %v1971_v44 }
 0x132   : > { %1972 = vrsqrt.f32 %v746_v45  ;;  %vm756_vm7 = vmor %vm754_vm6, %vm755_vm5  ;;  %vm764_vm9 = vweird.f32 %v746_v45 }
 0x133   : > { %v750_v47 = vmul.f32 %v1971_v44, %v749_v46 }
 0x135   : > { %v751_v48 = vmul.f32 0.5, %v750_v47  ;;  %v741_v49 = vpop.xlane.xlu2 %740 }
 0x136   : > { %v744_v50 = vmul.f32 %v741_v49, %v2274_v15 }
 0x137   : > { %v752_v51 = vsub.f32 1.5, %v751_v48 }
 0x138   : > { %v1973_v52 = vpop.eup %1972  ;;  %v747_v53 = vadd.f32 1e-05, %v744_v50 }
 0x139   : > { %v753_v54 = vmul.f32 %v1971_v44, %v752_v51  ;;  %v759_v55 = vmul.f32 %v1973_v52, %v746_v45  ;;  %vm765_vm8 = vweird.f32 %v1973_v52 }
 0x13a   : > { %1974 = vrsqrt.f32 %v747_v53  ;;  %vm766_vm10 = vmor %vm764_vm9, %vm765_vm8  ;;  %vm774_vm12 = vweird.f32 %v747_v53 }
 0x13b   : > { %v757_v57 = vsel %vm756_vm7, %v1971_v44, %v753_v54  ;;  %v760_v58 = vmul.f32 %v1973_v52, %v759_v55 }
 0x13c   : > { %v778_v59 = vmul.f32 %v757_v57, %v727_v18 }
 0x13d   : > { %v761_v61 = vmul.f32 0.5, %v760_v58 }
 0x13e   : > { %v784_v62 = vmul.f32 %v1960_v56, %v778_v59 }
 0x13f   : > { %v762_v63 = vsub.f32 1.5, %v761_v61 }
 0x140   : > { %v1975_v0 = vpop.eup %1974  ;;  %v790_v1 = vadd.f32 %v1961_v60, %v784_v62 }
 0x141   : > { %v763_v2 = vmul.f32 %v1973_v52, %v762_v63  ;;  %v769_v5 = vmul.f32 %v1975_v0, %v747_v53  ;;  %vm775_vm11 = vweird.f32 %v1975_v0 }
 0x142   : > { %1831 = vmatmul.msk.f32.vlgmr.msra.gmra.mxu0 %vm706_vm2, %v790_v1  ;;  %1834 = vmatmul.msk.f32.vlgmr.msra.gmra.mxu1 %vm706_vm2, %v790_v1  ;;  %vm776_vm13 = vmor %vm774_vm12, %vm775_vm11 }
 0x143   : > { %v767_v6 = vsel %vm766_vm10, %v1973_v52, %v763_v2  ;;  %v770_v8 = vmul.f32 %v1975_v0, %v769_v5 }
 0x144   : > { %v779_v9 = vmul.f32 %v767_v6, %v2282_v25 }
 0x145   : > { %v771_v10 = vmul.f32 0.5, %v770_v8 }
 0x146   : > { %v785_v11 = vmul.f32 %v1960_v56, %v779_v9 }
 0x147   : > { %v772_v12 = vsub.f32 1.5, %v771_v10 }
 0x148   : > { %v791_v13 = vadd.f32 %v1961_v60, %v785_v11 }
 0x149   : > { %v773_v14 = vmul.f32 %v1975_v0, %v772_v12 }
 0x14a   : > { %1832 = vmatmul.msk.f32.gmra.mxu0 %vm706_vm2, %v791_v13  ;;  %1835 = vmatmul.msk.f32.gmra.mxu1 %vm706_vm2, %v791_v13 }
 0x14b   : > { %v777_v16 = vsel %vm776_vm13, %v1975_v0, %v773_v14 }
 0x14c   : > { %v780_v17 = vmul.f32 %v777_v16, %v2285_v26 }
 0x14e   : > { %v786_v18 = vmul.f32 %v1960_v56, %v780_v17 }
 0x150   : > { %v792_v19 = vadd.f32 %v1961_v60, %v786_v18 }
 0x152   : > { %1833 = vmatmul.msk.f32.gmra.mxu0 %vm706_vm2, %v792_v19  ;;  %1836 = vmatmul.msk.f32.gmra.mxu1 %vm706_vm2, %v792_v19 }
 0x1bf   : > { %v822_v21 = vpop.f32.mrf.mxu0  ;;  %v848_v22 = vpop.f32.mrf.mxu1 }
 0x1c0   : > { %v2327_v23 = vadd.f32 %v1962_v20, %v822_v21 }
 0x1c2   : > { %949 = vrot.lane.b32.xlu2 %v2327_v23, %s2083_s1 }
 0x1c7   : > { %v825_v24 = vpop.f32.mrf.mxu0  ;;  %v851_v25 = vpop.f32.mrf.mxu1 }
 0x1c8   : > { %v2330_v26 = vadd.f32 %v1962_v20, %v825_v24  ;;  %v2332_v27 = vpack.i.bf16 %v848_v22, %v851_v25 }
 0x1ca   : > { %951 = vrot.lane.b32.xlu1 %v2330_v26, %s2083_s1  ;;  %945 = vrot.lane.b32.xlu2 %v2330_v26, %s2084_s27 }
 0x1cf   : > { %v828_v28 = vpop.f32.mrf.mxu0  ;;  %v2336_v29 = vpop.f32.mrf.mxu1 }
 0x1d0   : > { %v2338_v30 = vadd.f32 %v1962_v20, %v828_v28  ;;  %1853 = vmatpush.msk.msrb.mxu1 %vm1049_vm14, %v2336_v29 }
 0x1d2   : > { %1103 = vmatpush.msrb.mxu1 %v851_v25  ;;  %953 = vrot.lane.b32.xlu0 %v2338_v30, %s2083_s1 }
 0x1d3   : > { %947 = vrot.lane.b32.xlu1 %v2338_v30, %s2084_s27  ;;  %862 = vrot.lane.b32.xlu2 %v2330_v26, %s2085_s3 }
 0x1d4   : > { %1104 = vmatpush.msrb.mxu1 %v848_v22 }
 0x1da   : > { %943 = vrot.lane.b32.xlu0 %v2327_v23, %s2084_s27 }
 0x1db   : > { %860 = vrot.lane.b32.xlu1 %v2327_v23, %s2085_s3  ;;  %1036 = vrot.lane.b32.xlu2 %v2336_v29, %s2085_s3 }
 0x1e2   : > { %864 = vrot.lane.b32.xlu0 %v2338_v30, %s2085_s3 }
 0x1e3   : > { %1946 = vrot.lane.b32.xlu1 %v2332_v27, %s2085_s3 }
 0x1eb   : > { %1125 = vrot.lane.b32.xlu1 %v2338_v30, %s2086_s29 }
 0x21c   : > { %v950_v31 = vpop.permute.xlu2 %949 }
 0x224   : > { %v946_v32 = vpop.permute.xlu2 %945 }
 0x22d   : > { %v863_v34 = vpop.permute.xlu2 %862 }
 0x235   : > { %v1037_v38 = vpop.permute.xlu2 %1036 }
 0x23c   : > { %v952_v33 = vpop.permute.xlu1 %951 }
 0x244   : > { %v954_v35 = vpop.permute.xlu0 %953 }
 0x245   : > { %v948_v36 = vpop.permute.xlu1 %947  ;;  %1843 = vmatpush.xpose.msk.msrb.mxu0 %vm866_vm15, %v954_v35  ;;  %1889 = vmatpush.xpose.msk.msra.mxu3 %vm866_vm15, %v954_v35 }
 0x249   : > { %1844 = vmatpush.xpose.msk.msrb.mxu0 %vm866_vm15, %v952_v33  ;;  %1890 = vmatpush.xpose.msk.msra.mxu3 %vm866_vm15, %v952_v33 }
 0x24c   : > { %v944_v37 = vpop.permute.xlu0 %943 }
 0x24d   : > { %v861_v39 = vpop.permute.xlu1 %860  ;;  %1845 = vmatpush.xpose.msk.msrb.mxu0 %vm866_vm15, %v950_v31  ;;  %1891 = vmatpush.xpose.msk.msra.mxu3 %vm866_vm15, %v950_v31 }
 0x250   : > { %1846 = vmatmul.msk.f32.vlgmr.msrb.gmra.mxu0 %vm866_vm15, %v944_v37  ;;  %1847 = vmatmul.msk.f32.vlgmr.msra.gmra.mxu3 %vm866_vm15, %v946_v32 }
 0x251   : > { %1849 = vmatpush.msk.msra.mxu0 %vm1049_vm14, %v1037_v38 }
 0x254   : > { %v865_v40 = vpop.permute.xlu0 %864 }
 0x255   : > { %v1947_v41 = vpop.permute.xlu1 %1946  ;;  %1837 = vmatpush.xpose.msk.msra.mxu2 %vm866_vm15, %v865_v40 }
 0x256   : > { %v1948_v42 = vunpack.i.l.bf16 %v1947_v41  ;;  %v1949_v43 = vunpack.i.h.bf16 %v1947_v41 }
 0x258   : > { %1066 = vmatpush.msra.mxu0 %v1948_v42  ;;  %1848 = vmatmul.msk.f32.gmra.mxu3 %vm866_vm15, %v948_v36 }
 0x259   : > { %1838 = vmatpush.xpose.msk.msra.mxu2 %vm866_vm15, %v863_v34 }
 0x25a   : > { %1067 = vmatpush.msra.mxu0 %v1949_v43 }
 0x25d   : > { %v1126_v44 = vpop.permute.xlu1 %1125  ;;  %1839 = vmatpush.xpose.msk.msra.mxu2 %vm866_vm15, %v861_v39 }
 0x260   : > { %1840 = vmatmul.msk.f32.vlgmr.msra.gmra.mxu2 %vm866_vm15, %v2327_v23 }
 0x261   : > { %1857 = vmatpush.xpose.msk.msrb.mxu2 %vm866_vm15, %v1126_v44 }
 0x268   : > { %1841 = vmatmul.msk.f32.gmra.mxu2 %vm866_vm15, %v2330_v26 }
 0x270   : > { %1842 = vmatmul.msk.f32.gmra.mxu2 %vm866_vm15, %v2338_v30 }
 0x2cd   : > { %v984_v45 = vpop.f32.mrf.mxu0 }
 0x2ce   : > { %v993_v46 = vmul.f32 0.35355338, %v984_v45 }
 0x2d0   : > { %v996_v47 = vsel %vm908_vm0, %v993_v46, -inf }
 0x2d1   : > { %997 = vmax.xlane.f32.xlu0 %v996_v47 }
 0x2d3   : > { %v987_v48 = vpop.f32.mrf.mxu3 }
 0x2d4   : > { %v994_v49 = vmul.f32 0.35355338, %v987_v48 }
 0x2d6   : > { %v999_v50 = vsel %vm908_vm0, %v994_v49, -inf }
 0x2d7   : > { %1000 = vmax.xlane.f32.xlu2 %v999_v50 }
 0x2db   : > { %v990_v51 = vpop.f32.mrf.mxu3 }
 0x2dc   : > { %v995_v52 = vmul.f32 0.35355338, %v990_v51 }
 0x2de   : > { %v1002_v53 = vsel %vm915_vm1, %v995_v52, -inf }
 0x2df   : > { %1003 = vmax.xlane.f32.xlu1 %v1002_v53 }
 0x2e3   : > { %v896_v13 = vpop.f32.mrf.mxu2 }
 0x2e4   : > { %v2399_v18 = vmul.f32 0.35355338, %v896_v13 }
 0x2e5   : > { %1121 = vrot.lane.b32.xlu0 %v2327_v23, %s2086_s29 }
 0x2e6   : > { %v909_v21 = vsel %vm908_vm0, %v2399_v18, -inf }
 0x2eb   : > { %v899_v14 = vpop.f32.mrf.mxu2 }
 0x2ec   : > { %v906_v19 = vmul.f32 0.35355338, %v899_v14 }
 0x2ed   : > { %1259 = vrot.lane.b32.xlu0 %v2338_v30, %s2087_s17 }
 0x2ee   : > { %v912_v22 = vsel %vm908_vm0, %v906_v19, -inf }
 0x2ef   : > { %1115 = vrot.lane.b32.xlu2 %v2327_v23, %s2088_s25 }
 0x2f3   : > { %v902_v16 = vpop.f32.mrf.mxu2 }
 0x2f4   : > { %v907_v17 = vmul.f32 0.35355338, %v902_v16 }
 0x2f5   : > { %1257 = vrot.lane.b32.xlu0 %v2330_v26, %s2087_s17 }
 0x2f6   : > { %v916_v20 = vsel %vm915_vm1, %v907_v17, -inf }
 0x2f8   : > { %1123 = vrot.lane.b32.xlu1 %v2330_v26, %s2086_s29 }
 0x344   : > { %v998_v54 = vpop.xlane.xlu0 %997 }
 0x345   : > { %v1005_v55 = vsub.f32 %v993_v46, %v998_v54 }
 0x347   : > { %v1008_v56 = vmul.f32 1.442695, %v1005_v55 }
 0x349   : > { %1976 = vpow2.f32 %v1008_v56 }
 0x34a   : > { %v1001_v57 = vpop.xlane.xlu2 %1000 }
 0x34b   : > { %v1006_v58 = vsub.f32 %v994_v49, %v1001_v57 }
 0x34d   : > { %v1010_v59 = vmul.f32 1.442695, %v1006_v58 }
 0x34f   : > { %v1977_v60 = vpop.eup %1976  ;;  %1978 = vpow2.f32 %v1010_v59 }
 0x350   : > { %v1014_v61 = vsel %vm908_vm0, %v1977_v60, 0.0 }
 0x351   : > { %1015 = vadd.xlane.f32.xlu0 %v1014_v61 }
 0x352   : > { %v1004_v62 = vpop.xlane.xlu1 %1003  ;;  %v1116_v12 = vpop.permute.xlu2 %1115 }
 0x353   : > { %v1007_v63 = vsub.f32 %v995_v52, %v1004_v62 }
 0x355   : > { %v1979_v0 = vpop.eup %1978  ;;  %v1012_v1 = vmul.f32 1.442695, %v1007_v63 }
 0x356   : > { %v1017_v2 = vsel %vm908_vm0, %v1979_v0, 0.0 }
 0x357   : > { %1980 = vpow2.f32 %v1012_v1  ;;  %v1122_v5 = vpop.permute.xlu0 %1121  ;;  %1018 = vadd.xlane.f32.xlu2 %v1017_v2 }
 0x35d   : > { %v1981_v6 = vpop.eup %1980 }
 0x35e   : > { %v1020_v8 = vsel %vm915_vm1, %v1981_v6, 0.0 }
 0x35f   : > { %v1260_v9 = vpop.permute.xlu0 %1259  ;;  %1021 = vadd.xlane.f32.xlu1 %v1020_v8 }
 0x360   : > { %1867 = vmatpush.xpose.msk.msrb.mxu0 %vm866_vm15, %v1260_v9 }
 0x365   : > { %1255 = vrot.lane.b32.xlu0 %v2327_v23, %s2087_s17 }
 0x367   : > { %v1258_v10 = vpop.permute.xlu0 %1257 }
 0x368   : > { %1868 = vmatpush.xpose.msk.msrb.mxu0 %vm866_vm15, %v1258_v10 }
 0x36a   : > { %v1124_v11 = vpop.permute.xlu1 %1123 }
 0x36b   : > { %1858 = vmatpush.xpose.msk.msrb.mxu2 %vm866_vm15, %v1124_v11 }
 0x36d   : > { %1119 = vrot.lane.b32.xlu0 %v2338_v30, %s2088_s25 }
 0x36f   : > { %1859 = vmatpush.xpose.msk.msrb.mxu2 %vm866_vm15, %v1122_v5  ;;  %1249 = vrot.lane.b32.xlu2 %v2327_v23, %s2089_s2 }
 0x372   : > { %1860 = vmatmul.msk.f32.vlgmr.msrb.gmra.mxu2 %vm866_vm15, %v1116_v12 }
 0x375   : > { %1253 = vrot.lane.b32.xlu0 %v2338_v30, %s2089_s2 }
 0x377   : > { %1251 = vrot.lane.b32.xlu2 %v2330_v26, %s2089_s2 }
 0x378   : > { %1117 = vrot.lane.b32.xlu1 %v2330_v26, %s2088_s25 }
 0x39f   : > { %917 = vmax.xlane.f32.xlu0 %v916_v20 }
 0x3a0   : > { %910 = vmax.xlane.f32.xlu2 %v909_v21 }
 0x3a2   : > { %913 = vmax.xlane.f32.xlu1 %v912_v22 }
 0x3c4   : > { %v1016_v23 = vpop.xlane.xlu0 %1015 }
 0x3c5   : > { %1982 = vrcp.f32 %v1016_v23 }
 0x3ca   : > { %v1019_v24 = vpop.xlane.xlu2 %1018 }
 0x3cb   : > { %v1983_v25 = vpop.eup %1982  ;;  %1984 = vrcp.f32 %v1019_v24 }
 0x3cc   : > { %v1026_v26 = vmul.f32 %v1983_v25, %v1977_v60 }
 0x3ce   : > { %1850 = vmatmul.msk.f32.vlgmr.msra.gmra.mxu0 %vm908_vm0, %v1026_v26 }
 0x3d1   : > { %v1985_v28 = vpop.eup %1984 }
 0x3d2   : > { %v1022_v30 = vpop.xlane.xlu1 %1021  ;;  %v1027_v31 = vmul.f32 %v1985_v28, %v1979_v0  ;;  %v1250_v35 = vpop.permute.xlu2 %1249 }
 0x3d3   : > { %1986 = vrcp.f32 %v1022_v30 }
 0x3d6   : > { %1851 = vmatmul.msk.f32.gmra.mxu0 %vm908_vm0, %v1027_v31 }
 0x3d7   : > { %v1256_v32 = vpop.permute.xlu0 %1255 }
 0x3d8   : > { %1869 = vmatpush.xpose.msk.msrb.mxu0 %vm866_vm15, %v1256_v32 }
 0x3d9   : > { %v1987_v33 = vpop.eup %1986 }
 0x3da   : > { %v1028_v34 = vmul.f32 %v1987_v33, %v1981_v6  ;;  %v1252_v38 = vpop.permute.xlu2 %1251 }
 0x3de   : > { %1852 = vmatmul.msk.f32.gmra.mxu0 %vm908_vm0, %v1028_v34 }
 0x3df   : > { %v1120_v37 = vpop.permute.xlu0 %1119 }
 0x3e6   : > { %1870 = vmatmul.msk.f32.vlgmr.msrb.gmra.mxu0 %vm866_vm15, %v1250_v35 }
 0x3e7   : > { %v1254_v39 = vpop.permute.xlu0 %1253 }
 0x3ea   : > { %v1118_v36 = vpop.permute.xlu1 %1117 }
 0x3eb   : > { %1861 = vmatmul.msk.f32.gmra.mxu2 %vm866_vm15, %v1118_v36 }
 0x3ee   : > { %1871 = vmatmul.msk.f32.gmra.mxu0 %vm866_vm15, %v1252_v38 }
 0x3f3   : > { %1862 = vmatmul.msk.f32.gmra.mxu2 %vm866_vm15, %v1120_v37 }
 0x3f5   : > { %v1156_v40 = vpop.f32.mrf.mxu2 }
 0x3f6   : > { %v1165_v41 = vmul.f32 0.35355338, %v1156_v40  ;;  %1872 = vmatmul.msk.f32.gmra.mxu0 %vm866_vm15, %v1254_v39 }
 0x3f8   : > { %v1168_v42 = vsel %vm908_vm0, %v1165_v41, -inf }
 0x3f9   : > { %1169 = vmax.xlane.f32.xlu2 %v1168_v42 }
 0x412   : > { %v918_v43 = vpop.xlane.xlu0 %917 }
 0x413   : > { %v921_v44 = vsub.f32 %v907_v17, %v918_v43  ;;  %v911_v57 = vpop.xlane.xlu2 %910 }
 0x414   : > { %v919_v60 = vsub.f32 %v2399_v18, %v911_v57 }
 0x415   : > { %v926_v45 = vmul.f32 1.442695, %v921_v44  ;;  %v914_v53 = vpop.xlane.xlu1 %913 }
 0x416   : > { %v920_v55 = vsub.f32 %v906_v19, %v914_v53  ;;  %v922_v62 = vmul.f32 1.442695, %v919_v60 }
 0x417   : > { %1988 = vpow2.f32 %v926_v45 }
 0x418   : > { %v924_v56 = vmul.f32 1.442695, %v920_v55 }
 0x41a   : > { %1990 = vpow2.f32 %v924_v56 }
 0x41b   : > { %1992 = vpow2.f32 %v922_v62 }
 0x41d   : > { %v2415_v46 = vpop.eup %1988 }
 0x41e   : > { %v934_v47 = vsel %vm915_vm1, %v2415_v46, 0.0 }
 0x41f   : > { %935 = vadd.xlane.f32.xlu0 %v934_v47 }
 0x420   : > { %v2428_v0 = vpop.eup %1990 }
 0x421   : > { %v931_v6 = vsel %vm908_vm0, %v2428_v0, 0.0  ;;  %v1993_v12 = vpop.eup %1992 }
 0x422   : > { %v928_v14 = vsel %vm908_vm0, %v1993_v12, 0.0 }
 0x44b   : > { %v2419_v48 = vpop.f32.mrf.mxu0 }
 0x453   : > { %v2421_v49 = vpop.f32.mrf.mxu0 }
 0x45b   : > { %v2423_v50 = vpop.f32.mrf.mxu0 }
 0x463   : > { %v1290_v51 = vpop.f32.mrf.mxu0 }
 0x464   : > { %v1299_v52 = vmul.f32 0.35355338, %v1290_v51 }
 0x466   : > { %v1302_v54 = vsel %vm908_vm0, %v1299_v52, -inf }
 0x467   : > { %1303 = vmax.xlane.f32.xlu0 %v1302_v54 }
 0x46b   : > { %v1293_v9 = vpop.f32.mrf.mxu0 }
 0x46c   : > { %v1170_v63 = vpop.xlane.xlu2 %1169  ;;  %v1300_v11 = vmul.f32 0.35355338, %v1293_v9 }
 0x46d   : > { %v1177_v5 = vsub.f32 %v1165_v41, %v1170_v63 }
 0x46e   : > { %v1159_v58 = vpop.f32.mrf.mxu2  ;;  %v1305_v13 = vsel %vm908_vm0, %v1300_v11, -inf }
 0x46f   : > { %v1166_v59 = vmul.f32 0.35355338, %v1159_v58  ;;  %v1180_v10 = vmul.f32 1.442695, %v1177_v5 }
 0x471   : > { %v1171_v61 = vsel %vm908_vm0, %v1166_v59, -inf  ;;  %1994 = vpow2.f32 %v1180_v10 }
 0x472   : > { %1172 = vmax.xlane.f32.xlu1 %v1171_v61 }
 0x473   : > { %v1296_v18 = vpop.f32.mrf.mxu0 }
 0x474   : > { %v2438_v19 = vmul.f32 0.35355338, %v1296_v18 }
 0x476   : > { %v1162_v1 = vpop.f32.mrf.mxu2  ;;  %v1308_v20 = vsel %vm915_vm1, %v2438_v19, -inf }
 0x477   : > { %v1167_v2 = vmul.f32 0.35355338, %v1162_v1  ;;  %v1995_v16 = vpop.eup %1994 }
 0x478   : > { %v1186_v17 = vsel %vm908_vm0, %v1995_v16, 0.0 }
 0x479   : > { %v1174_v8 = vsel %vm915_vm1, %v1167_v2, -inf }
 0x47a   : > { %932 = vadd.xlane.f32.xlu1 %v931_v6  ;;  %1175 = vmax.xlane.f32.xlu2 %v1174_v8 }
 0x47b   : > { %1951 = vrot.lane.b32.xlu0 %v2332_v27, %s2090_s26 }
 0x482   : > { %1306 = vmax.xlane.f32.xlu1 %v1305_v13  ;;  %929 = vadd.xlane.f32.xlu2 %v928_v14 }
 0x48a   : > { %1187 = vadd.xlane.f32.xlu2 %v1186_v17 }
 0x492   : > { %v936_v21 = vpop.xlane.xlu0 %935 }
 0x49b   : > { %1205 = vrot.lane.b32.xlu1 %v2336_v29, %s2090_s26 }
 0x4a5   : > { %1309 = vmax.xlane.f32.xlu0 %v1308_v20 }
 0x4b9   : > { %1956 = vrot.lane.b32.xlu0 %v2332_v27, %s2091_s30 }
 0x4da   : > { %v1304_v22 = vpop.xlane.xlu0 %1303 }
 0x4db   : > { %v1311_v25 = vsub.f32 %v1299_v52, %v1304_v22 }
 0x4dd   : > { %v1314_v28 = vmul.f32 1.442695, %v1311_v25 }
 0x4e5   : > { %v1173_v23 = vpop.xlane.xlu1 %1172 }
 0x4e6   : > { %v1178_v24 = vsub.f32 %v1166_v59, %v1173_v23 }
 0x4e8   : > { %v1182_v26 = vmul.f32 1.442695, %v1178_v24 }
 0x4ea   : > { %1996 = vpow2.f32 %v1182_v26 }
 0x4eb   : > { %1998 = vpow2.f32 %v1314_v28 }
 0x4ed   : > { %v933_v30 = vpop.xlane.xlu1 %932  ;;  %v1176_v31 = vpop.xlane.xlu2 %1175 }
 0x4ee   : > { %v1179_v32 = vsub.f32 %v1167_v2, %v1176_v31  ;;  %v1952_v55 = vpop.permute.xlu0 %1951 }
 0x4ef   : > { %v1953_v59 = vunpack.i.l.bf16 %v1952_v55  ;;  %v1954_v60 = vunpack.i.h.bf16 %v1952_v55 }
 0x4f0   : > { %v1997_v33 = vpop.eup %1996  ;;  %v1184_v34 = vmul.f32 1.442695, %v1179_v32  ;;  %v1963_v32 = vld [vmem:[%s2623_s28] ss:$0 sm:$0xff] }
 0x4f1   : > { %v1189_v35 = vsel %vm908_vm0, %v1997_v33, 0.0  ;;  %v2445_v27 = vpop.eup %1998 }
 0x4f2   : > { %1190 = vadd.xlane.f32.xlu2 %v1189_v35  ;;  %2000 = vpow2.f32 %v1184_v34  ;;  %v1320_v41 = vsel %vm908_vm0, %v2445_v27, 0.0 }
 0x4f5   : > { %v1307_v36 = vpop.xlane.xlu1 %1306  ;;  %v930_v38 = vpop.xlane.xlu2 %929 }
 0x4f6   : > { %v1312_v37 = vsub.f32 %v1300_v11, %v1307_v36  ;;  %2002 = vrcp.f32 %v930_v38 }
 0x4f8   : > { %v1316_v39 = vmul.f32 1.442695, %v1312_v37  ;;  %v2001_v40 = vpop.eup %2000 }
 0x4f9   : > { %v1192_v42 = vsel %vm915_vm1, %v2001_v40, 0.0 }
 0x4fa   : > { %2004 = vpow2.f32 %v1316_v39  ;;  %1321 = vadd.xlane.f32.xlu2 %v1320_v41  ;;  %1193 = vadd.xlane.f32.xlu1 %v1192_v42 }
 0x4fb   : > { %2006 = vrcp.f32 %v933_v30 }
 0x4fc   : > { %v2003_v43 = vpop.eup %2002  ;;  %2008 = vrcp.f32 %v936_v21 }
 0x4fd   : > { %v940_v44 = vmul.f32 %v2003_v43, %v1993_v12  ;;  %v1188_v52 = vpop.xlane.xlu2 %1187 }
 0x4fe   : > { %2010 = vrcp.f32 %v1188_v52 }
 0x4ff   : > { %1854 = vmatmul.msk.f32.vlgmr.msrb.gmra.mxu1 %vm908_vm0, %v940_v44 }
 0x500   : > { %v2005_v45 = vpop.eup %2004 }
 0x501   : > { %v1323_v47 = vsel %vm908_vm0, %v2005_v45, 0.0  ;;  %v2007_v51 = vpop.eup %2006 }
 0x502   : > { %1324 = vadd.xlane.f32.xlu0 %v1323_v47  ;;  %v941_v53 = vmul.f32 %v2007_v51, %v2428_v0  ;;  %v2009_v54 = vpop.eup %2008 }
 0x503   : > { %v942_v58 = vmul.f32 %v2009_v54, %v2415_v46 }
 0x504   : > { %v2011_v57 = vpop.eup %2010 }
 0x505   : > { %v1198_v61 = vmul.f32 %v2011_v57, %v1995_v16 }
 0x507   : > { %1855 = vmatmul.msk.f32.gmra.mxu1 %vm908_vm0, %v941_v53 }
 0x50d   : > { %v1206_v56 = vpop.permute.xlu1 %1205 }
 0x50e   : > { %1863 = vmatpush.msk.msrb.mxu3 %vm1049_vm14, %v1206_v56 }
 0x50f   : > { %1856 = vmatmul.msk.f32.gmra.mxu1 %vm908_vm0, %v942_v58 }
 0x510   : > { %1234 = vmatpush.msrb.mxu3 %v1953_v59 }
 0x512   : > { %1235 = vmatpush.msrb.mxu3 %v1954_v60  ;;  %1339 = vrot.lane.b32.xlu2 %v2336_v29, %s2091_s30 }
 0x513   : > { %1864 = vmatmul.msk.f32.vlgmr.msrb.gmra.mxu3 %vm908_vm0, %v1198_v61 }
 0x518   : > { %v1310_v62 = vpop.xlane.xlu0 %1309 }
 0x519   : > { %v1313_v63 = vsub.f32 %v2438_v19, %v1310_v62 }
 0x51b   : > { %v1318_v0 = vmul.f32 1.442695, %v1313_v63 }
 0x51d   : > { %2012 = vpow2.f32 %v1318_v0 }
 0x523   : > { %v2013_v1 = vpop.eup %2012 }
 0x524   : > { %v1326_v46 = vsel %vm915_vm1, %v2013_v1, 0.0 }
 0x52b   : > { %v1957_v6 = vpop.permute.xlu0 %1956 }
 0x52c   : > { %v1958_v14 = vunpack.i.l.bf16 %v1957_v6  ;;  %v1959_v17 = vunpack.i.h.bf16 %v1957_v6  ;;  %v681_v6 = vld [vmem:[%s2239_s13] sm:$0xff] }
 0x53b   : > { %1327 = vadd.xlane.f32.xlu2 %v1326_v46  ;;  %v684_v46 = vld [vmem:[%s2239_s13 + $0x18] sm:$0xff] }
 0x53c   : > { %1494 = vmatpush.msra.mxu2 %v684_v46  ;;  %v687_v46 = vld [vmem:[%s2253_s0 + $0x8] sm:$0xff] }
 0x565   : > { %v1191_v2 = vpop.xlane.xlu2 %1190 }
 0x566   : > { %2014 = vrcp.f32 %v1191_v2  ;;  %v683_v2 = vld [vmem:[%s2239_s13 + $0x10] sm:$0xff] }
 0x567   : > { %1495 = vmatpush.msra.mxu2 %v683_v2 }
 0x56c   : > { %v2015_v5 = vpop.eup %2014 }
 0x56d   : > { %v1322_v8 = vpop.xlane.xlu2 %1321  ;;  %v1199_v9 = vmul.f32 %v2015_v5, %v1997_v33  ;;  %v1194_v10 = vpop.xlane.xlu1 %1193  ;;  %v682_v5 = vld [vmem:[%s2239_s13 + $0x8] sm:$0xff] }
 0x56e   : > { %2016 = vrcp.f32 %v1194_v10  ;;  %1496 = vmatpush.msra.mxu2 %v682_v5  ;;  %v686_v5 = vld [vmem:[%s2253_s0] sm:$0xff] }
 0x56f   : > { %1865 = vmatmul.msk.f32.gmra.mxu3 %vm908_vm0, %v1199_v9  ;;  %2018 = vrcp.f32 %v1322_v8 }
 0x570   : > { %1497 = vmatpush.msra.mxu2 %v681_v6 }
 0x574   : > { %v2017_v29 = vpop.eup %2016 }
 0x575   : > { %v1325_v11 = vpop.xlane.xlu0 %1324  ;;  %v1340_v12 = vpop.permute.xlu2 %1339  ;;  %v1200_v16 = vmul.f32 %v2017_v29, %v2001_v40 }
 0x576   : > { %v2019_v13 = vpop.eup %2018  ;;  %1873 = vmatpush.msk.msra.mxu1 %vm1049_vm14, %v1340_v12  ;;  %2020 = vrcp.f32 %v1325_v11 }
 0x577   : > { %1866 = vmatmul.msk.f32.gmra.mxu3 %vm908_vm0, %v1200_v16  ;;  %v1332_v18 = vmul.f32 %v2019_v13, %v2445_v27 }
 0x578   : > { %1368 = vmatpush.msra.mxu1 %v1958_v14 }
 0x57a   : > { %1369 = vmatpush.msra.mxu1 %v1959_v17 }
 0x57b   : > { %1874 = vmatmul.msk.f32.vlgmr.msra.gmra.mxu1 %vm908_vm0, %v1332_v18 }
 0x57c   : > { %v2021_v19 = vpop.eup %2020  ;;  %v1106_v24 = vpop.f32.mrf.mxu1 }
 0x57d   : > { %v1333_v20 = vmul.f32 %v2021_v19, %v2005_v45  ;;  %v1107_v30 = vadd.f32 %v1106_v24, %v2419_v48 }
 0x583   : > { %1875 = vmatmul.msk.f32.gmra.mxu1 %vm908_vm0, %v1333_v20 }
 0x584   : > { %v1109_v25 = vpop.f32.mrf.mxu1 }
 0x585   : > { %v1110_v27 = vadd.f32 %v1109_v25, %v2421_v49 }
 0x58c   : > { %v1112_v26 = vpop.f32.mrf.mxu1 }
 0x58d   : > { %v1113_v49 = vadd.f32 %v1112_v26, %v2423_v50  ;;  %v1965_v26 = vld [vmem:[%s2625_s24] ss:$0 sm:$0xff] }
 0x596   : > { %v1237_v28 = vpop.f32.mrf.mxu3 }
 0x597   : > { %v1246_v31 = vadd.f32 %v1237_v28, %v1107_v30 }
 0x5ae   : > { %v1328_v21 = vpop.xlane.xlu2 %1327 }
 0x5af   : > { %2022 = vrcp.f32 %v1328_v21 }
 0x5b5   : > { %v2023_v22 = vpop.eup %2022 }
 0x5b6   : > { %v1334_v23 = vmul.f32 %v2023_v22, %v2013_v1  ;;  %v1964_v22 = vld [vmem:[%s2624_s21] ss:$0 sm:$0xff] }
 0x5b8   : > { %1876 = vmatmul.msk.f32.gmra.mxu1 %vm908_vm0, %v1334_v23 }
 0x5f2   : > { %v1240_v36 = vpop.f32.mrf.mxu3 }
 0x5f3   : > { %v1247_v38 = vadd.f32 %v1240_v36, %v1110_v27 }
 0x5f8   : > { %v1371_v33 = vpop.f32.mrf.mxu1 }
 0x5f9   : > { %v1380_v34 = vadd.f32 %v1371_v33, %v1246_v31 }
 0x5fa   : > { %v1243_v44 = vpop.f32.mrf.mxu3 }
 0x5fb   : > { %v1386_v35 = vadd.f32 %v1963_v32, %v1380_v34 }
 0x5fd   : > { %v2477_v37 = vadd.f32 %v1386_v35, %v2262_v3  ;;  %v1248_v3 = vadd.f32 %v1243_v44, %v1113_v49 }
 0x5ff   : > { %v1392_v39 = vsel %vm706_vm2, %v2477_v37, 0.0 }
 0x600   : > { %1393 = vadd.xlane.f32.xlu1 %v1392_v39  ;;  %v1374_v48 = vpop.f32.mrf.mxu1 }
 0x601   : > { %v1381_v40 = vadd.f32 %v1374_v48, %v1247_v38 }
 0x603   : > { %v1387_v41 = vadd.f32 %v1963_v32, %v1381_v40 }
 0x605   : > { %v2482_v42 = vadd.f32 %v1387_v41, %v2270_v7 }
 0x607   : > { %v1395_v43 = vsel %vm706_vm2, %v2482_v42, 0.0 }
 0x608   : > { %1396 = vadd.xlane.f32.xlu0 %v1395_v43 }
 0x635   : > { %v1377_v45 = vpop.f32.mrf.mxu1 }
 0x636   : > { %v1382_v47 = vadd.f32 %v1377_v45, %v1248_v3 }
 0x638   : > { %v1388_v51 = vadd.f32 %v1963_v32, %v1382_v47 }
 0x63a   : > { %v2488_v52 = vadd.f32 %v1388_v51, %v2264_v4 }
 0x63c   : > { %v1398_v53 = vsel %vm713_vm3, %v2488_v52, 0.0 }
 0x63d   : > { %1399 = vadd.xlane.f32.xlu1 %v1398_v53  ;;  %v701_v53 = vld [vmem:[%s2253_s0 + $0x78] sm:$0xff] }
 0x63e   : > { %1574 = vmatpush.msra.mxu3 %v701_v53 }
 0x673   : > { %v1394_v7 = vpop.xlane.xlu1 %1393 }
 0x674   : > { %v1401_v54 = vmul.f32 %v1394_v7, %v2274_v15  ;;  %v700_v7 = vld [vmem:[%s2253_s0 + $0x70] sm:$0xff] }
 0x675   : > { %1575 = vmatpush.msra.mxu3 %v700_v7 }
 0x676   : > { %v1404_v55 = vsub.f32 %v2477_v37, %v1401_v54  ;;  %v699_v54 = vld [vmem:[%s2253_s0 + $0x68] sm:$0xff] }
 0x677   : > { %1576 = vmatpush.msra.mxu3 %v699_v54 }
 0x678   : > { %v1407_v56 = vmul.f32 %v1404_v55, %v1404_v55 }
 0x67a   : > { %v1410_v50 = vsel %vm706_vm2, %v1407_v56, 0.0  ;;  %v697_v56 = vld [vmem:[%s2253_s0 + $0x58] sm:$0xff] }
 0x67b   : > { %1411 = vadd.xlane.f32.xlu0 %v1410_v50  ;;  %v1397_v57 = vpop.xlane.xlu0 %1396  ;;  %v696_v50 = vld [vmem:[%s2253_s0 + $0x50] sm:$0xff] }
 0x67c   : > { %v1402_v4 = vmul.f32 %v1397_v57, %v2274_v15  ;;  %v695_v57 = vld [vmem:[%s2253_s0 + $0x48] sm:$0xff] }
 0x67e   : > { %v1405_v58 = vsub.f32 %v2482_v42, %v1402_v4  ;;  %v694_v4 = vld [vmem:[%s2253_s0 + $0x40] sm:$0xff] }
 0x680   : > { %v1408_v59 = vmul.f32 %v1405_v58, %v1405_v58 }
 0x682   : > { %v1413_v60 = vsel %vm706_vm2, %v1408_v59, 0.0  ;;  %v692_v59 = vld [vmem:[%s2253_s0 + $0x30] sm:$0xff] }
 0x683   : > { %1414 = vadd.xlane.f32.xlu1 %v1413_v60  ;;  %v691_v60 = vld [vmem:[%s2253_s0 + $0x28] sm:$0xff] }
 0x6b0   : > { %v1400_v61 = vpop.xlane.xlu1 %1399 }
 0x6b1   : > { %v1403_v62 = vmul.f32 %v1400_v61, %v2274_v15  ;;  %v690_v61 = vld [vmem:[%s2253_s0 + $0x20] sm:$0xff] }
 0x6b3   : > { %v2500_v63 = vsub.f32 %v2488_v52, %v1403_v62  ;;  %v689_v62 = vld [vmem:[%s2253_s0 + $0x18] sm:$0xff] }
 0x6b5   : > { %v1409_v0 = vmul.f32 %v2500_v63, %v2500_v63 }
 0x6b7   : > { %v1416_v1 = vsel %vm713_vm3, %v1409_v0, 0.0  ;;  %v688_v0 = vld [vmem:[%s2253_s0 + $0x10] sm:$0xff] }
 0x6b8   : > { %1417 = vadd.xlane.f32.xlu2 %v1416_v1 }
 0x6ee   : > { %v1412_v8 = vpop.xlane.xlu0 %1411 }
 0x6ef   : > { %v1419_v9 = vmul.f32 %v1412_v8, %v2274_v15 }
 0x6f1   : > { %v1422_v10 = vadd.f32 1e-05, %v1419_v9 }
 0x6f3   : > { %2024 = vrsqrt.f32 %v1422_v10  ;;  %vm1431_vm5 = vweird.f32 %v1422_v10 }
 0x6f6   : > { %v1415_v29 = vpop.xlane.xlu1 %1414 }
 0x6f7   : > { %v1420_v11 = vmul.f32 %v1415_v29, %v2274_v15 }
 0x6f9   : > { %v2025_v12 = vpop.eup %2024  ;;  %v1423_v13 = vadd.f32 1e-05, %v1420_v11 }
 0x6fa   : > { %v1426_v14 = vmul.f32 %v2025_v12, %v1422_v10  ;;  %vm1432_vm4 = vweird.f32 %v2025_v12 }
 0x6fb   : > { %2026 = vrsqrt.f32 %v1423_v13  ;;  %vm1433_vm6 = vmor %vm1431_vm5, %vm1432_vm4  ;;  %vm1441_vm8 = vweird.f32 %v1423_v13 }
 0x6fc   : > { %v1427_v16 = vmul.f32 %v2025_v12, %v1426_v14 }
 0x6fe   : > { %v1428_v17 = vmul.f32 0.5, %v1427_v16 }
 0x700   : > { %v1429_v18 = vsub.f32 1.5, %v1428_v17 }
 0x701   : > { %v2027_v19 = vpop.eup %2026 }
 0x702   : > { %v1430_v20 = vmul.f32 %v2025_v12, %v1429_v18  ;;  %v1436_v21 = vmul.f32 %v2027_v19, %v1423_v13  ;;  %vm1442_vm7 = vweird.f32 %v2027_v19 }
 0x703   : > { %vm1443_vm9 = vmor %vm1441_vm8, %vm1442_vm7 }
 0x704   : > { %v1434_v23 = vsel %vm1433_vm6, %v2025_v12, %v1430_v20  ;;  %v1437_v24 = vmul.f32 %v2027_v19, %v1436_v21 }
 0x705   : > { %v1455_v25 = vmul.f32 %v1434_v23, %v1404_v55  ;;  %v698_v55 = vld [vmem:[%s2253_s0 + $0x60] sm:$0xff] }
 0x706   : > { %v1438_v28 = vmul.f32 0.5, %v1437_v24  ;;  %1577 = vmatpush.msra.mxu3 %v698_v55 }
 0x707   : > { %v1461_v30 = vmul.f32 %v1964_v22, %v1455_v25 }
 0x708   : > { %v1439_v31 = vsub.f32 1.5, %v1438_v28  ;;  %1578 = vmatpush.msra.mxu3 %v697_v56 }
 0x709   : > { %v1467_v32 = vadd.f32 %v1965_v26, %v1461_v30 }
 0x70a   : > { %v1440_v33 = vmul.f32 %v2027_v19, %v1439_v31  ;;  %1579 = vmatpush.msra.mxu3 %v696_v50 }
 0x70b   : > { %1877 = vmatmul.msk.f32.vlgmr.msra.gmra.mxu2 %vm706_vm2, %v1467_v32 }
 0x70c   : > { %v1444_v34 = vsel %vm1443_vm9, %v2027_v19, %v1440_v33  ;;  %1580 = vmatpush.msra.mxu3 %v695_v57 }
 0x70d   : > { %v1456_v35 = vmul.f32 %v1444_v34, %v1405_v58  ;;  %v693_v58 = vld [vmem:[%s2253_s0 + $0x38] sm:$0xff] }
 0x70e   : > { %1581 = vmatpush.msra.mxu3 %v694_v4  ;;  %v1967_v4 = vld [vmem:[%s645_s22] ss:$0 sm:$0xff] }
 0x70f   : > { %v1462_v36 = vmul.f32 %v1964_v22, %v1456_v35 }
 0x710   : > { %1582 = vmatpush.msra.mxu3 %v693_v58 }
 0x711   : > { %v1468_v27 = vadd.f32 %v1965_v26, %v1462_v36 }
 0x712   : > { %1583 = vmatpush.msra.mxu3 %v692_v59 }
 0x713   : > { %1878 = vmatmul.msk.f32.gmra.mxu2 %vm706_vm2, %v1468_v27 }
 0x714   : > { %1584 = vmatpush.msra.mxu3 %v691_v60 }
 0x716   : > { %1585 = vmatpush.msra.mxu3 %v690_v61 }
 0x718   : > { %1586 = vmatpush.msra.mxu3 %v689_v62 }
 0x71a   : > { %1587 = vmatpush.msra.mxu3 %v688_v0 }
 0x71c   : > { %1588 = vmatpush.msra.mxu3 %v687_v46 }
 0x71e   : > { %1589 = vmatpush.msra.mxu3 %v686_v5 }
 0x72b   : > { %v1418_v38 = vpop.xlane.xlu2 %1417 }
 0x72c   : > { %v1421_v39 = vmul.f32 %v1418_v38, %v2274_v15 }
 0x72e   : > { %v1424_v48 = vadd.f32 1e-05, %v1421_v39 }
 0x730   : > { %2028 = vrsqrt.f32 %v1424_v48  ;;  %vm1451_vm11 = vweird.f32 %v1424_v48 }
 0x736   : > { %v2029_v40 = vpop.eup %2028 }
 0x737   : > { %v1446_v41 = vmul.f32 %v2029_v40, %v1424_v48  ;;  %vm1452_vm10 = vweird.f32 %v2029_v40 }
 0x738   : > { %vm1453_vm12 = vmor %vm1451_vm11, %vm1452_vm10 }
 0x739   : > { %v1447_v43 = vmul.f32 %v2029_v40, %v1446_v41 }
 0x73b   : > { %v1448_v44 = vmul.f32 0.5, %v1447_v43 }
 0x73d   : > { %v1449_v49 = vsub.f32 1.5, %v1448_v44 }
 0x73f   : > { %v1450_v3 = vmul.f32 %v2029_v40, %v1449_v49 }
 0x741   : > { %v1454_v45 = vsel %vm1453_vm12, %v2029_v40, %v1450_v3 }
 0x742   : > { %v1457_v15 = vmul.f32 %v1454_v45, %v2500_v63  ;;  %v1966_v63 = vld [vmem:[%s637_s19] ss:$0 sm:$0xff] }
 0x744   : > { %v1463_v47 = vmul.f32 %v1964_v22, %v1457_v15 }
 0x746   : > { %v1469_v51 = vadd.f32 %v1965_v26, %v1463_v47 }
 0x748   : > { %1879 = vmatmul.msk.f32.gmra.mxu2 %vm706_vm2, %v1469_v51 }
 0x78e   : > { %v1499_v1 = vpop.f32.mrf.mxu2 }
 0x78f   : > { %v1500_v2 = vadd.f32 %v1966_v63, %v1499_v1 }
 0x791   : > { %v1880_v6 = vmul.f32 -1.702, %v1500_v2 }
 0x793   : > { %v1514_v8 = vmul.f32 1.442695, %v1880_v6 }
 0x795   : > { %2030 = vpow2.f32 %v1514_v8 }
 0x796   : > { %v1502_v9 = vpop.f32.mrf.mxu2 }
 0x797   : > { %v1503_v10 = vadd.f32 %v1966_v63, %v1502_v9 }
 0x799   : > { %v1881_v29 = vmul.f32 -1.702, %v1503_v10 }
 0x79b   : > { %v2031_v11 = vpop.eup %2030  ;;  %v1516_v12 = vmul.f32 1.442695, %v1881_v29 }
 0x79c   : > { %v1520_v13 = vadd.f32 1.0, %v2031_v11 }
 0x79d   : > { %2032 = vpow2.f32 %v1516_v12 }
 0x79e   : > { %2034 = vrcp.f32 %v1520_v13  ;;  %v1534_v20 = vand.u32 2147483648, %v1520_v13  ;;  %v1532_v22 = vand.u32 2147483647, %v1520_v13  ;;  %vm1528_vm14 = vweird.f32 %v1520_v13 }
 0x7a0   : > { %v1535_v25 = vor.u32 1.1754944e-38, %v1534_v20  ;;  %vm1533_vm0 = vcmp.eq.f32.partialorder %v1532_v22, 8.507059e+37 }
 0x7a3   : > { %v2033_v14 = vpop.eup %2032 }
 0x7a4   : > { %v2035_v16 = vpop.eup %2034  ;;  %v1521_v17 = vadd.f32 1.0, %v2033_v14 }
 0x7a5   : > { %v1524_v18 = vmul.f32 %v2035_v16, %v1520_v13  ;;  %vm1529_vm13 = vweird.f32 %v2035_v16 }
 0x7a6   : > { %2036 = vrcp.f32 %v1521_v17  ;;  %vm1530_vm15 = vmor %vm1528_vm14, %vm1529_vm13  ;;  %v1549_v33 = vand.u32 2147483648, %v1521_v17  ;;  %v1547_v35 = vand.u32 2147483647, %v1521_v17  ;;  %vm1543_vm4 = vweird.f32 %v1521_v17 }
 0x7a7   : > { %v1525_v19 = vsub.f32 1.0, %v1524_v18 }
 0x7a8   : > { %v1550_v27 = vor.u32 1.1754944e-38, %v1549_v33  ;;  %vm1548_vm6 = vcmp.eq.f32.partialorder %v1547_v35, 8.507059e+37 }
 0x7a9   : > { %v1526_v21 = vmul.f32 %v2035_v16, %v1525_v19 }
 0x7ab   : > { %v1527_v23 = vadd.f32 %v2035_v16, %v1526_v21 }
 0x7ac   : > { %v2037_v24 = vpop.eup %2036 }
 0x7ad   : > { %v1531_v26 = vsel %vm1530_vm15, %v2035_v16, %v1527_v23  ;;  %v1539_v28 = vmul.f32 %v2037_v24, %v1521_v17  ;;  %vm1544_vm1 = vweird.f32 %v2037_v24 }
 0x7ae   : > { %v1536_v30 = vsel %vm1533_vm0, %v1535_v25, %v1531_v26  ;;  %vm1545_vm5 = vmor %vm1543_vm4, %vm1544_vm1 }
 0x7af   : > { %v1568_v31 = vmul.f32 %v1536_v30, %v1500_v2  ;;  %v1540_v32 = vsub.f32 1.0, %v1539_v28 }
 0x7b1   : > { %1590 = vmatmul.f32.vlgmr.msra.gmra.mxu3 %v1568_v31  ;;  %v1541_v34 = vmul.f32 %v2037_v24, %v1540_v32 }
 0x7b3   : > { %v1542_v36 = vadd.f32 %v2037_v24, %v1541_v34 }
 0x7b5   : > { %v1546_v38 = vsel %vm1545_vm5, %v2037_v24, %v1542_v36 }
 0x7b6   : > { %v1551_v39 = vsel %vm1548_vm6, %v1550_v27, %v1546_v38 }
 0x7b7   : > { %v1569_v48 = vmul.f32 %v1551_v39, %v1503_v10 }
 0x7b9   : > { %1593 = vmatmul.f32.gmra.mxu3 %v1569_v48 }
 0x7cb   : > { %v1505_v40 = vpop.f32.mrf.mxu2 }
 0x7cc   : > { %v1506_v41 = vadd.f32 %v1966_v63, %v1505_v40 }
 0x7ce   : > { %v1882_v43 = vmul.f32 -1.702, %v1506_v41 }
 0x7d0   : > { %v1518_v44 = vmul.f32 1.442695, %v1882_v43 }
 0x7d2   : > { %2038 = vpow2.f32 %v1518_v44 }
 0x7d8   : > { %v2039_v49 = vpop.eup %2038 }
 0x7d9   : > { %v1522_v3 = vadd.f32 1.0, %v2039_v49 }
 0x7db   : > { %2040 = vrcp.f32 %v1522_v3  ;;  %v1564_v51 = vand.u32 2147483648, %v1522_v3  ;;  %v1562_v7 = vand.u32 2147483647, %v1522_v3  ;;  %vm1558_vm8 = vweird.f32 %v1522_v3 }
 0x7dd   : > { %v1565_v55 = vor.u32 1.1754944e-38, %v1564_v51  ;;  %vm1563_vm10 = vcmp.eq.f32.partialorder %v1562_v7, 8.507059e+37 }
 0x7e1   : > { %v2041_v45 = vpop.eup %2040 }
 0x7e2   : > { %v1554_v15 = vmul.f32 %v2041_v45, %v1522_v3  ;;  %vm1559_vm7 = vweird.f32 %v2041_v45 }
 0x7e3   : > { %vm1560_vm9 = vmor %vm1558_vm8, %vm1559_vm7 }
 0x7e4   : > { %v1555_v47 = vsub.f32 1.0, %v1554_v15 }
 0x7e6   : > { %v1556_v53 = vmul.f32 %v2041_v45, %v1555_v47 }
 0x7e8   : > { %v1557_v54 = vadd.f32 %v2041_v45, %v1556_v53 }
 0x7ea   : > { %v1561_v56 = vsel %vm1560_vm9, %v2041_v45, %v1557_v54 }
 0x7eb   : > { %v1566_v50 = vsel %vm1563_vm10, %v1565_v55, %v1561_v56 }
 0x7ec   : > { %v1570_v57 = vmul.f32 %v1566_v50, %v1506_v41 }
 0x7ee   : > { %1596 = vmatmul.f32.gmra.mxu3 %v1570_v57 }
 0x834   : > { %v1591_v58 = vpop.f32.mrf.mxu3 }
 0x835   : > { %v1592_v59 = vadd.f32 %v1967_v4, %v1591_v58 }
 0x837   : > { %v1600_v60 = vadd.f32 %v1592_v59, %v2477_v37 }
 0x839   : > { %1603 = vst.msk [vmem:[#allocation2] sm:$0xff] %vm706_vm2, %v1600_v60 }
 0x83a   : > { %1606 = vst.msk [vmem:[%s2259_s9] sm:$0xff] %vm706_vm2, %v1600_v60 }
 0x83c   : > { %v1594_v61 = vpop.f32.mrf.mxu3 }
 0x83d   : > { %v1595_v62 = vadd.f32 %v1967_v4, %v1594_v61 }
 0x83f   : > { %v1601_v63 = vadd.f32 %v1595_v62, %v2482_v42 }
 0x841   : > { %1604 = vst.msk [vmem:[#allocation2 + $0x8] sm:$0xff] %vm706_vm2, %v1601_v63 }
 0x842   : > { %1607 = vst.msk [vmem:[%s2259_s9 + $0x8] sm:$0xff] %vm706_vm2, %v1601_v63 }
 0x871   : > { %v1597_v0 = vpop.f32.mrf.mxu3 }
 0x872   : > { %v1598_v1 = vadd.f32 %v1967_v4, %v1597_v0 }
 0x874   : > { %v1602_v46 = vadd.f32 %v1598_v1, %v2488_v52 }
 0x876   : > { %1605 = vst.msk [vmem:[#allocation2 + $0x10] sm:$0x1] %vm713_vm3, %v1602_v46 }
 0x877   : > { %1608 = vst.msk [vmem:[%s2259_s9 + $0x10] sm:$0x1] %vm713_vm3, %v1602_v46 }
 0x878 PF: > { %s2626_s15 = sld [smem:[#allocation6_spill]] }
 0x879   : > { %s2627_s25 = sld [smem:[#allocation4_spill]] }
 0x87a   : > { %s2628_s26 = sld [smem:[#allocation5_spill]] }
 0x87b   : > { %s2629_s27 = sld [smem:[#allocation7_spill]] }
 0x87c   : > { %s2630_s28 = sld [smem:[#allocation8_spill]] }
 0x87e   : > { %s23_s29 = sadd.s32 1, %s2626_s15  }
 0x87f   : > { %p20_p8 = scmp.ge.s32.totalorder %s23_s29, 8  }
 0x881   :  { %22 = sbr.rel (!%p20_p8) target bundleno = 7 (0x7), region = 142 }

// kernel: _clipseg_core.5
= control target key start
LH: loop header
LB: loop body
LE: loop exit
PB: predicated region body
PF: predicated region fallthrough
CT: control target
= control target key end

     0   :  { %s2758_s28 = smov 0   ;;  %s2760_s29 = smov 0   ;;  %s3207_s0 = inlined_call_operand.vmem [shape: f32[3,2,17,32], index: 0, kind: input, shape index: {}]   ;;  %s3208_s1 = inlined_call_operand.vmem [shape: f32[2,1,32], index: 1, kind: input, shape index: {}]   ;;  %s3209_s2 = inlined_call_operand.vmem [shape: f32[3,32,16], index: 2, kind: input, shape index: {}]   ;;  %s3210_s3 = inlined_call_operand.vmem [shape: f32[3,1,16], index: 3, kind: input, shape index: {}]   ;;  %s3211_s4 = inlined_call_operand.vmem [shape: f32[3,16,32], index: 4, kind: input, shape index: {}]   ;;  %s3212_s5 = inlined_call_operand.vmem [shape: f32[3,1,32], index: 5, kind: input, shape index: {}]   ;;  %s3213_s6 = inlined_call_operand.vmem [shape: f32[3,16,64], index: 6, kind: input, shape index: {}]   ;;  %s3214_s7 = inlined_call_operand.vmem [shape: f32[3,1,16], index: 7, kind: input, shape index: {}]   ;;  %s3215_s8 = inlined_call_operand.vmem [shape: f32[3,1,16], index: 8, kind: input, shape index: {}]   ;;  %s3216_s9 = inlined_call_operand.vmem [shape: f32[3,1,16], index: 9, kind: input, shape index: {}]   ;;  %s3217_s10 = inlined_call_operand.vmem [shape: f32[3,1,16], index: 10, kind: input, shape index: {}]   ;;  %s3218_s11 = inlined_call_operand.vmem [shape: f32[3,1,16], index: 11, kind: input, shape index: {}]   ;;  %s3219_s12 = inlined_call_operand.vmem [shape: f32[3,16,64], index: 12, kind: input, shape index: {}]   ;;  %s3220_s13 = inlined_call_operand.vmem [shape: f32[3,1,64], index: 13, kind: input, shape index: {}]   ;;  %s3221_s14 = inlined_call_operand.vmem [shape: f32[3,64,16], index: 14, kind: input, shape index: {}]   ;;  %s3222_s15 = inlined_call_operand.vmem [shape: f32[3,1,16], index: 15, kind: input, shape index: {}]   ;;  %s3223_s16 = inlined_call_operand.vmem [shape: f32[32,16], index: 16, kind: input, shape index: {}]   ;;  %s3224_s17 = inlined_call_operand.vmem [shape: f32[1,16], index: 17, kind: input, shape index: {}]   ;;  %s3225_s18 = inlined_call_operand.vmem [shape: f32[32,16], index: 18, kind: input, shape index: {}]   ;;  %s3226_s19 = inlined_call_operand.vmem [shape: f32[1,16], index: 19, kind: input, shape index: {}]   ;;  %s3227_s20 = inlined_call_operand.vmem [shape: f32[16,16], index: 20, kind: input, shape index: {}]   ;;  %s3228_s21 = inlined_call_operand.vmem [shape: f32[1,16], index: 21, kind: input, shape index: {}]   ;;  %s3229_s22 = inlined_call_operand.vmem [shape: f32[2,16,16], index: 22, kind: output, shape index: {}]  }
   0x1   :  { %3236 = sst [smem:[#allocation8_spill]] %s3207_s0  ;;  %s2762_s30 = smov 0  }
   0x2   :  { %3237 = sst [smem:[#allocation9_spill]] %s3208_s1 }
   0x3   :  { %3238 = sst [smem:[#allocation10_spill]] %s3209_s2 }
   0x4   :  { %3239 = sst [smem:[#allocation11_spill]] %s3210_s3  ;;  %s2756_s3 = smov 0  }
   0x5   :  { %3240 = sst [smem:[#allocation12_spill]] %s3211_s4  ;;  %s2764_s4 = smov 0  }
   0x6   :  { %3241 = sst [smem:[#allocation13_spill]] %s3212_s5 }
   0x7   :  { %3242 = sst [smem:[#allocation14_spill]] %s3213_s6 }
   0x8   :  { %3243 = sst [smem:[#allocation15_spill]] %s3219_s12 }
   0x9   :  { %3244 = sst [smem:[#allocation16_spill]] %s3221_s14 }
   0xa   :  { %3245 = sst [smem:[#allocation17_spill]] %s3223_s16 }
   0xb   :  { %3246 = sst [smem:[#allocation18_spill]] %s3224_s17 }
   0xc   :  { %3247 = sst [smem:[#allocation19_spill]] %s3225_s18 }
   0xd   :  { %3248 = sst [smem:[#allocation20_spill]] %s3226_s19 }
   0xe   :  { %3249 = sst [smem:[#allocation21_spill]] %s3227_s20 }
   0xf   :  { %3250 = sst [smem:[#allocation22_spill]] %s3228_s21 }
  0x10 LB: > { %3251 = sst [smem:[#allocation3_spill]] %s2621_s29  ;;  %s41_s0 = sadd.s32 1, %s2621_s29  ;;  %s2629_s4 = sphi %s2764_s4, %s32_s4   ;;  %s2625_s30 = sphi %s2762_s30, %s3287_s30   ;;  %s2621_s29 = sphi %s2760_s29, %s3286_s29   ;;  %s2617_s28 = sphi %s2758_s28, %s3285_s28   ;;  %s2613_s3 = sphi %s2756_s3, %s3284_s3  }
  0x11   : > { %3252 = sst [smem:[#allocation4_spill]] %s2625_s30  ;;  %s44_s23 = sadd.s32 1, %s2625_s30 }
  0x12   : > { %3253 = sst [smem:[#allocation5_spill]] %s2629_s4  ;;  %p42_p0 = scmp.ge.s32.totalorder %s41_s0, 3 }
  0x13   : > { %p2333_p1 = scmp.ge.s32.totalorder %s2629_s4, 1  ;;  %p760_p2 = scmp.lt.s32.totalorder %s2629_s4, 7 }
  0x14   : > { %s3289_s0 = smov (%p42_p0, %s41_s0), 0  ;;  %s3291_s23 = smov (!%p42_p0, %s44_s23), %s2625_s30 }
  0x15   : > { %3254 = sst [smem:[#allocation6_spill]] %s3289_s0  ;;  %p761_p3 = pnand %p2333_p1, %p760_p2 }
  0x16   : > { %p46_p4 = scmp.ge.s32.totalorder %s3291_s23, 2  ;;  %p881_p5 = scmp.lt.s32.totalorder (!%p761_p3), %s2613_s3, 2 }
  0x17   : > { %764 = sbr.rel (%p761_p3) target bundleno = 2637 (0xa4d), region = 108  ;;  %p883_p6 = scmp.lt.s32.totalorder (!%p761_p3), %s2617_s28, 1 }
  0x18   : > { %s3293_s23 = smov (%p46_p4, %s3291_s23), 0  ;;  %s3256_s26 = sld [smem:[#allocation10_spill]] (!%p761_p3) }
  0x19   : > { %3255 = sst [smem:[#allocation7_spill]] %s3293_s23  ;;  %p2350_p7 = scmp.ne.s32.totalorder (!%p761_p3), %s2613_s3, 0 }
  0x1a   : > { %s3257_s0 = sld [smem:[#allocation12_spill]] (!%p761_p3) }
  0x1b   : > { %s3259_s18 = sld [smem:[#allocation14_spill]] (!%p761_p3) }
  0x1c   : > { %s2790_s1 = scalar_select %p881_p5, %s2613_s3, 2  ;;  %vm961_vm0 = vcmask 261120  }
  0x1d   : > { %s3295_s28 = smov (!%p883_p6, %s2617_s28), 1  ;;  %s3260_s12 = sld [smem:[#allocation15_spill]] }
  0x1e   : > { %s2416_s5 = sshll.u32 %s2790_s1, 5  ;;  %s2417_s24 = sshll.u32 %s2790_s1, 4 }
  0x1f   : > { %s897_s2 = scalar_lea.vmem %s3256_s26, %s2416_s5  ;;  %s2420_s19 = sshll.u32 %s2790_s1, 6 }
  0x20   : > { %s2802_s30 = scalar_lea.vmem %s3257_s0, %s2417_s24  ;;  %v956_v0 = vld [vmem:[%s897_s2 + $0x18] sm:$0xff]  ;;  %v955_v1 = vld [vmem:[%s897_s2 + $0x10] sm:$0xff]  ;;  %v954_v2 = vld [vmem:[%s897_s2 + $0x8] sm:$0xff]  ;;  %s3261_s14 = sld [smem:[#allocation16_spill]] }
  0x21   : > { %s2811_s16 = scalar_lea.vmem %s3259_s18, %s2417_s24  ;;  %2423 = vmatpush.msra.mxu2 %v956_v0  ;;  %983 = vmatpush.msra.mxu0 %v956_v0  ;;  %v953_v3 = vld [vmem:[%s897_s2] sm:$0xff]  ;;  %s2432_s5 = smul.u32 3, %s3295_s28 }
  0x22   : > { %2422 = vmatpush.msra.mxu1 %v956_v0  ;;  %s2433_s2 = smul.u32 6, %s2790_s1  ;;  %s2421_s18 = sshll.u32 %s3295_s28, 4 }
  0x23   : > { %s2836_s26 = scalar_lea.vmem %s3260_s12, %s2417_s24  ;;  %2425 = vmatpush.msra.mxu2 %v955_v1  ;;  %984 = vmatpush.msra.mxu0 %v955_v1  ;;  %s3263_s0 = sld [smem:[#allocation11_spill]] }
  0x24   : > { %2424 = vmatpush.msra.mxu1 %v955_v1  ;;  %s887_s12 = sadd.s32 %s2433_s2, %s2432_s5  ;;  %s3264_s21 = sld [smem:[#allocation8_spill]] }
  0x25   : > { %2427 = vmatpush.msra.mxu2 %v954_v2  ;;  %985 = vmatpush.msra.mxu0 %v954_v2  ;;  %s3265_s20 = sld [smem:[#allocation17_spill]] (!%p2350_p7) }
  0x26   : > { %s2846_s6 = scalar_lea.vmem %s3261_s14, %s2420_s19  ;;  %2426 = vmatpush.msra.mxu1 %v954_v2  ;;  %s2862_s19 = scalar_lea.vmem %s3229_s22, %s2421_s18 }
  0x27   : > { %2429 = vmatpush.msra.mxu2 %v953_v3  ;;  %986 = vmatpush.msra.mxu0 %v953_v3  ;;  %s2334_s14 = sshll.u32 %s887_s12, 3  ;;  %s3266_s2 = sld [smem:[#allocation19_spill]] (!%p2350_p7) }
  0x28   : > { %2428 = vmatpush.msra.mxu1 %v953_v3 }
  0x29   : > { %s900_s24 = scalar_lea.vmem %s3263_s0, %s2790_s1  ;;  %s3269_s0 = sld [smem:[#allocation18_spill]] (!%p2350_p7) }
  0x2a   : > { %s889_s29 = scalar_lea.vmem %s3264_s21, %s2334_s14  ;;  %v2484_v7 = vld [vmem:[%s900_s24] ss:$0 sm:$0xff]  ;;  %s3267_s24 = sld [smem:[#allocation9_spill]] (!%p2350_p7) }
  0x2b   : > { %v952_v4 = vld [vmem:[%s889_s29 + $0x10] sm:$0x1]  ;;  %v950_v5 = vld [vmem:[%s889_s29] sm:$0xff]  ;;  %v951_v6 = vld [vmem:[%s889_s29 + $0x8] sm:$0xff]  ;;  %s3270_s21 = sld [smem:[#allocation20_spill]] (!%p2350_p7) }
  0x2c   : > { %2349 = vmatmul.msk.f32.vlgmr.msra.gmra.mxu2 %vm961_vm0, %v952_v4  ;;  %2347 = vmatmul.msk.f32.vlgmr.msra.gmra.mxu0 %vm961_vm0, %v950_v5 }
  0x2d   : > { %2348 = vmatmul.msk.f32.vlgmr.msra.gmra.mxu1 %vm961_vm0, %v951_v6 }
  0x30   : > { %s3268_s4 = scalar_lea.vmem (!%p2350_p7), %s3267_s24, %s3295_s28 }
  0xa9   : > { %v988_v8 = vpop.f32.mrf.mxu0 }
  0xaa   : > { %v989_v9 = vadd.f32 %v2484_v7, %v988_v8  ;;  %v991_v10 = vpop.f32.mrf.mxu1 }
  0xab   : > { %v992_v11 = vadd.f32 %v2484_v7, %v991_v10 }
  0xac   : > { %1000 = sbr.rel (%p2350_p7) target bundleno = 322 (0x142), region = 112 }
  0xaf   : > { %v994_v12 = vpop.f32.mrf.mxu2 }
  0xb0   : > { %v995_v13 = vadd.f32 %v2484_v7, %v994_v12 }
  0xb1   : > { %v1005_v14 = vld [vmem:[%s3265_s20 + $0x18] sm:$0xff]  ;;  %v1004_v15 = vld [vmem:[%s3265_s20 + $0x10] sm:$0xff]  ;;  %v1003_v18 = vld [vmem:[%s3265_s20 + $0x8] sm:$0xff]  ;;  %vm1063_vm1 = vcmask 130048   ;;  %vm1066_vm2 = vcmask 122880  }
  0xb2   : > { %v1033_v16 = vld [vmem:[%s3266_s2 + $0x18] sm:$0xff]  ;;  %1022 = vmatpush.msra.mxu0 %v1005_v14  ;;  %v1032_v17 = vld [vmem:[%s3266_s2 + $0x10] sm:$0xff]  ;;  %v1031_v19 = vld [vmem:[%s3266_s2 + $0x8] sm:$0xff] }
  0xb3   : > { %1047 = vmatpush.msra.mxu1 %v1033_v16  ;;  %v1002_v20 = vld [vmem:[%s3265_s20] sm:$0xff] }
  0xb4   : > { %1023 = vmatpush.msra.mxu0 %v1004_v15  ;;  %v1030_v21 = vld [vmem:[%s3266_s2] sm:$0xff] }
  0xb5   : > { %1048 = vmatpush.msra.mxu1 %v1032_v17  ;;  %v1001_v22 = vld [vmem:[%s3268_s4] sm:$0x1] }
  0xb6   : > { %1024 = vmatpush.msra.mxu0 %v1003_v18  ;;  %v1006_v23 = vld [vmem:[%s3269_s0] sm:$0x1] }
  0xb7   : > { %1049 = vmatpush.msra.mxu1 %v1031_v19  ;;  %v1034_v24 = vld [vmem:[%s3270_s21] sm:$0x1] }
  0xb8   : > { %1025 = vmatpush.msra.mxu0 %v1002_v20 }
  0xb9   : > { %1050 = vmatpush.msra.mxu1 %v1030_v21  ;;  %2351 = vmatmul.msk.f32.vlgmr.msra.gmra.mxu0 %vm961_vm0, %v1001_v22 }
  0xba   : > { %2352 = vmatmul.msk.f32.vlgmr.msra.gmra.mxu1 %vm961_vm0, %v1001_v22 }
 0x136   : > { %v1027_v25 = vpop.f32.mrf.mxu0 }
 0x137   : > { %v1052_v26 = vpop.f32.mrf.mxu1  ;;  %v1028_v27 = vadd.f32 %v1027_v25, %v1006_v23 }
 0x138   : > { %v1053_v28 = vadd.f32 %v1052_v26, %v1034_v24 }
 0x139   : > { %v1055_v29 = vperm.slane %v1028_v27, 0 }
 0x13a   : > { %v1059_v30 = vperm.slane %v1053_v28, 0 }
 0x13b   : > { %v1056_v31 = vmul.f32 %v1055_v29, %v989_v9  ;;  %v1057_v32 = vmul.f32 %v1055_v29, %v992_v11  ;;  %v1058_v33 = vmul.f32 %v1055_v29, %v995_v13 }
 0x13d   : > { %v1060_v34 = vadd.f32 %v1059_v30, %v1056_v31  ;;  %v1061_v35 = vadd.f32 %v1059_v30, %v1057_v32  ;;  %v1062_v36 = vadd.f32 %v1059_v30, %v1058_v33 }
 0x13f   : > { %1064 = vst.msk [vmem:[#allocation2] sm:$0xff] %vm1063_vm1, %v1060_v34 }
 0x140   : > { %1065 = vst.msk [vmem:[#allocation2 + $0x8] sm:$0xff] %vm1063_vm1, %v1061_v35 }
 0x141   : > { %1067 = vst.msk [vmem:[#allocation2 + $0x10] sm:$0x1] %vm1066_vm2, %v1062_v36 }
 0x142 PF: > { %p2353_p8 = scmp.eq.s32.totalorder %s2613_s3, 0 }
 0x144   : > { %1071 = sbr.rel (%p2353_p8) target bundleno = 335 (0x14f), region = 116 }
 0x149   : > { %v1072_v37 = vld [vmem:[#allocation2] sm:$0xff]  ;;  %vm1078_vm3 = vcmask 130048   ;;  %v1073_v38 = vld [vmem:[#allocation2 + $0x8] sm:$0xff]  ;;  %v1074_v39 = vld [vmem:[#allocation2 + $0x10] sm:$0x1]  ;;  %vm1081_vm4 = vcmask 122880  }
 0x14a   : > { %v1075_v40 = vadd.f32 %v1072_v37, %v989_v9  ;;  %v1076_v41 = vadd.f32 %v1073_v38, %v992_v11  ;;  %v1077_v42 = vadd.f32 %v1074_v39, %v995_v13 }
 0x14c   : > { %1079 = vst.msk [vmem:[#allocation2] sm:$0xff] %vm1078_vm3, %v1075_v40 }
 0x14d   : > { %1080 = vst.msk [vmem:[#allocation2 + $0x8] sm:$0xff] %vm1078_vm3, %v1076_v41 }
 0x14e   : > { %1082 = vst.msk [vmem:[#allocation2 + $0x10] sm:$0x1] %vm1081_vm4, %v1077_v42 }
 0x14f PF: > { %v1084_v43 = vld [vmem:[%s2802_s30 + $0x8] sm:$0xff]  ;;  %v1083_v44 = vld [vmem:[%s2802_s30] sm:$0xff]  ;;  %vm1111_vm5 = vcmask 130048   ;;  %s3271_s30 = sld [smem:[#allocation13_spill]]  ;;  %s2631_s14 = smov 108   ;;  %vm1182_vm6 = vcmask 31744  }
 0x150   : > { %1135 = vmatpush.msra.mxu0 %v1084_v43  ;;  %v1087_v46 = vld [vmem:[%s2811_s16 + $0x8] sm:$0xff]  ;;  %v1086_v47 = vld [vmem:[%s2811_s16] sm:$0xff]  ;;  %s2632_s5 = smov 124   ;;  %s2633_s18 = smov 112   ;;  %vm1365_vm7 = vcmask 1040384   ;;  %vm1224_vm8 = vcmask 138240  }
 0x151   : > { %1161 = vmatpush.msra.mxu1 %v1087_v46  ;;  %s2634_s29 = smov 104   ;;  %vm1231_vm9 = vcmask 131072   ;;  %s2635_s24 = smov 100   ;;  %vm1714_vm10 = vcmask 122880  }
 0x152   : > { %1136 = vmatpush.msra.mxu0 %v1083_v44  ;;  %s2636_s4 = smov 120   ;;  %s2637_s27 = smov 116  }
 0x153   : > { %v2915_v45 = vld [vmem:[#allocation2] sm:$0xff]  ;;  %1162 = vmatpush.msra.mxu1 %v1086_v47  ;;  %s2638_s23 = smov 96   ;;  %s2639_s0 = smov 80  }
 0x154   : > { %2354 = vmatmul.msk.f32.vlgmr.msra.gmra.mxu0 %vm1111_vm5, %v2915_v45  ;;  %2357 = vmatmul.msk.f32.vlgmr.msra.gmra.mxu1 %vm1111_vm5, %v2915_v45  ;;  %v2923_v48 = vld [vmem:[#allocation2 + $0x8] sm:$0xff]  ;;  %s3273_s21 = scalar_lea.vmem %s3214_s7, %s2790_s1  ;;  %p2409_p9 = scmp.ne.s32.totalorder %s2613_s3, 2 }
 0x155   : > { %v2929_v49 = vld [vmem:[#allocation2 + $0x10] sm:$0x1]  ;;  %s3272_s12 = scalar_lea.vmem %s3271_s30, %s2790_s1  ;;  %s3280_s28 = sld [smem:[#allocation21_spill]] (!%p2409_p9) }
 0x156   : > { %v2500_v50 = vld [vmem:[%s3272_s12] ss:$0 sm:$0xff] }
 0x15c   : > { %2355 = vmatmul.msk.f32.gmra.mxu0 %vm1111_vm5, %v2923_v48  ;;  %2358 = vmatmul.msk.f32.gmra.mxu1 %vm1111_vm5, %v2923_v48 }
 0x164   : > { %2356 = vmatmul.msk.f32.gmra.mxu0 %vm1111_vm5, %v2929_v49  ;;  %2359 = vmatmul.msk.f32.gmra.mxu1 %vm1111_vm5, %v2929_v49 }
 0x1d1   : > { %v1138_v51 = vpop.f32.mrf.mxu0  ;;  %v1164_v53 = vpop.f32.mrf.mxu1 }
 0x1d2   : > { %v2940_v52 = vadd.f32 %v2500_v50, %v1138_v51 }
 0x1d4   : > { %1265 = vrot.lane.b32.xlu1 %v2940_v52, %s2631_s14 }
 0x1d9   : > { %v1141_v54 = vpop.f32.mrf.mxu0  ;;  %v1167_v56 = vpop.f32.mrf.mxu1 }
 0x1da   : > { %v2943_v55 = vadd.f32 %v2500_v50, %v1141_v54  ;;  %v2954_v60 = vpack.i.bf16 %v1164_v53, %v1167_v56 }
 0x1dc   : > { %1261 = vrot.lane.b32.xlu2 %v2943_v55, %s2632_s5  ;;  %1259 = vrot.lane.b32.xlu1 %v2940_v52, %s2632_s5 }
 0x1e1   : > { %v1144_v57 = vpop.f32.mrf.mxu0  ;;  %v2952_v59 = vpop.f32.mrf.mxu1 }
 0x1e2   : > { %v2947_v58 = vadd.f32 %v2500_v50, %v1144_v57  ;;  %2376 = vmatpush.msk.msrb.mxu1 %vm1365_vm7, %v2952_v59 }
 0x1e4   : > { %1269 = vrot.lane.b32.xlu0 %v2947_v58, %s2631_s14  ;;  %1263 = vrot.lane.b32.xlu2 %v2947_v58, %s2632_s5  ;;  %s3282_s5 = sld [smem:[#allocation22_spill]] (!%p2409_p9) }
 0x1e5   : > { %1176 = vrot.lane.b32.xlu1 %v2940_v52, %s2633_s18  ;;  %1419 = vmatpush.msrb.mxu1 %v1167_v56 }
 0x1e7   : > { %1420 = vmatpush.msrb.mxu1 %v1164_v53 }
 0x1ec   : > { %1352 = vrot.lane.b32.xlu2 %v2952_v59, %s2633_s18  ;;  %1267 = vrot.lane.b32.xlu0 %v2943_v55, %s2631_s14  ;;  %s3275_s14 = scalar_lea.vmem %s3216_s9, %s2790_s1 }
 0x1ed   : > { %2486 = vrot.lane.b32.xlu1 %v2954_v60, %s2633_s18 }
 0x1f4   : > { %1180 = vrot.lane.b32.xlu2 %v2947_v58, %s2633_s18  ;;  %1178 = vrot.lane.b32.xlu0 %v2943_v55, %s2633_s18 }
 0x1f5   : > { %1441 = vrot.lane.b32.xlu1 %v2947_v58, %s2634_s29 }
 0x236   : > { %v1262_v61 = vpop.permute.xlu2 %1261 }
 0x23e   : > { %v1264_v62 = vpop.permute.xlu2 %1263 }
 0x246   : > { %v1353_v63 = vpop.permute.xlu2 %1352  ;;  %v1266_v0 = vpop.permute.xlu1 %1265 }
 0x247   : > { %2372 = vmatpush.msk.msrb.mxu0 %vm1365_vm7, %v1353_v63 }
 0x24e   : > { %v1181_v1 = vpop.permute.xlu2 %1180  ;;  %v1260_v2 = vpop.permute.xlu1 %1259 }
 0x24f   : > { %2360 = vmatpush.xpose.msk.msra.mxu2 %vm1182_vm6, %v1181_v1 }
 0x256   : > { %v1270_v3 = vpop.permute.xlu0 %1269 }
 0x257   : > { %v1177_v4 = vpop.permute.xlu1 %1176  ;;  %2366 = vmatpush.xpose.msk.msra.mxu3 %vm1182_vm6, %v1270_v3 }
 0x25e   : > { %v1268_v5 = vpop.permute.xlu0 %1267 }
 0x25f   : > { %2367 = vmatpush.xpose.msk.msra.mxu3 %vm1182_vm6, %v1268_v5  ;;  %v2487_v6 = vpop.permute.xlu1 %2486 }
 0x260   : > { %v2488_v15 = vunpack.i.l.bf16 %v2487_v6  ;;  %v2489_v16 = vunpack.i.h.bf16 %v2487_v6 }
 0x262   : > { %1382 = vmatpush.msrb.mxu0 %v2488_v15 }
 0x263   : > { %2368 = vmatpush.xpose.msk.msra.mxu3 %vm1182_vm6, %v1266_v0 }
 0x264   : > { %1383 = vmatpush.msrb.mxu0 %v2489_v16 }
 0x266   : > { %v1179_v7 = vpop.permute.xlu0 %1178  ;;  %2369 = vmatmul.msk.f32.vlgmr.msra.gmra.mxu3 %vm1182_vm6, %v1260_v2 }
 0x267   : > { %2361 = vmatpush.xpose.msk.msra.mxu2 %vm1182_vm6, %v1179_v7  ;;  %v1442_v8 = vpop.permute.xlu1 %1441 }
 0x26b   : > { %2362 = vmatpush.xpose.msk.msra.mxu2 %vm1182_vm6, %v1177_v4 }
 0x26e   : > { %2363 = vmatmul.msk.f32.vlgmr.msra.gmra.mxu2 %vm1182_vm6, %v2940_v52  ;;  %2370 = vmatmul.msk.f32.gmra.mxu3 %vm1182_vm6, %v1262_v61 }
 0x26f   : > { %2380 = vmatpush.xpose.msk.msrb.mxu2 %vm1182_vm6, %v1442_v8 }
 0x276   : > { %2364 = vmatmul.msk.f32.gmra.mxu2 %vm1182_vm6, %v2943_v55  ;;  %2371 = vmatmul.msk.f32.gmra.mxu3 %vm1182_vm6, %v1264_v62 }
 0x27e   : > { %2365 = vmatmul.msk.f32.gmra.mxu2 %vm1182_vm6, %v2947_v58 }
 0x2e9   : > { %v1300_v9 = vpop.f32.mrf.mxu3 }
 0x2ea   : > { %v1309_v10 = vmul.f32 0.5, %v1300_v9 }
 0x2ec   : > { %v1312_v11 = vsel %vm1224_vm8, %v1309_v10, -inf }
 0x2ed   : > { %1313 = vmax.xlane.f32.xlu0 %v1312_v11 }
 0x2f1   : > { %v1303_v12 = vpop.f32.mrf.mxu3  ;;  %v1212_v40 = vpop.f32.mrf.mxu2 }
 0x2f2   : > { %v1310_v13 = vmul.f32 0.5, %v1303_v12  ;;  %v3012_v41 = vmul.f32 0.5, %v1212_v40 }
 0x2f4   : > { %v1315_v14 = vsel %vm1224_vm8, %v1310_v13, -inf  ;;  %v1225_v42 = vsel %vm1224_vm8, %v3012_v41, -inf }
 0x2f5   : > { %1316 = vmax.xlane.f32.xlu1 %v1315_v14 }
 0x2f9   : > { %v1306_v17 = vpop.f32.mrf.mxu3  ;;  %v1215_v43 = vpop.f32.mrf.mxu2 }
 0x2fa   : > { %v1311_v18 = vmul.f32 0.5, %v1306_v17  ;;  %v1222_v44 = vmul.f32 0.5, %v1215_v43 }
 0x2fc   : > { %v1318_v19 = vsel %vm1231_vm9, %v1311_v18, -inf  ;;  %v1228_v47 = vsel %vm1224_vm8, %v1222_v44, -inf }
 0x2fd   : > { %1319 = vmax.xlane.f32.xlu2 %v1318_v19 }
 0x301   : > { %1437 = vrot.lane.b32.xlu0 %v2940_v52, %s2634_s29  ;;  %v1218_v46 = vpop.f32.mrf.mxu2 }
 0x302   : > { %v1223_v50 = vmul.f32 0.5, %v1218_v46 }
 0x304   : > { %v1232_v51 = vsel %vm1231_vm9, %v1223_v50, -inf }
 0x309   : > { %1575 = vrot.lane.b32.xlu0 %v2947_v58, %s2635_s24 }
 0x30e   : > { %1439 = vrot.lane.b32.xlu1 %v2943_v55, %s2634_s29  ;;  %s3276_s29 = scalar_lea.vmem %s3220_s13, %s2790_s1 }
 0x311   : > { %1573 = vrot.lane.b32.xlu0 %v2943_v55, %s2635_s24 }
 0x315   : > { %1431 = vrot.lane.b32.xlu2 %v2940_v52, %s2636_s4 }
 0x360   : > { %v1314_v20 = vpop.xlane.xlu0 %1313 }
 0x361   : > { %v1321_v21 = vsub.f32 %v1309_v10, %v1314_v20 }
 0x363   : > { %v1324_v22 = vmul.f32 1.442695, %v1321_v21 }
 0x365   : > { %2508 = vpow2.f32 %v1324_v22 }
 0x368   : > { %v1317_v23 = vpop.xlane.xlu1 %1316 }
 0x369   : > { %v1322_v24 = vsub.f32 %v1310_v13, %v1317_v23 }
 0x36b   : > { %v2509_v25 = vpop.eup %2508  ;;  %v1326_v26 = vmul.f32 1.442695, %v1322_v24 }
 0x36c   : > { %v1330_v27 = vsel %vm1224_vm8, %v2509_v25, 0.0 }
 0x36d   : > { %2510 = vpow2.f32 %v1326_v26  ;;  %1331 = vadd.xlane.f32.xlu0 %v1330_v27 }
 0x370   : > { %v1320_v28 = vpop.xlane.xlu2 %1319 }
 0x371   : > { %v1323_v29 = vsub.f32 %v1311_v18, %v1320_v28 }
 0x373   : > { %v2511_v30 = vpop.eup %2510  ;;  %v1328_v31 = vmul.f32 1.442695, %v1323_v29  ;;  %v1438_v32 = vpop.permute.xlu0 %1437 }
 0x374   : > { %v1333_v33 = vsel %vm1224_vm8, %v2511_v30, 0.0 }
 0x375   : > { %2512 = vpow2.f32 %v1328_v31  ;;  %1334 = vadd.xlane.f32.xlu2 %v1333_v33 }
 0x378   : > { %v1432_v39 = vpop.permute.xlu2 %1431 }
 0x37b   : > { %v2513_v34 = vpop.eup %2512  ;;  %v1576_v35 = vpop.permute.xlu0 %1575 }
 0x37c   : > { %2390 = vmatpush.xpose.msk.msra.mxu0 %vm1182_vm6, %v1576_v35  ;;  %v1336_v36 = vsel %vm1231_vm9, %v2513_v34, 0.0 }
 0x37d   : > { %1337 = vadd.xlane.f32.xlu1 %v1336_v36 }
 0x380   : > { %v1440_v37 = vpop.permute.xlu1 %1439 }
 0x381   : > { %1565 = vrot.lane.b32.xlu0 %v2940_v52, %s2637_s27  ;;  %2381 = vmatpush.xpose.msk.msrb.mxu2 %vm1182_vm6, %v1440_v37 }
 0x383   : > { %v1574_v38 = vpop.permute.xlu0 %1573 }
 0x384   : > { %2391 = vmatpush.xpose.msk.msra.mxu0 %vm1182_vm6, %v1574_v38 }
 0x385   : > { %2382 = vmatpush.xpose.msk.msrb.mxu2 %vm1182_vm6, %v1438_v32 }
 0x388   : > { %2383 = vmatmul.msk.f32.vlgmr.msrb.gmra.mxu2 %vm1182_vm6, %v1432_v39 }
 0x389   : > { %1567 = vrot.lane.b32.xlu0 %v2943_v55, %s2637_s27 }
 0x38d   : > { %1571 = vrot.lane.b32.xlu2 %v2940_v52, %s2635_s24 }
 0x395   : > { %1435 = vrot.lane.b32.xlu2 %v2947_v58, %s2636_s4 }
 0x396   : > { %1433 = vrot.lane.b32.xlu1 %v2943_v55, %s2636_s4  ;;  %s3277_s4 = scalar_lea.vmem %s3222_s15, %s2790_s1 }
 0x39d   : > { %1569 = vrot.lane.b32.xlu2 %v2947_v58, %s2637_s27 }
 0x3b3   : > { %1226 = vmax.xlane.f32.xlu0 %v1225_v42 }
 0x3c0   : > { %1229 = vmax.xlane.f32.xlu1 %v1228_v47 }
 0x3c6   : > { %1233 = vmax.xlane.f32.xlu2 %v1232_v51 }
 0x3e0   : > { %v1332_v52 = vpop.xlane.xlu0 %1331 }
 0x3e1   : > { %2514 = vrcp.f32 %v1332_v52 }
 0x3e7   : > { %v2515_v53 = vpop.eup %2514 }
 0x3e8   : > { %v1335_v54 = vpop.xlane.xlu2 %1334  ;;  %v1342_v55 = vmul.f32 %v2515_v53, %v2509_v25 }
 0x3e9   : > { %2516 = vrcp.f32 %v1335_v54 }
 0x3ea   : > { %2373 = vmatmul.msk.f32.vlgmr.msrb.gmra.mxu0 %vm1224_vm8, %v1342_v55 }
 0x3ef   : > { %v2517_v56 = vpop.eup %2516 }
 0x3f0   : > { %v1572_v57 = vpop.permute.xlu2 %1571  ;;  %v1338_v58 = vpop.xlane.xlu1 %1337  ;;  %v1343_v61 = vmul.f32 %v2517_v56, %v2511_v30 }
 0x3f1   : > { %2518 = vrcp.f32 %v1338_v58  ;;  %2392 = vmatpush.xpose.msk.msra.mxu0 %vm1182_vm6, %v1572_v57 }
 0x3f2   : > { %2374 = vmatmul.msk.f32.gmra.mxu0 %vm1224_vm8, %v1343_v61 }
 0x3f3   : > { %v1566_v0 = vpop.permute.xlu0 %1565 }
 0x3f7   : > { %v2519_v62 = vpop.eup %2518 }
 0x3f8   : > { %v1344_v63 = vmul.f32 %v2519_v62, %v2513_v34  ;;  %v1436_v1 = vpop.permute.xlu2 %1435 }
 0x3fa   : > { %2375 = vmatmul.msk.f32.gmra.mxu0 %vm1224_vm8, %v1344_v63 }
 0x3fb   : > { %v1568_v3 = vpop.permute.xlu0 %1567 }
 0x400   : > { %v1570_v7 = vpop.permute.xlu2 %1569 }
 0x402   : > { %2393 = vmatmul.msk.f32.vlgmr.msra.gmra.mxu0 %vm1182_vm6, %v1566_v0 }
 0x408   : > { %v1434_v2 = vpop.permute.xlu1 %1433 }
 0x409   : > { %2384 = vmatmul.msk.f32.gmra.mxu2 %vm1182_vm6, %v1434_v2 }
 0x40a   : > { %2394 = vmatmul.msk.f32.gmra.mxu0 %vm1182_vm6, %v1568_v3 }
 0x40b   : > { %v1472_v4 = vpop.f32.mrf.mxu2 }
 0x40c   : > { %v1481_v5 = vmul.f32 0.5, %v1472_v4 }
 0x40e   : > { %v1484_v6 = vsel %vm1224_vm8, %v1481_v5, -inf }
 0x40f   : > { %1485 = vmax.xlane.f32.xlu0 %v1484_v6 }
 0x411   : > { %2385 = vmatmul.msk.f32.gmra.mxu2 %vm1182_vm6, %v1436_v1 }
 0x412   : > { %2395 = vmatmul.msk.f32.gmra.mxu0 %vm1182_vm6, %v1570_v7 }
 0x426   : > { %v1227_v23 = vpop.xlane.xlu0 %1226 }
 0x427   : > { %v1235_v26 = vsub.f32 %v3012_v41, %v1227_v23 }
 0x429   : > { %v1238_v30 = vmul.f32 1.442695, %v1235_v26 }
 0x433   : > { %v1230_v19 = vpop.xlane.xlu1 %1229 }
 0x434   : > { %v1236_v20 = vsub.f32 %v1222_v44, %v1230_v19 }
 0x436   : > { %v1240_v22 = vmul.f32 1.442695, %v1236_v20 }
 0x439   : > { %v1234_v8 = vpop.xlane.xlu2 %1233 }
 0x43a   : > { %v1237_v9 = vsub.f32 %v1223_v50, %v1234_v8 }
 0x43c   : > { %v1242_v10 = vmul.f32 1.442695, %v1237_v9 }
 0x43e   : > { %2520 = vpow2.f32 %v1242_v10 }
 0x43f   : > { %2522 = vpow2.f32 %v1240_v22 }
 0x440   : > { %2524 = vpow2.f32 %v1238_v30 }
 0x444   : > { %v3028_v11 = vpop.eup %2520 }
 0x445   : > { %v1250_v12 = vsel %vm1231_vm9, %v3028_v11, 0.0  ;;  %v2523_v33 = vpop.eup %2522 }
 0x446   : > { %1251 = vadd.xlane.f32.xlu2 %v1250_v12  ;;  %v1247_v38 = vsel %vm1224_vm8, %v2523_v33, 0.0  ;;  %v2525_v40 = vpop.eup %2524 }
 0x447   : > { %v1244_v41 = vsel %vm1224_vm8, %v2525_v40, 0.0 }
 0x467   : > { %v3032_v13 = vpop.f32.mrf.mxu0 }
 0x46f   : > { %v3034_v14 = vpop.f32.mrf.mxu0 }
 0x477   : > { %v3036_v15 = vpop.f32.mrf.mxu0 }
 0x47f   : > { %v1606_v16 = vpop.f32.mrf.mxu0 }
 0x480   : > { %v1615_v17 = vmul.f32 0.5, %v1606_v16 }
 0x482   : > { %v1618_v18 = vsel %vm1224_vm8, %v1615_v17, -inf  ;;  %v1486_v32 = vpop.xlane.xlu0 %1485 }
 0x483   : > { %1619 = vmax.xlane.f32.xlu2 %v1618_v18  ;;  %v1493_v36 = vsub.f32 %v1481_v5, %v1486_v32 }
 0x485   : > { %v1496_v39 = vmul.f32 1.442695, %v1493_v36 }
 0x487   : > { %v1609_v21 = vpop.f32.mrf.mxu0  ;;  %2526 = vpow2.f32 %v1496_v39 }
 0x488   : > { %v1616_v44 = vmul.f32 0.5, %v1609_v21 }
 0x48a   : > { %v1621_v46 = vsel %vm1224_vm8, %v1616_v44, -inf }
 0x48c   : > { %v1475_v24 = vpop.f32.mrf.mxu2 }
 0x48d   : > { %v1482_v25 = vmul.f32 0.5, %v1475_v24  ;;  %v2527_v42 = vpop.eup %2526 }
 0x48e   : > { %v1502_v43 = vsel %vm1224_vm8, %v2527_v42, 0.0 }
 0x48f   : > { %v1612_v27 = vpop.f32.mrf.mxu0  ;;  %v1487_v28 = vsel %vm1224_vm8, %v1482_v25, -inf }
 0x490   : > { %v3041_v29 = vmul.f32 0.5, %v1612_v27  ;;  %1488 = vmax.xlane.f32.xlu1 %v1487_v28 }
 0x492   : > { %v1624_v31 = vsel %vm1231_vm9, %v3041_v29, -inf }
 0x493   : > { %1625 = vmax.xlane.f32.xlu2 %v1624_v31 }
 0x494   : > { %v1478_v34 = vpop.f32.mrf.mxu2 }
 0x495   : > { %v1483_v35 = vmul.f32 0.5, %v1478_v34 }
 0x497   : > { %v1490_v37 = vsel %vm1231_vm9, %v1483_v35, -inf }
 0x498   : > { %1491 = vmax.xlane.f32.xlu0 %v1490_v37  ;;  %1248 = vadd.xlane.f32.xlu1 %v1247_v38 }
 0x4a0   : > { %1245 = vadd.xlane.f32.xlu0 %v1244_v41 }
 0x4a8   : > { %1503 = vadd.xlane.f32.xlu0 %v1502_v43 }
 0x4ab   : > { %2491 = vrot.lane.b32.xlu2 %v2954_v60, %s2638_s23 }
 0x4b1   : > { %1521 = vrot.lane.b32.xlu1 %v2952_v59, %s2638_s23 }
 0x4b9   : > { %v1252_v47 = vpop.xlane.xlu2 %1251 }
 0x4db   : > { %1622 = vmax.xlane.f32.xlu1 %v1621_v46 }
 0x4f4   : > { %2496 = vrot.lane.b32.xlu1 %v2954_v60, %s2639_s0 }
 0x4f6   : > { %v1620_v50 = vpop.xlane.xlu2 %1619 }
 0x4f7   : > { %v1627_v53 = vsub.f32 %v1615_v17, %v1620_v50 }
 0x4f9   : > { %v1630_v55 = vmul.f32 1.442695, %v1627_v53 }
 0x503   : > { %v1489_v51 = vpop.xlane.xlu1 %1488 }
 0x504   : > { %v1494_v52 = vsub.f32 %v1482_v25, %v1489_v51 }
 0x506   : > { %v1498_v54 = vmul.f32 1.442695, %v1494_v52  ;;  %v1626_v1 = vpop.xlane.xlu2 %1625 }
 0x507   : > { %v1629_v22 = vsub.f32 %v3041_v29, %v1626_v1 }
 0x508   : > { %2528 = vpow2.f32 %v1498_v54 }
 0x509   : > { %2530 = vpow2.f32 %v1630_v55  ;;  %v1634_v23 = vmul.f32 1.442695, %v1629_v22 }
 0x50b   : > { %v1492_v56 = vpop.xlane.xlu0 %1491  ;;  %v1249_v2 = vpop.xlane.xlu1 %1248 }
 0x50c   : > { %v1495_v57 = vsub.f32 %v1483_v35, %v1492_v56 }
 0x50e   : > { %v2529_v58 = vpop.eup %2528  ;;  %v1500_v61 = vmul.f32 1.442695, %v1495_v57  ;;  %v2492_v9 = vpop.permute.xlu2 %2491  ;;  %v2501_v57 = vld [vmem:[%s3273_s21] ss:$0 sm:$0xff]  ;;  %s3279_s21 = scalar_lea.vmem %s3218_s11, %s2790_s1 }
 0x50f   : > { %v1505_v62 = vsel %vm1224_vm8, %v2529_v58, 0.0  ;;  %v3055_v0 = vpop.eup %2530  ;;  %v2493_v17 = vunpack.i.l.bf16 %v2492_v9  ;;  %v2494_v18 = vunpack.i.h.bf16 %v2492_v9 }
 0x510   : > { %2532 = vpow2.f32 %v1500_v61  ;;  %1506 = vadd.xlane.f32.xlu0 %v1505_v62  ;;  %v1636_v3 = vsel %vm1224_vm8, %v3055_v0, 0.0 }
 0x513   : > { %v1246_v63 = vpop.xlane.xlu0 %1245 }
 0x514   : > { %2534 = vrcp.f32 %v1246_v63 }
 0x515   : > { %2536 = vrcp.f32 %v1249_v2 }
 0x516   : > { %v2533_v60 = vpop.eup %2532 }
 0x517   : > { %v1508_v4 = vsel %vm1231_vm9, %v2533_v60, 0.0 }
 0x518   : > { %1637 = vadd.xlane.f32.xlu0 %v1636_v3  ;;  %1509 = vadd.xlane.f32.xlu2 %v1508_v4 }
 0x51a   : > { %v2535_v5 = vpop.eup %2534 }
 0x51b   : > { %v1504_v6 = vpop.xlane.xlu0 %1503  ;;  %v1256_v7 = vmul.f32 %v2535_v5, %v2525_v40  ;;  %v2537_v8 = vpop.eup %2536 }
 0x51c   : > { %2538 = vrcp.f32 %v1504_v6  ;;  %v1257_v12 = vmul.f32 %v2537_v8, %v2523_v33 }
 0x51d   : > { %2377 = vmatmul.msk.f32.vlgmr.msrb.gmra.mxu1 %vm1224_vm8, %v1256_v7  ;;  %2540 = vrcp.f32 %v1252_v47 }
 0x51e   : > { %2542 = vpow2.f32 %v1634_v23 }
 0x522   : > { %v2539_v16 = vpop.eup %2538 }
 0x523   : > { %v1522_v10 = vpop.permute.xlu1 %1521  ;;  %v1514_v19 = vmul.f32 %v2539_v16, %v2527_v42  ;;  %v2541_v20 = vpop.eup %2540 }
 0x524   : > { %2386 = vmatpush.msk.msrb.mxu3 %vm1365_vm7, %v1522_v10  ;;  %v1258_v21 = vmul.f32 %v2541_v20, %v3028_v11  ;;  %v2543_v27 = vpop.eup %2542 }
 0x525   : > { %2378 = vmatmul.msk.f32.gmra.mxu1 %vm1224_vm8, %v1257_v12  ;;  %v1642_v28 = vsel %vm1231_vm9, %v2543_v27, 0.0 }
 0x526   : > { %1550 = vmatpush.msrb.mxu3 %v2493_v17  ;;  %v2640_v17 = vmov 16.0  }
 0x528   : > { %1551 = vmatpush.msrb.mxu3 %v2494_v18 }
 0x529   : > { %2387 = vmatmul.msk.f32.vlgmr.msrb.gmra.mxu3 %vm1224_vm8, %v1514_v19 }
 0x52c   : > { %1655 = vrot.lane.b32.xlu0 %v2952_v59, %s2639_s0  ;;  %s3278_s0 = scalar_lea.vmem %s3217_s10, %s2790_s1 }
 0x52d   : > { %2379 = vmatmul.msk.f32.gmra.mxu1 %vm1224_vm8, %v1258_v21 }
 0x54e   : > { %v1623_v24 = vpop.xlane.xlu1 %1622 }
 0x54f   : > { %v1628_v25 = vsub.f32 %v1616_v44, %v1623_v24 }
 0x551   : > { %v1632_v26 = vmul.f32 1.442695, %v1628_v25 }
 0x553   : > { %2544 = vpow2.f32 %v1632_v26 }
 0x556   : > { %1643 = vadd.xlane.f32.xlu0 %v1642_v28 }
 0x559   : > { %v2545_v30 = vpop.eup %2544 }
 0x55a   : > { %v1639_v11 = vsel %vm1224_vm8, %v2545_v30, 0.0 }
 0x55b   : > { %1640 = vadd.xlane.f32.xlu1 %v1639_v11 }
 0x566   : > { %v2497_v36 = vpop.permute.xlu1 %2496 }
 0x567   : > { %v2498_v39 = vunpack.i.l.bf16 %v2497_v36  ;;  %v2499_v40 = vunpack.i.h.bf16 %v2497_v36 }
 0x583   : > { %v1507_v31 = vpop.xlane.xlu0 %1506 }
 0x584   : > { %2546 = vrcp.f32 %v1507_v31 }
 0x58a   : > { %v2547_v59 = vpop.eup %2546 }
 0x58b   : > { %v1510_v32 = vpop.xlane.xlu2 %1509  ;;  %v1515_v33 = vmul.f32 %v2547_v59, %v2529_v58  ;;  %v1638_v35 = vpop.xlane.xlu0 %1637 }
 0x58c   : > { %2548 = vrcp.f32 %v1510_v32 }
 0x58d   : > { %2388 = vmatmul.msk.f32.gmra.mxu3 %vm1224_vm8, %v1515_v33  ;;  %2550 = vrcp.f32 %v1638_v35  ;;  %v1093_v35 = vld [vmem:[%s2836_s26] sm:$0xff] }
 0x592   : > { %v2549_v29 = vpop.eup %2548 }
 0x593   : > { %v1516_v34 = vmul.f32 %v2549_v29, %v2533_v60  ;;  %v2551_v38 = vpop.eup %2550 }
 0x594   : > { %v1648_v41 = vmul.f32 %v2551_v38, %v3055_v0 }
 0x595   : > { %2389 = vmatmul.msk.f32.gmra.mxu3 %vm1224_vm8, %v1516_v34  ;;  %v1094_v34 = vld [vmem:[%s2836_s26 + $0x8] sm:$0xff]  ;;  %s3274_s26 = scalar_lea.vmem %s3215_s8, %s2790_s1 }
 0x596   : > { %1820 = vmatpush.msra.mxu2 %v1094_v34 }
 0x598   : > { %1821 = vmatpush.msra.mxu2 %v1093_v35 }
 0x59a   : > { %v1422_v51 = vpop.f32.mrf.mxu1 }
 0x59b   : > { %v1423_v55 = vadd.f32 %v1422_v51, %v3032_v13  ;;  %v2503_v51 = vld [vmem:[%s3275_s14] ss:$0 sm:$0xff] }
 0x59e   : > { %v1656_v37 = vpop.permute.xlu0 %1655 }
 0x59f   : > { %2396 = vmatpush.msk.msra.mxu1 %vm1365_vm7, %v1656_v37 }
 0x5a1   : > { %1684 = vmatpush.msra.mxu1 %v2498_v39 }
 0x5a2   : > { %v1425_v52 = vpop.f32.mrf.mxu1 }
 0x5a3   : > { %1685 = vmatpush.msra.mxu1 %v2499_v40  ;;  %v1426_v1 = vadd.f32 %v1425_v52, %v3034_v14 }
 0x5a4   : > { %2397 = vmatmul.msk.f32.vlgmr.msra.gmra.mxu1 %vm1224_vm8, %v1648_v41 }
 0x5aa   : > { %v1428_v53 = vpop.f32.mrf.mxu1 }
 0x5ab   : > { %v1429_v6 = vadd.f32 %v1428_v53, %v3036_v15 }
 0x5ac   : > { %v1553_v54 = vpop.f32.mrf.mxu3 }
 0x5ad   : > { %v1562_v56 = vadd.f32 %v1553_v54, %v1423_v55 }
 0x5c9   : > { %v1644_v43 = vpop.xlane.xlu0 %1643 }
 0x5ce   : > { %v1641_v42 = vpop.xlane.xlu1 %1640 }
 0x5cf   : > { %2552 = vrcp.f32 %v1641_v42 }
 0x5d0   : > { %2554 = vrcp.f32 %v1644_v43 }
 0x5d1   : > { %2556 = vrcp.f32 %v2640_v17 }
 0x5d5   : > { %v2553_v44 = vpop.eup %2552 }
 0x5d6   : > { %v1649_v46 = vmul.f32 %v2553_v44, %v2545_v30  ;;  %v2555_v47 = vpop.eup %2554 }
 0x5d7   : > { %v1650_v50 = vmul.f32 %v2555_v47, %v2543_v27  ;;  %v2557_v18 = vpop.eup %2556 }
 0x5d8   : > { %2398 = vmatmul.msk.f32.gmra.mxu1 %vm1224_vm8, %v1649_v46  ;;  %v1719_v19 = vmul.f32 16.0, %v2557_v18  ;;  %vm1723_vm11 = vweird.f32 %v2557_v18  ;;  %v2502_v46 = vld [vmem:[%s3274_s26] ss:$0 sm:$0xff]  ;;  %s3281_s26 = smov (!%p2409_p9), %s3280_s28 }
 0x5da   : > { %v1720_v15 = vsub.f32 1.0, %v1719_v19  ;;  %v1102_v19 = vld [vmem:[%s2846_s6 + $0x30] sm:$0xff] }
 0x5dc   : > { %v1721_v20 = vmul.f32 %v2557_v18, %v1720_v15  ;;  %v1101_v15 = vld [vmem:[%s2846_s6 + $0x28] sm:$0xff] }
 0x5e0   : > { %2399 = vmatmul.msk.f32.gmra.mxu1 %vm1224_vm8, %v1650_v50 }
 0x610   : > { %v1556_v60 = vpop.f32.mrf.mxu3 }
 0x611   : > { %v1563_v2 = vadd.f32 %v1556_v60, %v1426_v1 }
 0x618   : > { %v1559_v5 = vpop.f32.mrf.mxu3 }
 0x619   : > { %v1564_v8 = vadd.f32 %v1559_v5, %v1429_v6 }
 0x621   : > { %v1687_v58 = vpop.f32.mrf.mxu1 }
 0x622   : > { %v1696_v61 = vadd.f32 %v1687_v58, %v1562_v56 }
 0x624   : > { %v1702_v62 = vadd.f32 %v2501_v57, %v1696_v61 }
 0x626   : > { %v1705_v63 = vadd.f32 %v1702_v62, %v2915_v45 }
 0x628   : > { %v1708_v0 = vsel %vm1111_vm5, %v1705_v63, 0.0 }
 0x629   : > { %1709 = vadd.xlane.f32.xlu2 %v1708_v0 }
 0x655   : > { %v1690_v3 = vpop.f32.mrf.mxu1 }
 0x656   : > { %v1697_v13 = vadd.f32 %v1690_v3, %v1563_v2 }
 0x658   : > { %v1703_v4 = vadd.f32 %v2501_v57, %v1697_v13 }
 0x65a   : > { %v1706_v7 = vadd.f32 %v1703_v4, %v2923_v48  ;;  %v1722_v48 = vadd.f32 %v2557_v18, %v1721_v20  ;;  %v1100_v20 = vld [vmem:[%s2846_s6 + $0x20] sm:$0xff] }
 0x65c   : > { %v1711_v9 = vsel %vm1111_vm5, %v1706_v7, 0.0  ;;  %v3092_v21 = vsel %vm1723_vm11, %v2557_v18, %v1722_v48  ;;  %v1103_v18 = vld [vmem:[%s2846_s6 + $0x38] sm:$0xff]  ;;  %vm1898_vm11 = vcmask 523264  }
 0x65d   : > { %v1693_v10 = vpop.f32.mrf.mxu1  ;;  %1712 = vadd.xlane.f32.xlu1 %v1711_v9  ;;  %1916 = vmatpush.msra.mxu3 %v1103_v18  ;;  %v1099_v48 = vld [vmem:[%s2846_s6 + $0x18] sm:$0xff]  ;;  %v2505_v18 = vld [vmem:[%s3277_s4] ss:$0 sm:$0xff] }
 0x65e   : > { %v1698_v45 = vadd.f32 %v1693_v10, %v1564_v8 }
 0x65f   : > { %1917 = vmatpush.msra.mxu3 %v1102_v19 }
 0x660   : > { %v1704_v12 = vadd.f32 %v2501_v57, %v1698_v45 }
 0x661   : > { %1918 = vmatpush.msra.mxu3 %v1101_v15 }
 0x662   : > { %v1707_v16 = vadd.f32 %v1704_v12, %v2929_v49 }
 0x663   : > { %1919 = vmatpush.msra.mxu3 %v1100_v20 }
 0x664   : > { %v1715_v14 = vsel %vm1714_vm10, %v1707_v16, 0.0 }
 0x665   : > { %1716 = vadd.xlane.f32.xlu2 %v1715_v14  ;;  %1920 = vmatpush.msra.mxu3 %v1099_v48 }
 0x69c   : > { %v1710_v22 = vpop.xlane.xlu2 %1709 }
 0x69d   : > { %v1725_v23 = vmul.f32 %v3092_v21, %v1710_v22  ;;  %v2504_v22 = vld [vmem:[%s3276_s29] ss:$0 sm:$0xff] }
 0x69f   : > { %v1728_v24 = vsub.f32 %v1705_v63, %v1725_v23  ;;  %v1098_v23 = vld [vmem:[%s2846_s6 + $0x10] sm:$0xff] }
 0x6a0   : > { %1921 = vmatpush.msra.mxu3 %v1098_v23 }
 0x6a1   : > { %v1731_v25 = vmul.f32 %v1728_v24, %v1728_v24 }
 0x6a3   : > { %v1734_v49 = vsel %vm1111_vm5, %v1731_v25, 0.0  ;;  %v1097_v25 = vld [vmem:[%s2846_s6 + $0x8] sm:$0xff] }
 0x6a4   : > { %1735 = vadd.xlane.f32.xlu1 %v1734_v49  ;;  %1922 = vmatpush.msra.mxu3 %v1097_v25 }
 0x6d0   : > { %v1713_v26 = vpop.xlane.xlu1 %1712 }
 0x6d1   : > { %v1726_v27 = vmul.f32 %v3092_v21, %v1713_v26  ;;  %v1096_v26 = vld [vmem:[%s2846_s6] sm:$0xff] }
 0x6d2   : > { %1923 = vmatpush.msra.mxu3 %v1096_v26 }
 0x6d3   : > { %v1729_v28 = vsub.f32 %v1706_v7, %v1726_v27 }
 0x6d5   : > { %v1732_v30 = vmul.f32 %v1729_v28, %v1729_v28 }
 0x6d7   : > { %v1737_v11 = vsel %vm1111_vm5, %v1732_v30, 0.0 }
 0x6d8   : > { %1738 = vadd.xlane.f32.xlu0 %v1737_v11  ;;  %v1717_v31 = vpop.xlane.xlu2 %1716 }
 0x6d9   : > { %v1727_v59 = vmul.f32 %v3092_v21, %v1717_v31 }
 0x6db   : > { %v1730_v32 = vsub.f32 %v1707_v16, %v1727_v59 }
 0x6dd   : > { %v1733_v33 = vmul.f32 %v1730_v32, %v1730_v32 }
 0x6df   : > { %v1740_v29 = vsel %vm1714_vm10, %v1733_v33, 0.0 }
 0x6e0   : > { %1741 = vadd.xlane.f32.xlu2 %v1740_v29 }
 0x717   : > { %v1736_v36 = vpop.xlane.xlu1 %1735 }
 0x718   : > { %v1743_v37 = vmul.f32 %v1736_v36, %v3092_v21 }
 0x71a   : > { %v1746_v38 = vadd.f32 1e-05, %v1743_v37 }
 0x71c   : > { %2558 = vrsqrt.f32 %v1746_v38  ;;  %vm1755_vm13 = vweird.f32 %v1746_v38 }
 0x722   : > { %v2559_v39 = vpop.eup %2558 }
 0x723   : > { %v1750_v40 = vmul.f32 %v2559_v39, %v1746_v38  ;;  %vm1756_vm12 = vweird.f32 %v2559_v39 }
 0x724   : > { %vm1757_vm14 = vmor %vm1755_vm13, %vm1756_vm12 }
 0x725   : > { %v1751_v41 = vmul.f32 %v2559_v39, %v1750_v40 }
 0x727   : > { %v1752_v42 = vmul.f32 0.5, %v1751_v41 }
 0x729   : > { %v1753_v43 = vsub.f32 1.5, %v1752_v42 }
 0x72b   : > { %v1754_v44 = vmul.f32 %v2559_v39, %v1753_v43 }
 0x72d   : > { %v1758_v47 = vsel %vm1757_vm14, %v2559_v39, %v1754_v44 }
 0x72e   : > { %v1779_v50 = vmul.f32 %v1758_v47, %v1728_v24 }
 0x730   : > { %v1785_v52 = vmul.f32 %v2502_v46, %v1779_v50 }
 0x732   : > { %v3113_v53 = vadd.f32 %v2503_v51, %v1785_v52 }
 0x734   : > { %2400 = vmatmul.msk.f32.vlgmr.msra.gmra.mxu2 %vm1111_vm5, %v3113_v53 }
 0x74b   : > { %v1739_v54 = vpop.xlane.xlu0 %1738 }
 0x74c   : > { %v1744_v55 = vmul.f32 %v1739_v54, %v3092_v21 }
 0x74e   : > { %v1747_v56 = vadd.f32 1e-05, %v1744_v55 }
 0x750   : > { %2560 = vrsqrt.f32 %v1747_v56  ;;  %vm1765_vm0 = vweird.f32 %v1747_v56 }
 0x753   : > { %v1742_v57 = vpop.xlane.xlu2 %1741 }
 0x754   : > { %v1745_v58 = vmul.f32 %v1742_v57, %v3092_v21 }
 0x756   : > { %v2561_v61 = vpop.eup %2560  ;;  %v1748_v62 = vadd.f32 1e-05, %v1745_v58 }
 0x757   : > { %v1760_v63 = vmul.f32 %v2561_v61, %v1747_v56  ;;  %vm1766_vm15 = vweird.f32 %v2561_v61 }
 0x758   : > { %2562 = vrsqrt.f32 %v1748_v62  ;;  %vm1767_vm1 = vmor %vm1765_vm0, %vm1766_vm15  ;;  %vm1775_vm3 = vweird.f32 %v1748_v62 }
 0x759   : > { %v1761_v0 = vmul.f32 %v2561_v61, %v1760_v63 }
 0x75b   : > { %v1762_v60 = vmul.f32 0.5, %v1761_v0 }
 0x75d   : > { %v1763_v1 = vsub.f32 1.5, %v1762_v60 }
 0x75e   : > { %v2563_v2 = vpop.eup %2562 }
 0x75f   : > { %v1764_v3 = vmul.f32 %v2561_v61, %v1763_v1  ;;  %v1770_v13 = vmul.f32 %v2563_v2, %v1748_v62  ;;  %vm1776_vm2 = vweird.f32 %v2563_v2 }
 0x760   : > { %vm1777_vm4 = vmor %vm1775_vm3, %vm1776_vm2 }
 0x761   : > { %v1768_v4 = vsel %vm1767_vm1, %v2561_v61, %v1764_v3  ;;  %v1771_v5 = vmul.f32 %v2563_v2, %v1770_v13 }
 0x762   : > { %v1780_v6 = vmul.f32 %v1768_v4, %v1729_v28 }
 0x763   : > { %v1772_v7 = vmul.f32 0.5, %v1771_v5 }
 0x764   : > { %v1786_v8 = vmul.f32 %v2502_v46, %v1780_v6 }
 0x765   : > { %v1773_v9 = vsub.f32 1.5, %v1772_v7 }
 0x766   : > { %v3119_v10 = vadd.f32 %v2503_v51, %v1786_v8 }
 0x767   : > { %v1774_v45 = vmul.f32 %v2563_v2, %v1773_v9 }
 0x768   : > { %2401 = vmatmul.msk.f32.gmra.mxu2 %vm1111_vm5, %v3119_v10 }
 0x769   : > { %v1778_v12 = vsel %vm1777_vm4, %v2563_v2, %v1774_v45 }
 0x76a   : > { %v1781_v16 = vmul.f32 %v1778_v12, %v1730_v32 }
 0x76c   : > { %v1787_v14 = vmul.f32 %v2502_v46, %v1781_v16 }
 0x76e   : > { %v3123_v17 = vadd.f32 %v2503_v51, %v1787_v14 }
 0x770   : > { %2402 = vmatmul.msk.f32.gmra.mxu2 %vm1111_vm5, %v3123_v17 }
 0x7b7   : > { %v1823_v24 = vpop.f32.mrf.mxu2 }
 0x7b8   : > { %v1824_v49 = vadd.f32 %v2504_v22, %v1823_v24 }
 0x7ba   : > { %v2403_v27 = vmul.f32 -1.702, %v1824_v49 }
 0x7bc   : > { %v1838_v28 = vmul.f32 1.442695, %v2403_v27 }
 0x7be   : > { %2564 = vpow2.f32 %v1838_v28 }
 0x7c4   : > { %v2565_v30 = vpop.eup %2564 }
 0x7c5   : > { %v1844_v11 = vadd.f32 1.0, %v2565_v30 }
 0x7c7   : > { %2566 = vrcp.f32 %v1844_v11  ;;  %v1858_v33 = vand.u32 2147483648, %v1844_v11  ;;  %v1856_v34 = vand.u32 2147483647, %v1844_v11  ;;  %vm1852_vm7 = vweird.f32 %v1844_v11 }
 0x7c9   : > { %v1859_v36 = vor.u32 1.1754944e-38, %v1858_v33  ;;  %vm1857_vm9 = vcmp.eq.f32.partialorder %v1856_v34, 8.507059e+37 }
 0x7cd   : > { %v2567_v31 = vpop.eup %2566 }
 0x7ce   : > { %v1848_v59 = vmul.f32 %v2567_v31, %v1844_v11  ;;  %vm1853_vm6 = vweird.f32 %v2567_v31 }
 0x7cf   : > { %vm1854_vm8 = vmor %vm1852_vm7, %vm1853_vm6 }
 0x7d0   : > { %v1849_v32 = vsub.f32 1.0, %v1848_v59 }
 0x7d2   : > { %v1850_v29 = vmul.f32 %v2567_v31, %v1849_v32 }
 0x7d4   : > { %v1851_v35 = vadd.f32 %v2567_v31, %v1850_v29 }
 0x7d6   : > { %v1855_v37 = vsel %vm1854_vm8, %v2567_v31, %v1851_v35 }
 0x7d7   : > { %v1860_v38 = vsel %vm1857_vm9, %v1859_v36, %v1855_v37 }
 0x7d8   : > { %v1892_v39 = vmul.f32 %v1860_v38, %v1824_v49 }
 0x7da   : > { %2406 = vmatmul.msk.f32.vlgmr.msra.gmra.mxu3 %vm1898_vm11, %v1892_v39 }
 0x7eb   : > { %v1826_v40 = vpop.f32.mrf.mxu2 }
 0x7ec   : > { %v1827_v41 = vadd.f32 %v2504_v22, %v1826_v40 }
 0x7ee   : > { %v2404_v42 = vmul.f32 -1.702, %v1827_v41 }
 0x7f0   : > { %v1840_v43 = vmul.f32 1.442695, %v2404_v42 }
 0x7f2   : > { %2568 = vpow2.f32 %v1840_v43 }
 0x7f3   : > { %v1829_v44 = vpop.f32.mrf.mxu2 }
 0x7f4   : > { %v1830_v46 = vadd.f32 %v2504_v22, %v1829_v44 }
 0x7f6   : > { %v2405_v47 = vmul.f32 -1.702, %v1830_v46 }
 0x7f8   : > { %v2569_v50 = vpop.eup %2568  ;;  %v1842_v51 = vmul.f32 1.442695, %v2405_v47 }
 0x7f9   : > { %v1845_v52 = vadd.f32 1.0, %v2569_v50 }
 0x7fa   : > { %2570 = vpow2.f32 %v1842_v51  ;;  %v2506_v51 = vld [vmem:[%s3278_s0] ss:$0 sm:$0xff] }
 0x7fb   : > { %2572 = vrcp.f32 %v1845_v52  ;;  %v1873_v61 = vand.u32 2147483648, %v1845_v52  ;;  %v1871_v63 = vand.u32 2147483647, %v1845_v52  ;;  %vm1867_vm13 = vweird.f32 %v1845_v52 }
 0x7fd   : > { %v1874_v1 = vor.u32 1.1754944e-38, %v1873_v61  ;;  %vm1872_vm15 = vcmp.eq.f32.partialorder %v1871_v63, 8.507059e+37 }
 0x800   : > { %v2571_v54 = vpop.eup %2570 }
 0x801   : > { %v2573_v55 = vpop.eup %2572  ;;  %v1846_v56 = vadd.f32 1.0, %v2571_v54  ;;  %v2507_v54 = vld [vmem:[%s3279_s21] ss:$0 sm:$0xff] }
 0x802   : > { %v1863_v57 = vmul.f32 %v2573_v55, %v1845_v52  ;;  %vm1868_vm12 = vweird.f32 %v2573_v55 }
 0x803   : > { %2574 = vrcp.f32 %v1846_v56  ;;  %vm1869_vm14 = vmor %vm1867_vm13, %vm1868_vm12  ;;  %v1888_v6 = vand.u32 2147483648, %v1846_v56  ;;  %v1886_v8 = vand.u32 2147483647, %v1846_v56  ;;  %vm1882_vm1 = vweird.f32 %v1846_v56 }
 0x804   : > { %v1864_v58 = vsub.f32 1.0, %v1863_v57 }
 0x805   : > { %v1889_v45 = vor.u32 1.1754944e-38, %v1888_v6  ;;  %vm1887_vm3 = vcmp.eq.f32.partialorder %v1886_v8, 8.507059e+37 }
 0x806   : > { %v1865_v62 = vmul.f32 %v2573_v55, %v1864_v58 }
 0x808   : > { %v1866_v0 = vadd.f32 %v2573_v55, %v1865_v62 }
 0x809   : > { %v2575_v60 = vpop.eup %2574 }
 0x80a   : > { %v1870_v2 = vsel %vm1869_vm14, %v2573_v55, %v1866_v0  ;;  %v1878_v3 = vmul.f32 %v2575_v60, %v1846_v56  ;;  %vm1883_vm0 = vweird.f32 %v2575_v60 }
 0x80b   : > { %v1875_v13 = vsel %vm1872_vm15, %v1874_v1, %v1870_v2  ;;  %vm1884_vm2 = vmor %vm1882_vm1, %vm1883_vm0 }
 0x80c   : > { %v1893_v4 = vmul.f32 %v1875_v13, %v1827_v41  ;;  %v1879_v5 = vsub.f32 1.0, %v1878_v3 }
 0x80e   : > { %v1880_v7 = vmul.f32 %v2575_v60, %v1879_v5  ;;  %2407 = vmatmul.msk.f32.gmra.mxu3 %vm1898_vm11, %v1893_v4 }
 0x810   : > { %v1881_v9 = vadd.f32 %v2575_v60, %v1880_v7 }
 0x812   : > { %v1885_v12 = vsel %vm1884_vm2, %v2575_v60, %v1881_v9 }
 0x813   : > { %v1890_v16 = vsel %vm1887_vm3, %v1889_v45, %v1885_v12 }
 0x814   : > { %v1894_v14 = vmul.f32 %v1890_v16, %v1830_v46 }
 0x816   : > { %2408 = vmatmul.msk.f32.gmra.mxu3 %vm1898_vm11, %v1894_v14 }
 0x85d   : > { %v1925_v19 = vpop.f32.mrf.mxu3 }
 0x85e   : > { %v1926_v15 = vadd.f32 %v2505_v18, %v1925_v19 }
 0x860   : > { %v1934_v20 = vadd.f32 %v1926_v15, %v3113_v53 }
 0x862   : > { %v1937_v48 = vsel %vm1111_vm5, %v1934_v20, 0.0 }
 0x863   : > { %1938 = vadd.xlane.f32.xlu1 %v1937_v48 }
 0x891   : > { %v1928_v22 = vpop.f32.mrf.mxu3 }
 0x892   : > { %v1929_v23 = vadd.f32 %v2505_v18, %v1928_v22 }
 0x894   : > { %v1935_v24 = vadd.f32 %v1929_v23, %v3119_v10 }
 0x896   : > { %v1940_v25 = vsel %vm1111_vm5, %v1935_v24, 0.0 }
 0x897   : > { %1941 = vadd.xlane.f32.xlu0 %v1940_v25 }
 0x899   : > { %v1931_v49 = vpop.f32.mrf.mxu3 }
 0x89a   : > { %v1932_v26 = vadd.f32 %v2505_v18, %v1931_v49 }
 0x89c   : > { %v1936_v27 = vadd.f32 %v1932_v26, %v3123_v17 }
 0x89e   : > { %v1943_v28 = vsel %vm1714_vm10, %v1936_v27, 0.0 }
 0x89f   : > { %1944 = vadd.xlane.f32.xlu2 %v1943_v28 }
 0x8d6   : > { %v1939_v30 = vpop.xlane.xlu1 %1938 }
 0x8d7   : > { %v1946_v53 = vmul.f32 %v1939_v30, %v3092_v21 }
 0x8d9   : > { %v1949_v11 = vsub.f32 %v1934_v20, %v1946_v53 }
 0x8db   : > { %v1952_v31 = vmul.f32 %v1949_v11, %v1949_v11 }
 0x8dd   : > { %v1955_v59 = vsel %vm1111_vm5, %v1952_v31, 0.0 }
 0x8de   : > { %1956 = vadd.xlane.f32.xlu1 %v1955_v59 }
 0x90a   : > { %v1942_v32 = vpop.xlane.xlu0 %1941 }
 0x90b   : > { %v1947_v10 = vmul.f32 %v1942_v32, %v3092_v21 }
 0x90d   : > { %v1950_v33 = vsub.f32 %v1935_v24, %v1947_v10 }
 0x90f   : > { %v1953_v29 = vmul.f32 %v1950_v33, %v1950_v33 }
 0x911   : > { %v1958_v34 = vsel %vm1111_vm5, %v1953_v29, 0.0 }
 0x912   : > { %1959 = vadd.xlane.f32.xlu0 %v1958_v34  ;;  %v1945_v17 = vpop.xlane.xlu2 %1944 }
 0x913   : > { %v1948_v35 = vmul.f32 %v1945_v17, %v3092_v21 }
 0x915   : > { %v1951_v36 = vsub.f32 %v1936_v27, %v1948_v35 }
 0x917   : > { %v1954_v37 = vmul.f32 %v1951_v36, %v1951_v36 }
 0x919   : > { %v1961_v38 = vsel %vm1714_vm10, %v1954_v37, 0.0 }
 0x91a   : > { %1962 = vadd.xlane.f32.xlu2 %v1961_v38 }
 0x951   : > { %v1957_v39 = vpop.xlane.xlu1 %1956 }
 0x952   : > { %v1964_v40 = vmul.f32 %v1957_v39, %v3092_v21 }
 0x954   : > { %v1967_v41 = vadd.f32 1e-05, %v1964_v40 }
 0x956   : > { %2576 = vrsqrt.f32 %v1967_v41  ;;  %vm1976_vm6 = vweird.f32 %v1967_v41 }
 0x95c   : > { %v2577_v42 = vpop.eup %2576 }
 0x95d   : > { %v1971_v43 = vmul.f32 %v2577_v42, %v1967_v41  ;;  %vm1977_vm4 = vweird.f32 %v2577_v42 }
 0x95e   : > { %vm1978_vm7 = vmor %vm1976_vm6, %vm1977_vm4 }
 0x95f   : > { %v1972_v44 = vmul.f32 %v2577_v42, %v1971_v43 }
 0x961   : > { %v1973_v46 = vmul.f32 0.5, %v1972_v44 }
 0x963   : > { %v1974_v47 = vsub.f32 1.5, %v1973_v46 }
 0x965   : > { %v1975_v50 = vmul.f32 %v2577_v42, %v1974_v47 }
 0x967   : > { %v1979_v52 = vsel %vm1978_vm7, %v2577_v42, %v1975_v50 }
 0x968   : > { %v2000_v55 = vmul.f32 %v1979_v52, %v1949_v11 }
 0x96a   : > { %v2006_v56 = vmul.f32 %v2506_v51, %v2000_v55 }
 0x96c   : > { %v2012_v57 = vadd.f32 %v2507_v54, %v2006_v56 }
 0x96e   : > { %2015 = vst.msk [vmem:[#allocation2] sm:$0xff] %vm1111_vm5, %v2012_v57 }
 0x985   : > { %v1960_v58 = vpop.xlane.xlu0 %1959 }
 0x986   : > { %v1965_v61 = vmul.f32 %v1960_v58, %v3092_v21 }
 0x988   : > { %v1968_v62 = vadd.f32 1e-05, %v1965_v61 }
 0x98a   : > { %2578 = vrsqrt.f32 %v1968_v62  ;;  %vm1986_vm9 = vweird.f32 %v1968_v62 }
 0x98d   : > { %v1963_v63 = vpop.xlane.xlu2 %1962 }
 0x98e   : > { %v1966_v0 = vmul.f32 %v1963_v63, %v3092_v21 }
 0x990   : > { %v2579_v60 = vpop.eup %2578  ;;  %v1969_v1 = vadd.f32 1e-05, %v1966_v0 }
 0x991   : > { %v1981_v2 = vmul.f32 %v2579_v60, %v1968_v62  ;;  %vm1987_vm8 = vweird.f32 %v2579_v60 }
 0x992   : > { %2580 = vrsqrt.f32 %v1969_v1  ;;  %vm1988_vm11 = vmor %vm1986_vm9, %vm1987_vm8  ;;  %vm1996_vm13 = vweird.f32 %v1969_v1 }
 0x993   : > { %v1982_v3 = vmul.f32 %v2579_v60, %v1981_v2 }
 0x995   : > { %v1983_v13 = vmul.f32 0.5, %v1982_v3 }
 0x997   : > { %v1984_v4 = vsub.f32 1.5, %v1983_v13 }
 0x998   : > { %v2581_v5 = vpop.eup %2580 }
 0x999   : > { %v1985_v6 = vmul.f32 %v2579_v60, %v1984_v4  ;;  %v1991_v7 = vmul.f32 %v2581_v5, %v1969_v1  ;;  %vm1997_vm12 = vweird.f32 %v2581_v5 }
 0x99a   : > { %vm1998_vm14 = vmor %vm1996_vm13, %vm1997_vm12 }
 0x99b   : > { %v1989_v8 = vsel %vm1988_vm11, %v2579_v60, %v1985_v6  ;;  %v1992_v9 = vmul.f32 %v2581_v5, %v1991_v7 }
 0x99c   : > { %v2001_v45 = vmul.f32 %v1989_v8, %v1950_v33 }
 0x99d   : > { %v1993_v12 = vmul.f32 0.5, %v1992_v9 }
 0x99e   : > { %v2007_v16 = vmul.f32 %v2506_v51, %v2001_v45 }
 0x99f   : > { %v1994_v14 = vsub.f32 1.5, %v1993_v12 }
 0x9a0   : > { %v2013_v21 = vadd.f32 %v2507_v54, %v2007_v16 }
 0x9a1   : > { %v1995_v18 = vmul.f32 %v2581_v5, %v1994_v14 }
 0x9a2   : > { %2016 = vst.msk [vmem:[#allocation2 + $0x8] sm:$0xff] %vm1111_vm5, %v2013_v21 }
 0x9a3   : > { %v1999_v19 = vsel %vm1998_vm14, %v2581_v5, %v1995_v18 }
 0x9a4   : > { %v2002_v15 = vmul.f32 %v1999_v19, %v1951_v36 }
 0x9a6   : > { %v2008_v20 = vmul.f32 %v2506_v51, %v2002_v15  ;;  %2021 = sbr.rel (%p2409_p9) target bundleno = 2637 (0xa4d), region = 120 }
 0x9a8   : > { %v2014_v48 = vadd.f32 %v2507_v54, %v2008_v20 }
 0x9aa   : > { %2017 = vst.msk [vmem:[#allocation2 + $0x10] sm:$0x1] %vm1714_vm10, %v2014_v48 }
 0x9ab   : > { %v2023_v22 = vld [vmem:[%s3280_s28 + $0x8] sm:$0xff]  ;;  %v2022_v23 = vld [vmem:[%s3281_s26] sm:$0xff]  ;;  %vm2031_vm15 = vcmask 1046528   ;;  %v2032_v24 = vrot.slane %v2012_v57, 1  ;;  %v2033_v25 = vrot.slane %v2013_v21, 1  ;;  %v2035_v49 = vrot.slane %v2014_v48, 1 }
 0x9ac   : > { %2055 = vmatpush.msra.mxu0 %v2023_v22  ;;  %2430 = vmatpush.msra.mxu1 %v2023_v22  ;;  %v2582_v28 = vld [vmem:[%s3282_s5] ss:$0 sm:$0xff] }
 0x9ad   : > { %v2034_v26 = vsel %vm2031_vm15, %v2032_v24, %v2033_v25  ;;  %v2036_v27 = vsel %vm2031_vm15, %v2033_v25, %v2035_v49 }
 0x9ae   : > { %2056 = vmatpush.msra.mxu0 %v2022_v23  ;;  %2431 = vmatpush.msra.mxu1 %v2022_v23 }
 0x9af   : > { %2410 = vmatmul.msk.f32.vlgmr.msra.gmra.mxu0 %vm1111_vm5, %v2034_v26  ;;  %2411 = vmatmul.msk.f32.vlgmr.msra.gmra.mxu1 %vm1111_vm5, %v2036_v27 }
 0xa2c   : > { %v2058_v30 = vpop.f32.mrf.mxu0  ;;  %v2061_v53 = vpop.f32.mrf.mxu1 }
 0xa2d   : > { %v2059_v11 = vadd.f32 %v2582_v28, %v2058_v30  ;;  %v2062_v31 = vadd.f32 %v2582_v28, %v2061_v53 }
 0xa2f   : > { %v2412_v59 = vmul.f32 -1.442695, %v2059_v11  ;;  %v2413_v32 = vmul.f32 -1.442695, %v2062_v31 }
 0xa31   : > { %2583 = vpow2.f32 %v2412_v59 }
 0xa32   : > { %2585 = vpow2.f32 %v2413_v32 }
 0xa37   : > { %v2584_v10 = vpop.eup %2583 }
 0xa38   : > { %v2586_v33 = vpop.eup %2585  ;;  %v2070_v29 = vadd.f32 1.0, %v2584_v10 }
 0xa39   : > { %v2071_v34 = vadd.f32 1.0, %v2586_v33 }
 0xa3a   : > { %2587 = vrcp.f32 %v2070_v29  ;;  %v2083_v39 = vand.u32 2147483648, %v2070_v29  ;;  %v2081_v42 = vand.u32 2147483647, %v2070_v29  ;;  %vm2077_vm1 = vweird.f32 %v2070_v29 }
 0xa3b   : > { %2589 = vrcp.f32 %v2071_v34  ;;  %v2098_v43 = vand.u32 2147483648, %v2071_v34  ;;  %v2096_v46 = vand.u32 2147483647, %v2071_v34  ;;  %vm2092_vm3 = vweird.f32 %v2071_v34 }
 0xa3c   : > { %v2084_v50 = vor.u32 1.1754944e-38, %v2083_v39  ;;  %vm2082_vm4 = vcmp.eq.f32.partialorder %v2081_v42, 8.507059e+37 }
 0xa3d   : > { %v2099_v54 = vor.u32 1.1754944e-38, %v2098_v43  ;;  %vm2097_vm7 = vcmp.eq.f32.partialorder %v2096_v46, 8.507059e+37 }
 0xa40   : > { %v2588_v17 = vpop.eup %2587 }
 0xa41   : > { %v2590_v35 = vpop.eup %2589  ;;  %v2073_v36 = vmul.f32 %v2588_v17, %v2070_v29  ;;  %vm2078_vm10 = vweird.f32 %v2588_v17 }
 0xa42   : > { %v2088_v37 = vmul.f32 %v2590_v35, %v2071_v34  ;;  %vm2093_vm0 = vweird.f32 %v2590_v35  ;;  %vm2079_vm2 = vmor %vm2077_vm1, %vm2078_vm10 }
 0xa43   : > { %v2074_v38 = vsub.f32 1.0, %v2073_v36  ;;  %vm2094_vm6 = vmor %vm2092_vm3, %vm2093_vm0 }
 0xa44   : > { %v2089_v40 = vsub.f32 1.0, %v2088_v37 }
 0xa45   : > { %v2075_v41 = vmul.f32 %v2588_v17, %v2074_v38 }
 0xa46   : > { %v2090_v44 = vmul.f32 %v2590_v35, %v2089_v40 }
 0xa47   : > { %v2076_v47 = vadd.f32 %v2588_v17, %v2075_v41 }
 0xa48   : > { %v2091_v51 = vadd.f32 %v2590_v35, %v2090_v44 }
 0xa49   : > { %v2080_v52 = vsel %vm2079_vm2, %v2588_v17, %v2076_v47 }
 0xa4a   : > { %v2085_v55 = vsel %vm2082_vm4, %v2084_v50, %v2080_v52  ;;  %v2095_v56 = vsel %vm2094_vm6, %v2590_v35, %v2091_v51 }
 0xa4b   : > { %2102 = vst.msk [vmem:[%s2862_s19] sm:$0xff] %vm1111_vm5, %v2085_v55  ;;  %v2100_v57 = vsel %vm2097_vm7, %v2099_v54, %v2095_v56 }
 0xa4c   : > { %2103 = vst.msk [vmem:[%s2862_s19 + $0x8] sm:$0xff] %vm1111_vm5, %v2100_v57 }
 0xa4d PF: > { %s3283_s18 = sld [smem:[#allocation5_spill]] }
 0xa4e   : > { %s3284_s3 = sld [smem:[#allocation3_spill]] }
 0xa4f   : > { %s3285_s28 = sld [smem:[#allocation4_spill]] }
 0xa50   : > { %s3286_s29 = sld [smem:[#allocation6_spill]] }
 0xa51   : > { %s3287_s30 = sld [smem:[#allocation7_spill]] }
 0xa53   : > { %s32_s4 = sadd.s32 1, %s3283_s18  }
 0xa54   : > { %p29_p10 = scmp.ge.s32.totalorder %s32_s4, 8  }
 0xa56   :  { %31 = sbr.rel (!%p29_p10) target bundleno = 16 (0x10), region = 195 }

</bundles_post_ra>
